<compile_context>
chip_gen: v6e
topology: v6e:2x2x1
jax: 0.10.0
libtpu: 0.0.40
codegen_flags: <defaults>
</compile_context>

<pallas_src>
import functools

import jax
import jax.numpy as jnp
from jax.experimental import pallas as pl
from jax.experimental.pallas import tpu as pltpu

KERNEL_SIZE = 7
PAD = KERNEL_SIZE // 2

# Use the MXU (banded-matrix) epilogue whenever the (2, HW, HW) f32 matrix fits
# comfortably in VMEM; otherwise fall back to the lane-roll epilogue.
_MATMUL_MAT_MAX_BYTES = 8 << 20


# ---------------------------------------------------------------------------
# Kernel
# ---------------------------------------------------------------------------
def _roll_conv(w_ref, sum_v, max_v, *, H, W):
    """Fallback 7x7 conv: 49 lane rolls on a sublane-stacked (sum, max) slab.

    One pltpu.roll per tap serves both feature planes; border handling is a
    single f32 mask multiplier per tap (row mask recomputed per dh).
    """
    K = KERNEL_SIZE
    Bt, HW = sum_v.shape
    stacked = jnp.concatenate([sum_v, max_v], axis=0)            # (2*Bt, HW)
    pos = jax.lax.broadcasted_iota(jnp.int32, (2 * Bt, HW), 1)
    row = pos // W
    col = pos % W
    acc = jnp.zeros((Bt, HW), jnp.float32)
    for dh in range(K):
        rr = row + (dh - PAD)
        row_ok = (rr >= 0) & (rr < H)
        for dw in range(K):
            cc = col + (dw - PAD)
            mask = (row_ok & (cc >= 0) & (cc < W)).astype(jnp.float32)
            dflat = (dh - PAD) * W + (dw - PAD)
            if dflat == 0:
                shifted = stacked
            else:
                # shifted[p] = stacked[(p + dflat) mod HW]; wrapped elements
                # are zeroed by the border mask below.
                shifted = pltpu.roll(stacked, shift=(-dflat) % HW, axis=1)
            masked = shifted * mask
            w_avg = w_ref[0 * K * K + dh * K + dw]               # SMEM scalar
            w_max = w_ref[1 * K * K + dh * K + dw]
            acc = acc + w_avg * masked[:Bt, :] + w_max * masked[Bt:, :]
    return acc


def _spatial_attention_kernel(tap_ref, x_ref, o_ref, sum_ref, max_ref, *,
                              H, W, C, use_matmul, mask_tail):
    # tap_ref : matmul path -> (2, HW, HW) f32 VMEM  banded conv matrices
    #           roll path   -> (98,)       f32 SMEM  flat conv weights
    # x_ref   : (Bt, Ct, HW) VMEM  lane-dense input block (channels streamed)
    # o_ref   : (Bt, 1, HW)  VMEM  lane-dense output block
    # sum_ref : (Bt, HW) f32 VMEM  running channel sum  (persists over c steps)
    # max_ref : (Bt, HW) f32 VMEM  running channel max
    Bt, Ct, HW = x_ref.shape
    c_step = pl.program_id(1)
    n_c_steps = pl.num_programs(1)

    # ---- streamed channel reduction: one whole-tile, vreg-aligned reduce ----
    x = x_ref[...].astype(jnp.float32)                           # (Bt, Ct, HW)
    if mask_tail:
        # Channel axis was zero-padded in the wrapper; mask the tail channels.
        ch = c_step * Ct + jax.lax.broadcasted_iota(jnp.int32, x.shape, 1)
        valid = ch < C
        part_sum = jnp.sum(jnp.where(valid, x, 0.0), axis=1)
        part_max = jnp.max(
            jnp.where(valid, x, jnp.finfo(jnp.float32).min), axis=1)
    else:
        part_sum = jnp.sum(x, axis=1)
        part_max = jnp.max(x, axis=1)

    @pl.when(c_step == 0)
    def _():
        sum_ref[...] = part_sum
        max_ref[...] = part_max

    @pl.when(c_step > 0)
    def _():
        sum_ref[...] = sum_ref[...] + part_sum
        max_ref[...] = jnp.maximum(max_ref[...], part_max)

    # ---- epilogue on the last channel step: 7x7 conv + sigmoid --------------
    @pl.when(c_step == n_c_steps - 1)
    def _():
        s = sum_ref[...]       # raw channel sum (1/C is folded into the taps)
        m = max_ref[...]       # channel max
        if use_matmul:
            acc = jnp.dot(s, tap_ref[0],
                          preferred_element_type=jnp.float32,
                          precision=jax.lax.Precision.HIGHEST)
            acc = acc + jnp.dot(m, tap_ref[1],
                                preferred_element_type=jnp.float32,
                                precision=jax.lax.Precision.HIGHEST)
        else:
            acc = _roll_conv(tap_ref, s, m, H=H, W=W)
        o_ref[:, 0, :] = jax.nn.sigmoid(acc).astype(o_ref.dtype)


# ---------------------------------------------------------------------------
# Wrapper helpers
# ---------------------------------------------------------------------------
def _physical_vmem_bytes():
    """Per-TensorCore physical VMEM (128 MiB v5e/v6e, 64 MiB v7x).

    Falls back to the most conservative generation (64 MiB) if unavailable."""
    try:
        info = pltpu.get_tpu_info()
        v = getattr(info, "vmem_capacity_bytes", None)
        if v:
            return int(v)
    except Exception:
        pass
    return 64 << 20


def _pick_batch_tile(n):
    """Largest divisor of n, capped at 8, chosen so that N >= 2 always yields
    >= 2 parallel batch grid steps (keeps both v7x TensorCores busy).
    N == 1 necessarily leaves one v7x TensorCore idle."""
    # TODO(synk): for N == 1 latency-critical inference, add a parallel channel
    # split with a tiny second combine kernel so both v7x cores get work.
    cap = 8 if n >= 16 else max(1, n // 2)
    cap = min(cap, n)
    for bt in range(cap, 0, -1):
        if n % bt == 0:
            return bt
    return 1


def _sublane_align(itemsize):
    return {4: 8, 2: 16, 1: 32}.get(itemsize, 8)


def _pick_block_budget(phys_vmem, conv_mat_bytes):
    """Per-input-block byte budget: large DMA blocks (up to 16 MiB) amortize
    the ~0.35 us per-grid-step overhead, while 3x block (Buffered(3)) + conv
    matrices + output + scratch stays within ~75% of physical VMEM."""
    usable = int(phys_vmem * 0.75) - 2 * conv_mat_bytes - (6 << 20)
    return max(1 << 20, min(usable // 3, 16 << 20))


def _pick_channel_tile(C, bt, hw, itemsize, budget_bytes):
    """Channel tile (ct) and padded channel count (Cpad).

    ct is a multiple of the dtype's sublane alignment unless all of C fits in
    one block.  If no reasonably sized aligned divisor of C fits the budget,
    C is zero-padded up to a multiple of ct and the kernel masks the tail."""
    align = _sublane_align(itemsize)
    max_ct = max(1, budget_bytes // max(1, bt * hw * itemsize))
    if C <= max_ct:
        return C, C                      # single channel step, full-dim block
    ct = max(align, (max_ct // align) * align)
    t = ct
    while t >= align and t * 2 >= ct:    # prefer an aligned divisor near budget
        if C % t == 0:
            return t, C
        t -= align
    c_pad = -(-C // ct) * ct             # pad + mask in kernel
    return ct, c_pad


def _build_conv_matrices(weight, C, H, W):
    """Banded (2, HW, HW) f32 matrices M such that, with f0 = channel-sum(x)
    and f1 = channel-max(x) flattened to HW lanes,
        conv7x7(concat([mean, max])) == f0 @ M[0] + f1 @ M[1].
    The 1/C of the channel mean is folded into M[0]."""
    K = KERNEL_SIZE
    HW = H * W
    w = weight.astype(jnp.float32).reshape(2, K, K)
    w = w * jnp.array([1.0 / C, 1.0], jnp.float32)[:, None, None]
    pos = jnp.arange(HW, dtype=jnp.int32)
    pr, pc = pos // W, pos % W
    dr = pr[:, None] - pr[None, :]       # [q, p] : input row minus output row
    dc = pc[:, None] - pc[None, :]
    in_win = (jnp.abs(dr) <= PAD) & (jnp.abs(dc) <= PAD)
    idx_r = jnp.clip(dr + PAD, 0, K - 1)
    idx_c = jnp.clip(dc + PAD, 0, K - 1)
    taps = w[:, idx_r, idx_c]            # (2, HW, HW) gather of tap weights
    return jnp.where(in_win[None, :, :], taps, 0.0)


# ---------------------------------------------------------------------------
# Public entry point
# ---------------------------------------------------------------------------
def spatial_attention(x, weight):
    """x: (N, C, H, W); weight: (1, 2, 7, 7) conv weight (no bias).

    Computes sigmoid(conv7x7(concat([mean_c(x), max_c(x)], axis=1))) with
    padding=3 — identical semantics to the PyTorch SpatialAttention module.
    """
    N, C, H, W = x.shape
    HW = H * W
    K = KERNEL_SIZE
    assert weight.shape == (1, 2, K, K)
    itemsize = x.dtype.itemsize
    phys_vmem = _physical_vmem_bytes()

    conv_mat_bytes = 2 * HW * HW * 4
    use_matmul = conv_mat_bytes <= _MATMUL_MAT_MAX_BYTES

    if use_matmul:
        taps = _build_conv_matrices(weight, C, H, W)             # (2, HW, HW)
        tap_spec = pl.BlockSpec((2, HW, HW), lambda b, c: (0, 0, 0))
        tap_vmem_bytes = conv_mat_bytes
    else:
        # Lane-roll fallback: flat SMEM weights with the 1/C mean fold.
        w = weight.astype(jnp.float32).reshape(2, K * K)
        w = w * jnp.array([[1.0 / C], [1.0]], jnp.float32)
        taps = w.reshape(-1)                                     # (98,)
        tap_spec = pl.BlockSpec(memory_space=pltpu.MemorySpace.SMEM)
        tap_vmem_bytes = 0

    bt = _pick_batch_tile(N)
    block_budget = _pick_block_budget(phys_vmem, tap_vmem_bytes)
    ct, c_pad = _pick_channel_tile(C, bt, HW, itemsize, block_budget)

    # TODO(synk): if HW < 128 (tiny late-stage feature maps), pack several
    # images along the lane axis for lane-dense stores instead of underfilling.
    x_flat = x.reshape(N, C, HW)            # free metadata reshape (NCHW)
    if c_pad != C:
        x_flat = jnp.pad(x_flat, ((0, 0), (0, c_pad - C), (0, 0)))

    n_b_steps = N // bt
    n_c_steps = c_pad // ct

    # Deeper input buffering bridges the conv-epilogue bubble between batch
    # tiles; only worth it when there are enough grid steps to pipeline.
    x_index = lambda b, c: (b, c, 0)
    n_buf = 2
    x_spec = pl.BlockSpec((bt, ct, HW), x_index)
    if n_b_steps * n_c_steps >= 3:
        try:
            x_spec = pl.BlockSpec((bt, ct, HW), x_index,
                                  pipeline_mode=pl.Buffered(3))
            n_buf = 3
        except TypeError:                    # BlockSpec without pipeline_mode
            pass

    # Generation-aware VMEM limit: cover buffered input + conv matrices +
    # output + scratch, stay under physical capacity (64 MiB/TC on v7x).
    need = (n_buf * bt * ct * HW * itemsize
            + 2 * tap_vmem_bytes
            + 2 * bt * HW * itemsize
            + 2 * bt * HW * 4
            + (4 << 20))
    vmem_limit = min(max(need, 32 << 20), phys_vmem - (4 << 20))
    vmem_limit = max(vmem_limit, need)

    kernel = functools.partial(
        _spatial_attention_kernel, H=H, W=W, C=C,
        use_matmul=use_matmul, mask_tail=(c_pad != C))

    out_flat = pl.pallas_call(
        kernel,
        out_shape=jax.ShapeDtypeStruct((N, 1, HW), x.dtype),
        grid=(n_b_steps, n_c_steps),
        in_specs=[tap_spec, x_spec],
        out_specs=pl.BlockSpec((bt, 1, HW), lambda b, c: (b, 0, 0)),
        scratch_shapes=[
            pltpu.VMEM((bt, HW), jnp.float32),   # running channel sum
            pltpu.VMEM((bt, HW), jnp.float32),   # running channel max
        ],
        compiler_params=pltpu.CompilerParams(
            dimension_semantics=("parallel", "arbitrary"),
            vmem_limit_bytes=int(vmem_limit)),
    )(taps, x_flat)

    return out_flat.reshape(N, 1, H, W)


def spatial_attention_ref(x, weight):
    """Pure-JAX reference matching the PyTorch module semantics."""
    avg_out = jnp.mean(x, axis=1, keepdims=True)
    max_out = jnp.max(x, axis=1, keepdims=True)
    feat = jnp.concatenate([avg_out, max_out], axis=1)           # (N, 2, H, W)
    conv = jax.lax.conv_general_dilated(
        feat, weight,
        window_strides=(1, 1),
        padding=[(PAD, PAD), (PAD, PAD)],
        dimension_numbers=("NCHW", "OIHW", "NCHW"),
        precision=jax.lax.Precision.HIGHEST,
    )
    return jax.nn.sigmoid(conv)


if __name__ == "__main__":
    key = jax.random.PRNGKey(0)
    kx, kw = jax.random.split(key)

    N, C, H, W = 2, 4, 16, 16
    x = jax.random.normal(kx, (N, C, H, W), dtype=jnp.float32)

    # Deterministic conv weight init (kaiming-uniform-like bound, as in PyTorch).
    fan_in = 2 * KERNEL_SIZE * KERNEL_SIZE
    bound = 1.0 / (fan_in ** 0.5)
    weight = jax.random.uniform(
        kw, (1, 2, KERNEL_SIZE, KERNEL_SIZE),
        minval=-bound, maxval=bound, dtype=jnp.float32)

    out = spatial_attention(x, weight)
    out = jax.block_until_ready(out)

    ref = spatial_attention_ref(x, weight)
    assert out.shape == (N, 1, H, W)
    max_err = jnp.max(jnp.abs(out - ref))
    assert jnp.allclose(out, ref, atol=1e-4, rtol=1e-4), (
        f"max abs err = {max_err}")

    print("KERNEL_OK")
</pallas_src>

<mosaic_0001>
module attributes {stable_mosaic.version = 11 : i64} {
  func.func @_spatial_attention_kernel(%arg0: i32, %arg1: i32, %arg2: memref<2x256x256xf32, #tpu.memory_space<vmem>>, %arg3: memref<1x4x256xf32, #tpu.memory_space<vmem>>, %arg4: memref<1x1x256xf32, #tpu.memory_space<vmem>>, %arg5: memref<1x256xf32, #tpu.memory_space<vmem>>, %arg6: memref<1x256xf32, #tpu.memory_space<vmem>>) attributes {dimension_semantics = [#tpu.dimension_semantics<parallel>, #tpu.dimension_semantics<arbitrary>], iteration_bounds = array<i64: 2, 1>, scalar_prefetch = 0 : i64, scratch_operands = 2 : i64, tpu.core_type = #tpu.core_type<tc>, window_params = [{pipeline_mode = #tpu.pipeline_mode<synchronous>, transform_indices = @transform_0, window_bounds = array<i64: 2, 256, 256>}, {transform_indices = @transform_1, window_bounds = array<i64: 1, 4, 256>}, {transform_indices = @transform_2, window_bounds = array<i64: 1, 1, 256>}]} {
    %c0 = arith.constant 0 : index
    %c0_0 = arith.constant 0 : index
    %c0_1 = arith.constant 0 : index
    %0 = vector.load %arg3[%c0, %c0_0, %c0_1] : memref<1x4x256xf32, #tpu.memory_space<vmem>>, vector<1x4x256xf32>
    %cst = arith.constant dense<0.000000e+00> : vector<1x256xf32>
    %1 = vector.multi_reduction <add>, %0, %cst [1] : vector<1x4x256xf32> to vector<1x256xf32>
    %cst_2 = arith.constant dense<0xFF800000> : vector<1x256xf32>
    %2 = vector.multi_reduction <maximumf>, %0, %cst_2 [1] : vector<1x4x256xf32> to vector<1x256xf32>
    %c0_i32 = arith.constant 0 : i32
    %3 = arith.cmpi eq, %arg1, %c0_i32 : i32
    %4 = arith.extui %3 : i1 to i32
    %c0_i32_3 = arith.constant 0 : i32
    %5 = arith.cmpi ne, %4, %c0_i32_3 : i32
    scf.if %5 {
      %c0_8 = arith.constant 0 : index
      %c0_9 = arith.constant 0 : index
      %12 = vector.load %arg5[%c0_8, %c0_9] : memref<1x256xf32, #tpu.memory_space<vmem>>, vector<1x256xf32>
      tpu.vector_store %arg5[%c0_8, %c0_9], %1 {strides = array<i32>} : memref<1x256xf32, #tpu.memory_space<vmem>>, vector<1x256xf32>,
      %c0_10 = arith.constant 0 : index
      %c0_11 = arith.constant 0 : index
      %13 = vector.load %arg6[%c0_10, %c0_11] : memref<1x256xf32, #tpu.memory_space<vmem>>, vector<1x256xf32>
      tpu.vector_store %arg6[%c0_10, %c0_11], %2 {strides = array<i32>} : memref<1x256xf32, #tpu.memory_space<vmem>>, vector<1x256xf32>,
    } else {
    }
    %c0_i32_4 = arith.constant 0 : i32
    %6 = arith.cmpi sgt, %arg1, %c0_i32_4 : i32
    %7 = arith.extui %6 : i1 to i32
    %c0_i32_5 = arith.constant 0 : i32
    %8 = arith.cmpi ne, %7, %c0_i32_5 : i32
    scf.if %8 {
      %c0_8 = arith.constant 0 : index
      %c0_9 = arith.constant 0 : index
      %12 = vector.load %arg5[%c0_8, %c0_9] : memref<1x256xf32, #tpu.memory_space<vmem>>, vector<1x256xf32>
      %13 = arith.addf %12, %1 : vector<1x256xf32>
      %c0_10 = arith.constant 0 : index
      %c0_11 = arith.constant 0 : index
      %14 = vector.load %arg5[%c0_10, %c0_11] : memref<1x256xf32, #tpu.memory_space<vmem>>, vector<1x256xf32>
      tpu.vector_store %arg5[%c0_10, %c0_11], %13 {strides = array<i32>} : memref<1x256xf32, #tpu.memory_space<vmem>>, vector<1x256xf32>,
      %c0_12 = arith.constant 0 : index
      %c0_13 = arith.constant 0 : index
      %15 = vector.load %arg6[%c0_12, %c0_13] : memref<1x256xf32, #tpu.memory_space<vmem>>, vector<1x256xf32>
      %16 = arith.maximumf %15, %2 : vector<1x256xf32>
      %c0_14 = arith.constant 0 : index
      %c0_15 = arith.constant 0 : index
      %17 = vector.load %arg6[%c0_14, %c0_15] : memref<1x256xf32, #tpu.memory_space<vmem>>, vector<1x256xf32>
      tpu.vector_store %arg6[%c0_14, %c0_15], %16 {strides = array<i32>} : memref<1x256xf32, #tpu.memory_space<vmem>>, vector<1x256xf32>,
    } else {
    }
    %c0_i32_6 = arith.constant 0 : i32
    %9 = arith.cmpi eq, %arg1, %c0_i32_6 : i32
    %10 = arith.extui %9 : i1 to i32
    %c0_i32_7 = arith.constant 0 : i32
    %11 = arith.cmpi ne, %10, %c0_i32_7 : i32
    scf.if %11 {
      %c0_8 = arith.constant 0 : index
      %c0_9 = arith.constant 0 : index
      %12 = vector.load %arg5[%c0_8, %c0_9] : memref<1x256xf32, #tpu.memory_space<vmem>>, vector<1x256xf32>
      %c0_10 = arith.constant 0 : index
      %c0_11 = arith.constant 0 : index
      %13 = vector.load %arg6[%c0_10, %c0_11] : memref<1x256xf32, #tpu.memory_space<vmem>>, vector<1x256xf32>
      %c0_12 = arith.constant 0 : index
      %c0_13 = arith.constant 0 : index
      %c0_14 = arith.constant 0 : index
      %14 = vector.load %arg2[%c0_12, %c0_13, %c0_14] : memref<2x256x256xf32, #tpu.memory_space<vmem>>, vector<1x256x256xf32>
      %15 = vector.shape_cast %14 : vector<1x256x256xf32> to vector<256x256xf32>
      %cst_15 = arith.constant dense<0.000000e+00> : vector<1x256xf32>
      %16 = tpu.matmul %12, %15, %cst_15 {dimension_numbers = #tpu.dot_dimension_numbers<[1], [0], [0], [1], [0, 0, 1, 1], [], []>, precision = #tpu.contract_precision<fp32>} : vector<1x256xf32>, vector<256x256xf32>, vector<1x256xf32> -> vector<1x256xf32>
      %c1 = arith.constant 1 : index
      %c0_16 = arith.constant 0 : index
      %c0_17 = arith.constant 0 : index
      %17 = vector.load %arg2[%c1, %c0_16, %c0_17] : memref<2x256x256xf32, #tpu.memory_space<vmem>>, vector<1x256x256xf32>
      %18 = vector.shape_cast %17 : vector<1x256x256xf32> to vector<256x256xf32>
      %cst_18 = arith.constant dense<0.000000e+00> : vector<1x256xf32>
      %19 = tpu.matmul %13, %18, %cst_18 {dimension_numbers = #tpu.dot_dimension_numbers<[1], [0], [0], [1], [0, 0, 1, 1], [], []>, precision = #tpu.contract_precision<fp32>} : vector<1x256xf32>, vector<256x256xf32>, vector<1x256xf32> -> vector<1x256xf32>
      %20 = arith.addf %16, %19 : vector<1x256xf32>
      %21 = arith.negf %20 : vector<1x256xf32>
      %22 = math.exp %21 : vector<1x256xf32>
      %cst_19 = arith.constant 1.000000e+00 : f32
      %23 = vector.broadcast %cst_19 : f32 to vector<1x256xf32>
      %24 = arith.addf %23, %22 : vector<1x256xf32>
      %25 = arith.divf %23, %24 : vector<1x256xf32>
      %c0_20 = arith.constant 0 : index
      %c0_21 = arith.constant 0 : index
      %c0_22 = arith.constant 0 : index
      %26 = vector.load %arg4[%c0_20, %c0_21, %c0_22] : memref<1x1x256xf32, #tpu.memory_space<vmem>>, vector<1x1x256xf32>
      %27 = vector.shape_cast %26 : vector<1x1x256xf32> to vector<1x256xf32>
      %28 = vector.shape_cast %25 : vector<1x256xf32> to vector<1x1x256xf32>
      tpu.vector_store %arg4[%c0_20, %c0_21, %c0_22], %28 {strides = array<i32>} : memref<1x1x256xf32, #tpu.memory_space<vmem>>, vector<1x1x256xf32>,
    } else {
    }
    return
  }
  func.func @transform_0(%arg0: i32, %arg1: i32) -> (i32, i32, i32) {
    %c0_i32 = arith.constant 0 : i32
    %c0_i32_0 = arith.constant 0 : i32
    %c0_i32_1 = arith.constant 0 : i32
    %c0_i32_2 = arith.constant 0 : i32
    return %c0_i32, %c0_i32_0, %c0_i32_1 : i32, i32, i32
  }
  func.func @transform_1(%arg0: i32, %arg1: i32) -> (i32, i32, i32) {
    %c0_i32 = arith.constant 0 : i32
    %c0_i32_0 = arith.constant 0 : i32
    return %arg0, %arg1, %c0_i32 : i32, i32, i32
  }
  func.func @transform_2(%arg0: i32, %arg1: i32) -> (i32, i32, i32) {
    %c0_i32 = arith.constant 0 : i32
    %c0_i32_0 = arith.constant 0 : i32
    %c0_i32_1 = arith.constant 0 : i32
    return %arg0, %c0_i32, %c0_i32_0 : i32, i32, i32
  }
}

</mosaic_0001>

<bundles_post_ra>
// kernel: tpu_custom_call.1
= control target key start
LH: loop header
LB: loop body
LE: loop exit
PB: predicated region body
PF: predicated region fallthrough
CT: control target
= control target key end

     0   :  { %7 = vsyncpa [#allocation5], 0  ;;  %s6091_s0 = inlined_call_operand.hbm [shape: f32[2,256,256], index: 0, kind: input, shape index: {}]   ;;  %s6092_s1 = inlined_call_operand.hbm [shape: f32[2,4,256], index: 1, kind: input, shape index: {}]   ;;  %s6093_s2 = inlined_call_operand.hbm [shape: f32[2,1,256], index: 2, kind: output, shape index: {}]  }
   0x1   :  { %8 = vsyncpa [#allocation8], 0 }
   0x2   :  { %10 = vsyncpa [#allocation8 + $0x1], 0 }
   0x3   :  { %11 = vsyncpa [#allocation6], 0 }
   0x4   :  { %13 = vsyncpa [#allocation6 + $0x1], 0  ;;  %s3454_s9 = smov 0   ;;  %s3456_s10 = smov 0  }
   0x5   :  { %s3458_s11 = smov 0   ;;  %s3460_s12 = smov 0  }
   0x6   :  { %s3462_s13 = smov 0   ;;  %s3464_s14 = smov 0  }
   0x7 LB: > { %s3187_s15 = sadd.s32 4294967295, %s3431_s14   ;;  %s3188_s16 = sadd.s32 4294967294, %s3431_s14   ;;  %s3431_s14 = sphi %s3464_s14, %s19_s14   ;;  %s3427_s13 = sphi %s3462_s13, %s7306_s13   ;;  %s3423_s12 = sphi %s3460_s12, %s7305_s12   ;;  %s3419_s11 = sphi %s3458_s11, %s7304_s11   ;;  %s3415_s10 = sphi %s3456_s10, %s7303_s10   ;;  %s3411_s9 = sphi %s3454_s9, %s7302_s9  }
   0x8   : > { %p74_p0 = scmp.ne.s32.totalorder %s3415_s10, %s3411_s9  ;;  %p3488_p1 = scmp.eq.s32.totalorder %s3187_s15, 0 }
   0x9   : > { %p3492_p2 = scmp.eq.s32.totalorder %s3187_s15, 1  ;;  %p104_p3 = scmp.eq.s32.totalorder %s3188_s16, 1 }
   0xa   : > { %p3498_p4 = por %p3488_p1, %p74_p0  ;;  %p3189_p5 = scmp.ge.s32.totalorder %s3431_s14, 1 }
   0xb   : > { %p3503_p6 = por %p104_p3, %p74_p0  ;;  %p111_p7 = scmp.lt.s32.totalorder %s3431_s14, 3 }
   0xc   : > { %s6508_s19 = scalar_select %p3498_p4, 1, 0 }
   0xd   : > { %s6509_s20 = scalar_select %p3503_p6, 1, 0 }
   0xe   : > { %p3508_p8 = pnand %p3189_p5, %p111_p7  ;;  %s3433_s22 = smov [#allocation4]  }
   0xf   : > { %s123_s23 = sshll.u32 %s3433_s22, 4  ;;  %s31_s25 = sadd.s32 1, %s3427_s13  ;;  %s124_s23 = int_to_ptr.vmem [resolvable:$true] %s123_s23 }
  0x10   : > { %p3216_p9 = pneg %p3508_p8  ;;  %s3304_s26 = scalar_lea.vmem %s124_s23, 16384 }
  0x11   : > { %p3305_p13 = scmp.ne.s32.totalorder %s124_s23, %s3304_s26  ;;  %p3312_p5 = scmp.lt.s32.totalorder %s124_s23, %s124_s23 }
  0x12   : > { %p3517_p11 = pnand %p3216_p9, %p3488_p1  ;;  %p3313_p7 = scmp.lt.s32.totalorder %s3304_s26, %s3304_s26 }
  0x14   : > { %p3295_p12 = pneg %p3517_p11  ;;  %p3314_p6 = por %p3313_p7, %p3312_p5 }
  0x16   : > { %p3307_p0 = pnand %p3305_p13, %p3295_p12 }
  0x18   : > { %p3308_p3 = pneg %p3307_p0 }
  0x1a   : > { %p3315_p4 = pnand %p3314_p6, %p3308_p3 }
  0x1c   : > { %3318 = shalt.err (!%p3315_p4)
}
  0x1d   : > { %s3434_s27 = smov 256   ;;  %s3435_s28 = smov 16  }
  0x1e   : > { %3219 = dma.hbm_to_vmem [thread:$0]  (!%p3517_p11), %s6091_s0, 16384, %s124_s23, [#allocation5], %s3434_s27, %s3434_s27, %s3435_s28  }
  0x1f   : > { %p33_p6 = scmp.ge.s32.totalorder %s31_s25, 2  ;;  %s61_s3 = sadd.s32 1, %s3419_s11 }
  0x20   : > { %p68_p4 = scmp.ne.s32.totalorder %s3419_s11, %s3415_s10  ;;  %p69_p9 = scmp.eq.s32.totalorder %s3431_s14, 0 }
  0x21   : > { %s7308_s25 = smov (%p33_p6, %s31_s25), 0  ;;  %p3229_p0 = scmp.lt.s32.totalorder %s3431_s14, 2 }
  0x22   : > { %p3535_p12 = por %p69_p9, %p68_p4  ;;  %p3541_p13 = por %p3492_p2, %p68_p4 }
  0x23   : > { %s56_s6 = ssub.s32 %s3427_s13, %s7308_s25  ;;  %s137_s7 = sand.u32 1, %s3419_s11  }
  0x24   : > { %p59_p11 = scmp.eq.s32.totalorder %s56_s6, 0  ;;  %s3192_s8 = sshll.u32 %s137_s7, 3 }
  0x25   : > { %s3206_s16 = sshll.u32 %s3427_s13, 7  ;;  %s141_s26 = scalar_lea.vmem [#allocation7], %s3192_s8 }
  0x26   : > { %s3550_s15 = scalar_select %p59_p11, %s3419_s11, %s61_s3  }
  0x27   : > { %s149_s24 = scalar_lea.hbm %s6092_s1, %s3206_s16  ;;  %s151_s27 = sshll.u32 %s141_s26, 4  ;;  %s152_s27 = int_to_ptr.vmem [resolvable:$true] %s151_s27 }
  0x28   : > { %p3558_p2 = pnand %p3229_p0, %p3535_p12  ;;  %s138_s28 = scalar_lea.sflag [#allocation8], %s137_s7 }
  0x29   : > { %s3332_s29 = scalar_lea.vmem %s152_s27, 128  ;;  %s3436_s30 = smov [#allocation7]  }
  0x2a   : > { %p3321_p3 = pneg %p3558_p2  ;;  %p3333_p5 = scmp.ne.s32.totalorder %s152_s27, %s3332_s29 }
  0x2b   : > { %s3337_s3 = sshll.u32 %s3436_s30, 4  ;;  %s3338_s3 = int_to_ptr.vmem [resolvable:$false] %s3337_s3 }
  0x2c   : > { %p3335_p7 = pnand %p3333_p5, %p3321_p3  ;;  %s3339_s6 = scalar_lea.vmem %s3338_s3, 256 }
  0x2d   : > { %p3340_p4 = scmp.lt.s32.totalorder %s152_s27, %s3338_s3  ;;  %p3341_p9 = scmp.lt.s32.totalorder %s3339_s6, %s3332_s29 }
  0x2e   : > { %p3336_p6 = pneg %p3335_p7 }
  0x2f   : > { %p3342_p11 = por %p3341_p9, %p3340_p4 }
  0x31   : > { %p3343_p10 = pnand %p3342_p11, %p3336_p6 }
  0x33   : > { %3346 = shalt.err (!%p3343_p10)
}
  0x34   : > { %3223 = dma.hbm_to_vmem [thread:$0]  (!%p3558_p2), %s149_s24, 128, %s152_s27, %s138_s28  }
  0x35   : > { %160 = sbr.rel (%p3508_p8) target bundleno = 767 (0x2ff), region = 28 }
  0x3a   : > { %3398 = dma.done.wait (%p3488_p1), [#allocation5], 16384  }
  0x3b   : > { %3400 = vsyncadd (%p3488_p1), [#allocation5], 4294950912  ;;  %s3573_s4 = sand.u32 1, %s3415_s10   ;;  %p6515_p10 = scmp.ne.s32.totalorder %s6508_s19, 0 }
  0x3c   : > { %s3197_s7 = sshll.u32 %s3573_s4, 3  ;;  %s167_s8 = scalar_lea.sflag [#allocation8], %s3573_s4 }
  0x3d   : > { %s3577_s16 = scalar_lea.vmem [#allocation7], %s3197_s7 }
  0x3e   : > { %3402 = dma.done.wait (%p6515_p10), %s167_s8, 128  }
  0x3f   : > { %3404 = vsyncadd (%p6515_p10), %s167_s8, 4294967168  ;;  %v3437_v0 = vmov 1966171168   ;;  %v6108_v2 = vlaneseq  ;;  %v421_v5 = vld [vmem:[#allocation4 + $0x2f8] sm:$0xff]  ;;  %v420_v6 = vld [vmem:[#allocation4 + $0x2f0] sm:$0xff]  ;;  %vm195_vm0 = vcmask 1043456  }
  0x40   : > { %v232_v1 = vunpack.c.l.s4 %v3437_v0  ;;  %v419_v7 = vld [vmem:[#allocation4 + $0x2e8] sm:$0xff]  ;;  %v3586_v8 = vand.u32 4294901760, %v421_v5  ;;  %v3588_v9 = vand.u32 4294901760, %v420_v6  ;;  %v418_v11 = vld [vmem:[#allocation4 + $0x2e0] sm:$0xff]  ;;  %v417_v12 = vld [vmem:[#allocation4 + $0x2d8] sm:$0xff]  ;;  %s3198_s17 = sshll.u32 %s3573_s4, 1 }
  0x41   : > { %v3584_v4 = vshrl.u32 %v6108_v2, 7  ;;  %v3590_v10 = vand.u32 4294901760, %v419_v7  ;;  %v416_v13 = vld [vmem:[#allocation4 + $0x2d0] sm:$0xff]  ;;  %v3592_v14 = vand.u32 4294901760, %v418_v11  ;;  %v3594_v15 = vand.u32 4294901760, %v417_v12  ;;  %v415_v17 = vld [vmem:[#allocation4 + $0x2c8] sm:$0xff] }
  0x42   : > { %v233_v3 = vunpack.c.0.s8 %v232_v1  ;;  %v3596_v16 = vand.u32 4294901760, %v416_v13  ;;  %v414_v18 = vld [vmem:[#allocation4 + $0x2c0] sm:$0xff]  ;;  %v3598_v19 = vld [vmem:[#allocation4 + $0x2b8] sm:$0xff]  ;;  %466 = vmatprep.subr.mxu0 %v3586_v8  ;;  %v3604_v21 = vand.u32 4294901760, %v415_v17  ;;  %v3612_v24 = vsub.f32 %v421_v5, %v3586_v8  ;;  %v3614_v25 = vld [vmem:[#allocation4 + $0x2b0] sm:$0xff]  ;;  %s3207_s19 = sshll.u32 %s3423_s12, 5 }
  0x43   : > { %6516 = vst [vmem:[#allocation13_spill] sm:$0xff] %v3584_v4  ;;  %v3606_v22 = vand.u32 4294901760, %v414_v18  ;;  %v3609_v23 = vand.u32 4294901760, %v3598_v19  ;;  %v3616_v26 = vld [vmem:[#allocation4 + $0x2a8] sm:$0xff]  ;;  %v3618_v27 = vld [vmem:[#allocation4 + $0x2a0] sm:$0xff]  ;;  %468 = vmatpush1.msra.mxu0 %v3588_v9  ;;  %v3622_v28 = vand.u32 4294901760, %v3614_v25  ;;  %v3625_v29 = vsub.f32 %v420_v6, %v3588_v9  ;;  %s3092_s26 = scalar_lea.hbm %s6093_s2, %s3207_s19 }
  0x44   : > { %v3601_v20 = vsub.s32 %v233_v3, %v3584_v4  ;;  %6518 = vst [vmem:[#allocation15_spill] sm:$0xff] %v3612_v24  ;;  %v3628_v30 = vand.u32 4294901760, %v3616_v26  ;;  %v3631_v31 = vsub.f32 %v419_v7, %v3590_v10  ;;  %v3633_v32 = vld [vmem:[#allocation4 + $0x298] sm:$0xff]  ;;  %v3635_v33 = vld [vmem:[#allocation4 + $0x290] sm:$0xff]  ;;  %v3637_v34 = vld [vmem:[#allocation4 + $0x288] sm:$0xff]  ;;  %470 = vmatprep.subr.mxu0 %v3590_v10  ;;  %v6106_v35 = vand.u32 4294901760, %v3612_v24 }
  0x45   : > { %v3642_v36 = vand.u32 4294901760, %v3618_v27  ;;  %v3645_v37 = vsub.f32 %v418_v11, %v3592_v14  ;;  %v3648_v38 = vand.u32 4294901760, %v3633_v32  ;;  %472 = vmatpush1.msra.mxu0 %v3592_v14  ;;  %v6104_v39 = vand.u32 4294901760, %v3625_v29  ;;  %v3659_v43 = vld [vmem:[#allocation4 + $0x280] sm:$0xff]  ;;  %v3683_v52 = vld [vmem:[#allocation4 + $0x278] sm:$0xff]  ;;  %v3693_v57 = vld [vmem:[#allocation4 + $0x270] sm:$0xff] }
  0x46   : > { %6517 = vst [vmem:[#allocation14_spill] sm:$0xff] %v3601_v20  ;;  %v6103_v40 = vand.u32 4294901760, %v3631_v31  ;;  %v3654_v41 = vsub.f32 %v417_v12, %v3594_v15  ;;  %v3657_v42 = vand.u32 4294901760, %v3635_v33  ;;  %474 = vmatprep.subr.mxu0 %v3594_v15  ;;  %v613_v44 = vsub.f32 %v3612_v24, %v6106_v35  ;;  %v3700_v62 = vld [vmem:[#allocation4 + $0x268] sm:$0xff]  ;;  %v3712_v5 = vld [vmem:[#allocation4 + $0x260] sm:$0xff]  ;;  %s190_s21 = scalar_lea.vmem [#allocation9], %s3198_s17 }
  0x47   : > { %v6101_v45 = vand.u32 4294901760, %v3645_v37  ;;  %v3667_v46 = vsub.f32 %v416_v13, %v3596_v16  ;;  %v3670_v47 = vand.u32 4294901760, %v3637_v34  ;;  %476 = vmatpush1.msra.mxu0 %v3596_v16  ;;  %v619_v48 = vsub.f32 %v3625_v29, %v6104_v39  ;;  %v3725_v13 = vld [vmem:[#allocation4 + $0x258] sm:$0xff]  ;;  %v3816_v35 = vld [vmem:[#allocation4 + $0x228] sm:$0xff]  ;;  %v3826_v2 = vld [vmem:[#allocation4 + $0x220] sm:$0xff]  ;;  %s3094_s22 = sshll.u32 %s190_s21, 4  ;;  %s3095_s22 = int_to_ptr.vmem [resolvable:$true] %s3094_s22 }
  0x48   : > { %v625_v49 = vsub.f32 %v3631_v31, %v6103_v40  ;;  %v6099_v50 = vand.u32 4294901760, %v3654_v41  ;;  %v3681_v51 = vsub.f32 %v415_v17, %v3604_v21  ;;  %478 = vmatprep.subr.mxu0 %v3604_v21  ;;  %v614_v53 = vand.u32 4294901760, %v613_v44  ;;  %v3803_v40 = vld [vmem:[#allocation4 + $0x230] sm:$0xff]  ;;  %s3080_s27 = scalar_lea.sflag [#allocation6], %s3573_s4  ;;  %s3347_s18 = scalar_lea.vmem %s3095_s22, 32 }
  0x49   : > { %v631_v54 = vsub.f32 %v3645_v37, %v6101_v45  ;;  %v6098_v55 = vand.u32 4294901760, %v3667_v46  ;;  %v3691_v56 = vand.u32 4294901760, %v3659_v43  ;;  %480 = vmatpush1.msra.mxu0 %v3606_v22  ;;  %v620_v58 = vand.u32 4294901760, %v619_v48  ;;  %p3348_p1 = scmp.ne.s32.totalorder %s3095_s22, %s3347_s18  ;;  %s3438_s12 = smov [#allocation9]  }
  0x4a   : > { %v626_v59 = vand.u32 4294901760, %v625_v49  ;;  %v637_v60 = vsub.f32 %v3654_v41, %v6099_v50  ;;  %v6096_v61 = vand.u32 4294901760, %v3681_v51  ;;  %482 = vmatprep.subr.mxu0 %v3609_v23  ;;  %615 = vmatprep.subr.mxu1 %v614_v53  ;;  %v3707_v1 = vsub.f32 %v414_v18, %v3606_v22  ;;  %s3351_s28 = sshll.u32 %s3438_s12, 4  ;;  %s3352_s28 = int_to_ptr.vmem [resolvable:$false] %s3351_s28 }
  0x4b   : > { %v632_v63 = vand.u32 4294901760, %v631_v54  ;;  %v643_v0 = vsub.f32 %v3667_v46, %v6098_v55  ;;  %v3710_v3 = vand.u32 4294901760, %v3683_v52  ;;  %484 = vmatpush1.msra.mxu0 %v3622_v28  ;;  %621 = vmatpush1.msra.mxu1 %v620_v58  ;;  %v3720_v11 = vsub.f32 %v3598_v19, %v3609_v23  ;;  %v3736_v19 = vld [vmem:[#allocation4 + $0x250] sm:$0xff]  ;;  %v3782_v55 = vld [vmem:[#allocation4 + $0x240] sm:$0xff]  ;;  %p3349_p8 = pnand %p3348_p1, %p3541_p13  ;;  %s3353_s29 = scalar_lea.vmem %s3352_s28, 64 }
  0x4c   : > { %v638_v6 = vand.u32 4294901760, %v637_v60  ;;  %v649_v7 = vsub.f32 %v3681_v51, %v6096_v61  ;;  %v3723_v12 = vand.u32 4294901760, %v3693_v57  ;;  %486 = vmatprep.subr.mxu0 %v3628_v30  ;;  %627 = vmatprep.subr.mxu1 %v626_v59  ;;  %v6095_v18 = vand.u32 4294901760, %v3707_v1  ;;  %p3354_p0 = scmp.lt.s32.totalorder %s3095_s22, %s3352_s28  ;;  %p3355_p2 = scmp.lt.s32.totalorder %s3353_s29, %s3347_s18 }
  0x4d   : > { %v644_v17 = vand.u32 4294901760, %v643_v0  ;;  %v3731_v44 = vsub.f32 %v3614_v25, %v3622_v28  ;;  %v3734_v48 = vand.u32 4294901760, %v3700_v62  ;;  %488 = vmatpush1.msra.mxu0 %v3642_v36  ;;  %633 = vmatpush1.msra.mxu1 %v632_v63  ;;  %v6097_v53 = vand.u32 4294901760, %v3720_v11  ;;  %p3350_p12 = pneg %p3349_p8 }
  0x4e   : > { %6519 = vst [vmem:[#allocation16_spill] sm:$0xff] %v3723_v12  ;;  %v650_v49 = vand.u32 4294901760, %v649_v7  ;;  %v3742_v54 = vsub.f32 %v3616_v26, %v3628_v30  ;;  %v3745_v58 = vand.u32 4294901760, %v3712_v5  ;;  %490 = vmatprep.subr.mxu0 %v3648_v38  ;;  %639 = vmatprep.subr.mxu1 %v638_v6  ;;  %v655_v25 = vsub.f32 %v3707_v1, %v6095_v18  ;;  %v3759_v26 = vld [vmem:[#allocation4 + $0x248] sm:$0xff]  ;;  %p3356_p3 = por %p3355_p2, %p3354_p0 }
  0x4f   : > { %6520 = vst [vmem:[#allocation17_spill] sm:$0xff] %v3731_v44  ;;  %6521 = vst [vmem:[#allocation18_spill] sm:$0xff] %v3734_v48  ;;  %v6100_v59 = vand.u32 4294901760, %v3731_v44  ;;  %v3754_v60 = vsub.f32 %v3618_v27, %v3642_v36  ;;  %v3757_v63 = vand.u32 4294901760, %v3725_v13  ;;  %492 = vmatpush1.msra.mxu0 %v3657_v42  ;;  %645 = vmatpush1.msra.mxu1 %v644_v17  ;;  %v3771_v27 = vand.u32 4294901760, %v3736_v19 }
  0x50   : > { %6522 = vst [vmem:[#allocation19_spill] sm:$0xff] %v3742_v54  ;;  %6523 = vst [vmem:[#allocation20_spill] sm:$0xff] %v3745_v58  ;;  %v661_v0 = vsub.f32 %v3720_v11, %v6097_v53  ;;  %v6102_v6 = vand.u32 4294901760, %v3742_v54  ;;  %v3768_v7 = vsub.f32 %v3633_v32, %v3648_v38  ;;  %494 = vmatprep.subr.mxu0 %v3670_v47  ;;  %651 = vmatprep.subr.mxu1 %v650_v49  ;;  %p3357_p5 = pnand %p3356_p3, %p3350_p12 }
  0x51   : > { %6524 = vst [vmem:[#allocation21_spill] sm:$0xff] %v3754_v60  ;;  %6525 = vst [vmem:[#allocation22_spill] sm:$0xff] %v3757_v63  ;;  %v656_v18 = vand.u32 4294901760, %v655_v25  ;;  %v667_v17 = vsub.f32 %v3731_v44, %v6100_v59  ;;  %v6105_v61 = vand.u32 4294901760, %v3754_v60  ;;  %v3780_v53 = vsub.f32 %v3635_v33, %v3657_v42  ;;  %496 = vmatpush1.msra.mxu0 %v3691_v56  ;;  %v3792_v59 = vld [vmem:[#allocation4 + $0x238] sm:$0xff] }
  0x52   : > { %6526 = vst [vmem:[#allocation23_spill] sm:$0xff] %v3768_v7  ;;  %6527 = vst [vmem:[#allocation24_spill] sm:$0xff] %v3771_v27  ;;  %v662_v32 = vand.u32 4294901760, %v661_v0  ;;  %v673_v49 = vsub.f32 %v3742_v54, %v6102_v6  ;;  %v6107_v25 = vand.u32 4294901760, %v3768_v7  ;;  %v3790_v50 = vand.u32 4294901760, %v3759_v26  ;;  %498 = vmatprep.subr.mxu0 %v3710_v3 }
  0x53   : > { %6528 = vst [vmem:[#allocation25_spill] sm:$0xff] %v3780_v53  ;;  %657 = vmatpush1.msra.mxu1 %v656_v18  ;;  %v668_v33 = vand.u32 4294901760, %v667_v17  ;;  %v679_v45 = vsub.f32 %v3754_v60, %v6105_v61  ;;  %v6111_v0 = vand.u32 4294901760, %v3780_v53  ;;  %v3801_v6 = vsub.f32 %v3637_v34, %v3670_v47  ;;  %500 = vmatpush1.msra.mxu0 %v3723_v12 }
  0x54   : > { %6529 = vst [vmem:[#allocation26_spill] sm:$0xff] %v3790_v50  ;;  %663 = vmatprep.subr.mxu1 %v662_v32  ;;  %v674_v39 = vand.u32 4294901760, %v673_v49  ;;  %v685_v18 = vsub.f32 %v3768_v7, %v6107_v25  ;;  %v3810_v17 = vand.u32 4294901760, %v3782_v55  ;;  %v3814_v61 = vsub.f32 %v3659_v43, %v3691_v56  ;;  %502 = vmatprep.subr.mxu0 %v3734_v48 }
  0x55   : > { %6530 = vst [vmem:[#allocation27_spill] sm:$0xff] %v3801_v6  ;;  %669 = vmatpush1.msra.mxu1 %v668_v33  ;;  %v680_v34 = vand.u32 4294901760, %v679_v45  ;;  %v691_v32 = vsub.f32 %v3780_v53, %v6111_v0  ;;  %v3824_v25 = vand.u32 4294901760, %v3792_v59  ;;  %504 = vmatpush1.msra.mxu0 %v3745_v58  ;;  %v3832_v45 = vsub.f32 %v3683_v52, %v3710_v3  ;;  %v3837_v0 = vld [vmem:[#allocation4 + $0x218] sm:$0xff] }
  0x56   : > { %6531 = vst [vmem:[#allocation28_spill] sm:$0xff] %v3810_v17  ;;  %6532 = vst [vmem:[#allocation29_spill] sm:$0xff] %v3814_v61  ;;  %675 = vmatprep.subr.mxu1 %v674_v39  ;;  %v686_v43 = vand.u32 4294901760, %v685_v18  ;;  %v6118_v33 = vand.u32 4294901760, %v3814_v61  ;;  %v3835_v7 = vand.u32 4294901760, %v3803_v40  ;;  %506 = vmatprep.subr.mxu0 %v3757_v63  ;;  %v6536_v39 = vand.u32 4294901760, %v3801_v6 }
  0x57   : > { %6533 = vst [vmem:[#allocation30_spill] sm:$0xff] %v3824_v25  ;;  %6534 = vst [vmem:[#allocation31_spill] sm:$0xff] %v3832_v45  ;;  %681 = vmatpush1.msra.mxu1 %v680_v34  ;;  %v692_v49 = vand.u32 4294901760, %v691_v32  ;;  %v3845_v18 = vsub.f32 %v3693_v57, %v3723_v12  ;;  %v3848_v52 = vand.u32 4294901760, %v3816_v35  ;;  %508 = vmatpush1.msra.mxu0 %v3771_v27  ;;  %v3862_v57 = vld [vmem:[#allocation4 + $0x210] sm:$0xff]  ;;  %v3871_v32 = vand.u32 4294901760, %v3837_v0 }
  0x58   : > { %6535 = vst [vmem:[#allocation32_spill] sm:$0xff] %v3835_v7  ;;  %v697_v53 = vsub.f32 %v3801_v6, %v6536_v39  ;;  %687 = vmatprep.subr.mxu1 %v686_v43  ;;  %v703_v34 = vsub.f32 %v3814_v61, %v6118_v33  ;;  %v3857_v60 = vsub.f32 %v3700_v62, %v3734_v48  ;;  %v3860_v39 = vand.u32 4294901760, %v3826_v2  ;;  %v3873_v62 = vld [vmem:[#allocation4 + $0x208] sm:$0xff] }
  0x59   : > { %6537 = vst [vmem:[#allocation33_spill] sm:$0xff] %v3845_v18  ;;  %6538 = vst [vmem:[#allocation34_spill] sm:$0xff] %v3848_v52  ;;  %693 = vmatpush1.msra.mxu1 %v692_v49  ;;  %510 = vmatprep.subr.mxu0 %v3790_v50  ;;  %v3868_v33 = vsub.f32 %v3712_v5, %v3745_v58  ;;  %v6543_v48 = vand.u32 4294901760, %v3832_v45  ;;  %v3882_v6 = vsub.f32 %v3725_v13, %v3757_v63 }
  0x5a   : > { %6539 = vst [vmem:[#allocation35_spill] sm:$0xff] %v3857_v60  ;;  %6540 = vst [vmem:[#allocation36_spill] sm:$0xff] %v3860_v39  ;;  %v698_v43 = vand.u32 4294901760, %v697_v53  ;;  %512 = vmatpush1.msra.mxu0 %v3810_v17  ;;  %v704_v61 = vand.u32 4294901760, %v703_v34  ;;  %v6545_v5 = vand.u32 4294901760, %v3845_v18  ;;  %v3890_v34 = vand.u32 4294901760, %v3862_v57 }
  0x5b   : > { %6541 = vst [vmem:[#allocation37_spill] sm:$0xff] %v3868_v33  ;;  %6542 = vst [vmem:[#allocation38_spill] sm:$0xff] %v3871_v32  ;;  %v709_v49 = vsub.f32 %v3832_v45, %v6543_v48  ;;  %514 = vmatprep.subr.mxu0 %v3824_v25  ;;  %v3894_v48 = vsub.f32 %v3736_v19, %v3771_v27  ;;  %v3896_v53 = vld [vmem:[#allocation4 + $0x200] sm:$0xff]  ;;  %v3904_v54 = vand.u32 4294901760, %v3873_v62  ;;  %v6550_v19 = vand.u32 4294901760, %v3868_v33 }
  0x5c   : > { %6544 = vst [vmem:[#allocation39_spill] sm:$0xff] %v3882_v6  ;;  %699 = vmatprep.subr.mxu1 %v698_v43  ;;  %v715_v58 = vsub.f32 %v3845_v18, %v6545_v5  ;;  %6546 = vst [vmem:[#allocation40_spill] sm:$0xff] %v3890_v34  ;;  %516 = vmatpush1.msra.mxu0 %v3835_v7  ;;  %v6548_v43 = vand.u32 4294901760, %v3857_v60  ;;  %v3906_v18 = vld [vmem:[#allocation4 + $0x3f8] sm:$0xff]  ;;  %v3915_v27 = vsub.f32 %v3759_v26, %v3790_v50 }
  0x5d   : > { %6547 = vst [vmem:[#allocation41_spill] sm:$0xff] %v3894_v48  ;;  %705 = vmatpush1.msra.mxu1 %v704_v61  ;;  %v710_v13 = vand.u32 4294901760, %v709_v49  ;;  %6549 = vst [vmem:[#allocation42_spill] sm:$0xff] %v3904_v54  ;;  %518 = vmatprep.subr.mxu0 %v3848_v52  ;;  %v727_v61 = vsub.f32 %v3868_v33, %v6550_v19  ;;  %v3924_v12 = vand.u32 4294901760, %v3896_v53  ;;  %v3930_v49 = vld [vmem:[#allocation4 + $0x3e8] sm:$0xff] }
  0x5e   : > { %v721_v45 = vsub.f32 %v3857_v60, %v6548_v43  ;;  %v716_v63 = vand.u32 4294901760, %v715_v58  ;;  %6551 = vst [vmem:[#allocation43_spill] sm:$0xff] %v3915_v27  ;;  %v3917_v43 = vld [vmem:[#allocation4 + $0x3f0] sm:$0xff]  ;;  %520 = vmatpush1.msra.mxu0 %v3860_v39  ;;  %v6552_v58 = vand.u32 4294901760, %v3882_v6  ;;  %v3928_v19 = vsub.f32 %v3782_v55, %v3810_v17 }
  0x5f   : > { %711 = vmatprep.subr.mxu1 %v710_v13  ;;  %6553 = vst [vmem:[#allocation44_spill] sm:$0xff] %v3924_v12  ;;  %v728_v26 = vand.u32 4294901760, %v727_v61  ;;  %522 = vmatprep.subr.mxu0 %v3871_v32  ;;  %v3946_v61 = vsub.f32 %v3792_v59, %v3824_v25  ;;  %v3949_v17 = vand.u32 4294901760, %v3917_v43  ;;  %v3962_v59 = vand.u32 4294901760, %v3930_v49 }
  0x60   : > { %v722_v5 = vand.u32 4294901760, %v721_v45  ;;  %v733_v60 = vsub.f32 %v3882_v6, %v6552_v58  ;;  %6554 = vst [vmem:[#allocation45_spill] sm:$0xff] %v3928_v19  ;;  %717 = vmatpush1.msra.mxu1 %v716_v63  ;;  %v6555_v45 = vand.u32 4294901760, %v3894_v48  ;;  %v3938_v58 = vand.u32 4294901760, %v3906_v18  ;;  %v3940_v6 = vld [vmem:[#allocation4 + $0x3e0] sm:$0xff]  ;;  %524 = vmatpush1.msra.mxu0 %v3890_v34 }
  0x61   : > { %6557 = vst [vmem:[#allocation47_spill] sm:$0xff] %v3946_v61  ;;  %6558 = vst [vmem:[#allocation48_spill] sm:$0xff] %v3949_v17  ;;  %526 = vmatprep.subr.mxu0 %v3904_v54  ;;  %v3959_v63 = vsub.f32 %v3803_v40, %v3835_v7  ;;  %v3971_v25 = vsub.f32 %v3816_v35, %v3848_v52  ;;  %v3976_v40 = vld [vmem:[#allocation4 + $0x3d0] sm:$0xff]  ;;  %v3987_v35 = vld [vmem:[#allocation4 + $0x3c8] sm:$0xff]  ;;  %v6567_v52 = vand.u32 4294901760, %v3946_v61 }
  0x62   : > { %v739_v13 = vsub.f32 %v3894_v48, %v6555_v45  ;;  %6556 = vst [vmem:[#allocation46_spill] sm:$0xff] %v3938_v58  ;;  %723 = vmatprep.subr.mxu1 %v722_v5  ;;  %v734_v55 = vand.u32 4294901760, %v733_v60  ;;  %v3951_v45 = vld [vmem:[#allocation4 + $0x3d8] sm:$0xff]  ;;  %v6559_v5 = vand.u32 4294901760, %v3915_v27  ;;  %6561 = vst [vmem:[#allocation50_spill] sm:$0xff] %v3962_v59  ;;  %528 = vmatpush1.msra.mxu0 %v3924_v12  ;;  %v6562_v48 = vand.u32 4294901760, %v3928_v19 }
  0x63   : > { %729 = vmatpush1.msra.mxu1 %v728_v26  ;;  %6560 = vst [vmem:[#allocation49_spill] sm:$0xff] %v3959_v63  ;;  %6563 = vst [vmem:[#allocation51_spill] sm:$0xff] %v3971_v25  ;;  %530 = vmatprep.subr.mxu0 %v3938_v58  ;;  %v757_v7 = vsub.f32 %v3946_v61, %v6567_v52  ;;  %v4008_v52 = vsub.f32 %v3862_v57, %v3890_v34 }
  0x64   : > { %v740_v33 = vand.u32 4294901760, %v739_v13  ;;  %v745_v60 = vsub.f32 %v3915_v27, %v6559_v5  ;;  %735 = vmatprep.subr.mxu1 %v734_v55  ;;  %v751_v26 = vsub.f32 %v3928_v19, %v6562_v48  ;;  %v3974_v5 = vand.u32 4294901760, %v3940_v6  ;;  %532 = vmatpush2.msra.mxu0 %v3949_v17 }
  0x65   : > { %v6161_v55 = vand.u32 4294901760, %v3959_v63  ;;  %v3982_v48 = vsub.f32 %v3826_v2, %v3860_v39  ;;  %v3985_v13 = vand.u32 4294901760, %v3951_v45  ;;  %534 = vmatprep.subr.mxu0 %v3962_v59  ;;  %v4004_v39 = vand.u32 4294901760, %v3976_v40  ;;  %6570 = vst [vmem:[#allocation57_spill] sm:$0xff] %v4008_v52 }
  0x66   : > { %6564 = vst [vmem:[#allocation52_spill] sm:$0xff] %v3974_v5  ;;  %741 = vmatpush1.msra.mxu1 %v740_v33  ;;  %v746_v27 = vand.u32 4294901760, %v745_v60  ;;  %v752_v19 = vand.u32 4294901760, %v751_v26  ;;  %v3996_v60 = vsub.f32 %v3837_v0, %v3871_v32  ;;  %v4010_v33 = vld [vmem:[#allocation4 + $0x3c0] sm:$0xff]  ;;  %v758_v0 = vand.u32 4294901760, %v757_v7  ;;  %536 = vmatpush2.msra.mxu0 %v3974_v5 }
  0x67   : > { %6565 = vst [vmem:[#allocation53_spill] sm:$0xff] %v3982_v48  ;;  %6566 = vst [vmem:[#allocation54_spill] sm:$0xff] %v3985_v13  ;;  %v763_v2 = vsub.f32 %v3959_v63, %v6161_v55  ;;  %v4018_v26 = vand.u32 4294901760, %v3987_v35  ;;  %v4020_v63 = vld [vmem:[#allocation4 + $0x3b8] sm:$0xff]  ;;  %v6573_v57 = vand.u32 4294901760, %v3982_v48  ;;  %538 = vmatprep.subr.mxu0 %v3985_v13  ;;  %v4042_v7 = vsub.f32 %v3896_v53, %v3924_v12 }
  0x68   : > { %6568 = vst [vmem:[#allocation55_spill] sm:$0xff] %v3996_v60  ;;  %747 = vmatprep.subr.mxu1 %v746_v27  ;;  %6569 = vst [vmem:[#allocation56_spill] sm:$0xff] %v4004_v39  ;;  %v6571_v27 = vand.u32 4294901760, %v3971_v25  ;;  %540 = vmatpush2.msra.mxu0 %v4004_v39 }
  0x69   : > { %753 = vmatpush1.msra.mxu1 %v752_v19  ;;  %6572 = vst [vmem:[#allocation58_spill] sm:$0xff] %v4018_v26  ;;  %v764_v32 = vand.u32 4294901760, %v763_v2  ;;  %v775_v34 = vsub.f32 %v3982_v48, %v6573_v57  ;;  %v4029_v19 = vsub.f32 %v3873_v62, %v3904_v54  ;;  %v4038_v57 = vand.u32 4294901760, %v4010_v33  ;;  %6577 = vst [vmem:[#allocation61_spill] sm:$0xff] %v4042_v7  ;;  %v4044_v48 = vld [vmem:[#allocation4 + $0x3a8] sm:$0xff]  ;;  %v4054_v54 = vld [vmem:[#allocation4 + $0x3a0] sm:$0xff] }
  0x6a   : > { %v769_v61 = vsub.f32 %v3971_v25, %v6571_v27  ;;  %v4031_v27 = vld [vmem:[#allocation4 + $0x3b0] sm:$0xff]  ;;  %759 = vmatprep.subr.mxu1 %v758_v0  ;;  %v6575_v25 = vand.u32 4294901760, %v3996_v60  ;;  %v6578_v0 = vand.u32 4294901760, %v4008_v52  ;;  %542 = vmatprep.subr.mxu0 %v4018_v26 }
  0x6b   : > { %6574 = vst [vmem:[#allocation59_spill] sm:$0xff] %v4029_v19  ;;  %6576 = vst [vmem:[#allocation60_spill] sm:$0xff] %v4038_v57  ;;  %765 = vmatpush1.msra.mxu1 %v764_v32  ;;  %v776_v62 = vand.u32 4294901760, %v775_v34  ;;  %544 = vmatpush2.msra.mxu0 %v4038_v57  ;;  %v6184_v32 = vand.u32 4294901760, %v4042_v7  ;;  %v4060_v34 = vsub.f32 %v3906_v18, %v3938_v58  ;;  %v6582_v12 = vand.u32 4294901760, %v4029_v19 }
  0x6c   : > { %v770_v55 = vand.u32 4294901760, %v769_v61  ;;  %v781_v2 = vsub.f32 %v3996_v60, %v6575_v25  ;;  %v787_v61 = vsub.f32 %v4008_v52, %v6578_v0  ;;  %v4052_v60 = vand.u32 4294901760, %v4020_v63  ;;  %v4065_v52 = vld [vmem:[#allocation4 + $0x398] sm:$0xff] }
  0x6d   : > { %6580 = vst [vmem:[#allocation63_spill] sm:$0xff] %v4060_v34  ;;  %v4063_v0 = vand.u32 4294901760, %v4031_v27  ;;  %v4076_v18 = vand.u32 4294901760, %v4044_v48  ;;  %v799_v58 = vsub.f32 %v4042_v7, %v6184_v32  ;;  %v4096_v32 = vsub.f32 %v3940_v6, %v3974_v5 }
  0x6e   : > { %6579 = vst [vmem:[#allocation62_spill] sm:$0xff] %v4052_v60  ;;  %771 = vmatprep.subr.mxu1 %v770_v55  ;;  %v782_v53 = vand.u32 4294901760, %v781_v2  ;;  %v788_v25 = vand.u32 4294901760, %v787_v61  ;;  %v793_v55 = vsub.f32 %v4029_v19, %v6582_v12  ;;  %546 = vmatprep.subr.mxu0 %v4052_v60  ;;  %v4073_v2 = vsub.f32 %v3917_v43, %v3949_v17  ;;  %v4090_v43 = vld [vmem:[#allocation4 + $0x390] sm:$0xff] }
  0x6f   : > { %6581 = vst [vmem:[#allocation64_spill] sm:$0xff] %v4063_v0  ;;  %777 = vmatpush1.msra.mxu1 %v776_v62  ;;  %6584 = vst [vmem:[#allocation66_spill] sm:$0xff] %v4076_v18  ;;  %548 = vmatpush2.msra.mxu0 %v4063_v0  ;;  %v4085_v12 = vsub.f32 %v3930_v49, %v3962_v59  ;;  %v4088_v61 = vand.u32 4294901760, %v4054_v54  ;;  %v4099_v62 = vand.u32 4294901760, %v4065_v52  ;;  %v4101_v49 = vld [vmem:[#allocation4 + $0x388] sm:$0xff]  ;;  %v800_v7 = vand.u32 4294901760, %v799_v58 }
  0x70   : > { %6583 = vst [vmem:[#allocation65_spill] sm:$0xff] %v4073_v2  ;;  %783 = vmatprep.subr.mxu1 %v782_v53  ;;  %v794_v19 = vand.u32 4294901760, %v793_v55  ;;  %v6195_v53 = vand.u32 4294901760, %v4073_v2  ;;  %550 = vmatprep.subr.mxu0 %v4076_v18  ;;  %6587 = vst [vmem:[#allocation69_spill] sm:$0xff] %v4096_v32  ;;  %v6589_v59 = vand.u32 4294901760, %v4060_v34  ;;  %v4110_v55 = vsub.f32 %v3951_v45, %v3985_v13 }
  0x71   : > { %6585 = vst [vmem:[#allocation67_spill] sm:$0xff] %v4085_v12  ;;  %6586 = vst [vmem:[#allocation68_spill] sm:$0xff] %v4088_v61  ;;  %789 = vmatpush1.msra.mxu1 %v788_v25  ;;  %552 = vmatpush2.msra.mxu0 %v4088_v61  ;;  %v4118_v58 = vand.u32 4294901760, %v4090_v43  ;;  %v4124_v25 = vld [vmem:[#allocation4 + $0x380] sm:$0xff]  ;;  %v4131_v5 = vand.u32 4294901760, %v4101_v49  ;;  %v6595_v50 = vand.u32 4294901760, %v4096_v32 }
  0x72   : > { %6588 = vst [vmem:[#allocation70_spill] sm:$0xff] %v4099_v62  ;;  %v805_v17 = vsub.f32 %v4060_v34, %v6589_v59  ;;  %6590 = vst [vmem:[#allocation71_spill] sm:$0xff] %v4110_v55  ;;  %795 = vmatprep.subr.mxu1 %v794_v19  ;;  %v811_v6 = vsub.f32 %v4073_v2, %v6195_v53  ;;  %554 = vmatprep.subr.mxu0 %v4099_v62  ;;  %v6593_v19 = vand.u32 4294901760, %v4085_v12  ;;  %v4133_v2 = vld [vmem:[#allocation4 + $0x378] sm:$0xff] }
  0x73   : > { %6591 = vst [vmem:[#allocation72_spill] sm:$0xff] %v4118_v58  ;;  %v4122_v59 = vsub.f32 %v3976_v40, %v4004_v39  ;;  %801 = vmatpush1.msra.mxu1 %v800_v7  ;;  %6594 = vst [vmem:[#allocation74_spill] sm:$0xff] %v4131_v5  ;;  %v823_v40 = vsub.f32 %v4096_v32, %v6595_v50  ;;  %556 = vmatpush2.msra.mxu0 %v4118_v58  ;;  %v4151_v50 = vand.u32 4294901760, %v4124_v25  ;;  %v4157_v32 = vld [vmem:[#allocation4 + $0x368] sm:$0xff] }
  0x74   : > { %v806_v45 = vand.u32 4294901760, %v805_v17  ;;  %v817_v34 = vsub.f32 %v4085_v12, %v6593_v19  ;;  %v812_v13 = vand.u32 4294901760, %v811_v6  ;;  %v4142_v7 = vsub.f32 %v3987_v35, %v4018_v26  ;;  %v4144_v19 = vld [vmem:[#allocation4 + $0x370] sm:$0xff]  ;;  %558 = vmatprep.subr.mxu0 %v4131_v5 }
  0x75   : > { %6592 = vst [vmem:[#allocation73_spill] sm:$0xff] %v4122_v59  ;;  %v6597_v12 = vand.u32 4294901760, %v4110_v55  ;;  %6598 = vst [vmem:[#allocation76_spill] sm:$0xff] %v4151_v50  ;;  %v4155_v17 = vsub.f32 %v4010_v33, %v4038_v57  ;;  %v824_v35 = vand.u32 4294901760, %v823_v40  ;;  %560 = vmatpush2.msra.mxu0 %v4151_v50  ;;  %v4175_v40 = vand.u32 4294901760, %v4144_v19 }
  0x76   : > { %6596 = vst [vmem:[#allocation75_spill] sm:$0xff] %v4142_v7  ;;  %807 = vmatprep.subr.mxu1 %v806_v45  ;;  %v818_v53 = vand.u32 4294901760, %v817_v34  ;;  %v6600_v45 = vand.u32 4294901760, %v4122_v59 }
  0x77   : > { %v829_v6 = vsub.f32 %v4110_v55, %v6597_v12  ;;  %6599 = vst [vmem:[#allocation77_spill] sm:$0xff] %v4155_v17  ;;  %813 = vmatpush2.msra.mxu1 %v812_v13  ;;  %v4164_v12 = vand.u32 4294901760, %v4133_v2  ;;  %v4166_v55 = vld [vmem:[#allocation4 + $0x360] sm:$0xff]  ;;  %v6218_v33 = vand.u32 4294901760, %v4155_v17  ;;  %v4172_v13 = vsub.f32 %v4020_v63, %v4052_v60  ;;  %6603 = vst [vmem:[#allocation80_spill] sm:$0xff] %v4175_v40 }
  0x78   : > { %v835_v34 = vsub.f32 %v4122_v59, %v6600_v45  ;;  %819 = vmatprep.subr.mxu1 %v818_v53  ;;  %v4177_v45 = vld [vmem:[#allocation4 + $0x358] sm:$0xff]  ;;  %v6604_v59 = vand.u32 4294901760, %v4142_v7  ;;  %v4188_v63 = vand.u32 4294901760, %v4157_v32 }
  0x79   : > { %6601 = vst [vmem:[#allocation78_spill] sm:$0xff] %v4164_v12  ;;  %v830_v39 = vand.u32 4294901760, %v829_v6  ;;  %6602 = vst [vmem:[#allocation79_spill] sm:$0xff] %v4172_v13  ;;  %825 = vmatpush2.msra.mxu1 %v824_v35  ;;  %562 = vmatprep.subr.mxu0 %v4164_v12  ;;  %v4185_v6 = vsub.f32 %v4031_v27, %v4063_v0  ;;  %v847_v60 = vsub.f32 %v4155_v17, %v6218_v33  ;;  %v4202_v27 = vld [vmem:[#allocation4 + $0x350] sm:$0xff] }
  0x7a   : > { %v836_v26 = vand.u32 4294901760, %v835_v34  ;;  %v841_v53 = vsub.f32 %v4142_v7, %v6604_v59  ;;  %6606 = vst [vmem:[#allocation82_spill] sm:$0xff] %v4188_v63  ;;  %564 = vmatpush2.msra.mxu0 %v4175_v40  ;;  %v4197_v59 = vsub.f32 %v4044_v48, %v4076_v18  ;;  %v4200_v34 = vand.u32 4294901760, %v4166_v55  ;;  %v4213_v48 = vld [vmem:[#allocation4 + $0x348] sm:$0xff] }
  0x7b   : > { %6605 = vst [vmem:[#allocation81_spill] sm:$0xff] %v4185_v6  ;;  %831 = vmatprep.subr.mxu1 %v830_v39  ;;  %v6229_v39 = vand.u32 4294901760, %v4185_v6  ;;  %566 = vmatprep.subr.mxu0 %v4188_v63  ;;  %v4208_v33 = vsub.f32 %v4054_v54, %v4088_v61  ;;  %v4211_v35 = vand.u32 4294901760, %v4177_v45  ;;  %v848_v17 = vand.u32 4294901760, %v847_v60 }
  0x7c   : > { %6607 = vst [vmem:[#allocation83_spill] sm:$0xff] %v4197_v59  ;;  %6608 = vst [vmem:[#allocation84_spill] sm:$0xff] %v4200_v34  ;;  %837 = vmatpush2.msra.mxu1 %v836_v26  ;;  %v842_v7 = vand.u32 4294901760, %v841_v53  ;;  %v6611_v18 = vand.u32 4294901760, %v4172_v13  ;;  %568 = vmatpush2.msra.mxu0 %v4200_v34  ;;  %v4222_v53 = vsub.f32 %v4065_v52, %v4099_v62  ;;  %v4230_v60 = vand.u32 4294901760, %v4202_v27  ;;  %v4236_v26 = vld [vmem:[#allocation4 + $0x340] sm:$0xff] }
  0x7d   : > { %6609 = vst [vmem:[#allocation85_spill] sm:$0xff] %v4208_v33  ;;  %6610 = vst [vmem:[#allocation86_spill] sm:$0xff] %v4211_v35  ;;  %v859_v54 = vsub.f32 %v4185_v6, %v6229_v39  ;;  %570 = vmatprep.subr.mxu0 %v4211_v35  ;;  %v4243_v61 = vand.u32 4294901760, %v4213_v48  ;;  %v4245_v6 = vld [vmem:[#allocation4 + $0x338] sm:$0xff]  ;;  %v6617_v57 = vand.u32 4294901760, %v4208_v33 }
  0x7e   : > { %v853_v0 = vsub.f32 %v4172_v13, %v6611_v18  ;;  %6612 = vst [vmem:[#allocation87_spill] sm:$0xff] %v4222_v53  ;;  %843 = vmatprep.subr.mxu1 %v842_v7  ;;  %6613 = vst [vmem:[#allocation88_spill] sm:$0xff] %v4230_v60  ;;  %v4234_v18 = vsub.f32 %v4090_v43, %v4118_v58  ;;  %v6615_v7 = vand.u32 4294901760, %v4197_v59  ;;  %572 = vmatpush2.msra.mxu0 %v4230_v60 }
  0x7f   : > { %849 = vmatpush2.msra.mxu1 %v848_v17  ;;  %6616 = vst [vmem:[#allocation90_spill] sm:$0xff] %v4243_v61  ;;  %v860_v62 = vand.u32 4294901760, %v859_v54  ;;  %v871_v43 = vsub.f32 %v4208_v33, %v6617_v57  ;;  %v4254_v17 = vsub.f32 %v4101_v49, %v4131_v5  ;;  %574 = vmatprep.subr.mxu0 %v4243_v61  ;;  %v4263_v57 = vand.u32 4294901760, %v4236_v26  ;;  %v4269_v33 = vld [vmem:[#allocation4 + $0x328] sm:$0xff] }
  0x80   : > { %6614 = vst [vmem:[#allocation89_spill] sm:$0xff] %v4234_v18  ;;  %v854_v52 = vand.u32 4294901760, %v853_v0  ;;  %v865_v13 = vsub.f32 %v4197_v59, %v6615_v7  ;;  %v4256_v7 = vld [vmem:[#allocation4 + $0x330] sm:$0xff]  ;;  %v6619_v59 = vand.u32 4294901760, %v4222_v53  ;;  %v4267_v0 = vsub.f32 %v4124_v25, %v4151_v50 }
  0x81   : > { %6618 = vst [vmem:[#allocation91_spill] sm:$0xff] %v4254_v17  ;;  %6620 = vst [vmem:[#allocation92_spill] sm:$0xff] %v4263_v57  ;;  %v872_v49 = vand.u32 4294901760, %v871_v43  ;;  %576 = vmatpush2.msra.mxu0 %v4263_v57  ;;  %v4287_v43 = vand.u32 4294901760, %v4256_v7 }
  0x82   : > { %855 = vmatprep.subr.mxu1 %v854_v52  ;;  %v866_v39 = vand.u32 4294901760, %v865_v13  ;;  %v877_v54 = vsub.f32 %v4222_v53, %v6619_v59  ;;  %6621 = vst [vmem:[#allocation93_spill] sm:$0xff] %v4267_v0  ;;  %v6622_v52 = vand.u32 4294901760, %v4234_v18  ;;  %v4276_v59 = vand.u32 4294901760, %v4245_v6  ;;  %v4278_v53 = vld [vmem:[#allocation4 + $0x320] sm:$0xff] }
  0x83   : > { %861 = vmatpush2.msra.mxu1 %v860_v62  ;;  %v6252_v25 = vand.u32 4294901760, %v4267_v0  ;;  %v4284_v62 = vsub.f32 %v4133_v2, %v4164_v12  ;;  %v4300_v2 = vand.u32 4294901760, %v4269_v33 }
  0x84   : > { %v883_v13 = vsub.f32 %v4234_v18, %v6622_v52  ;;  %6623 = vst [vmem:[#allocation94_spill] sm:$0xff] %v4276_v59  ;;  %867 = vmatprep.subr.mxu1 %v866_v39  ;;  %v878_v58 = vand.u32 4294901760, %v877_v54  ;;  %v4289_v52 = vld [vmem:[#allocation4 + $0x318] sm:$0xff]  ;;  %v6625_v18 = vand.u32 4294901760, %v4254_v17  ;;  %578 = vmatprep.subr.mxu0 %v4276_v59  ;;  %v4297_v54 = vsub.f32 %v4144_v19, %v4175_v40  ;;  %v4314_v19 = vld [vmem:[#allocation4 + $0x310] sm:$0xff] }
  0x85   : > { %6624 = vst [vmem:[#allocation95_spill] sm:$0xff] %v4284_v62  ;;  %873 = vmatpush2.msra.mxu1 %v872_v49  ;;  %v895_v12 = vsub.f32 %v4267_v0, %v6252_v25  ;;  %580 = vmatpush2.msra.mxu0 %v4287_v43  ;;  %v4320_v25 = vsub.f32 %v4166_v55, %v4200_v34  ;;  %v4323_v49 = vand.u32 4294901760, %v4289_v52 }
  0x86   : > { %v884_v5 = vand.u32 4294901760, %v883_v13  ;;  %v889_v39 = vsub.f32 %v4254_v17, %v6625_v18  ;;  %6626 = vst [vmem:[#allocation96_spill] sm:$0xff] %v4297_v54  ;;  %879 = vmatprep.subr.mxu1 %v878_v58  ;;  %v4309_v18 = vsub.f32 %v4157_v32, %v4188_v63  ;;  %v4312_v13 = vand.u32 4294901760, %v4278_v53  ;;  %582 = vmatprep.subr.mxu0 %v4300_v2  ;;  %v4325_v32 = vld [vmem:[#allocation4 + $0x308] sm:$0xff] }
  0x87   : > { %v6263_v58 = vand.u32 4294901760, %v4297_v54  ;;  %6629 = vst [vmem:[#allocation99_spill] sm:$0xff] %v4320_v25  ;;  %v896_v0 = vand.u32 4294901760, %v895_v12  ;;  %v6630_v63 = vand.u32 4294901760, %v4284_v62  ;;  %v4355_v12 = vand.u32 4294901760, %v4325_v32 }
  0x88   : > { %6627 = vst [vmem:[#allocation97_spill] sm:$0xff] %v4309_v18  ;;  %6628 = vst [vmem:[#allocation98_spill] sm:$0xff] %v4312_v13  ;;  %885 = vmatpush2.msra.mxu1 %v884_v5  ;;  %v890_v17 = vand.u32 4294901760, %v889_v39  ;;  %584 = vmatpush2.msra.mxu0 %v4312_v13  ;;  %v4334_v39 = vsub.f32 %v4177_v45, %v4211_v35  ;;  %v4346_v5 = vsub.f32 %v4202_v27, %v4230_v60 }
  0x89   : > { %v901_v40 = vsub.f32 %v4284_v62, %v6630_v63  ;;  %v907_v55 = vsub.f32 %v4297_v54, %v6263_v58  ;;  %586 = vmatprep.subr.mxu0 %v4323_v49  ;;  %v4342_v63 = vand.u32 4294901760, %v4314_v19  ;;  %v4348_v62 = vld [vmem:[#allocation4 + $0x300] sm:$0xff]  ;;  %v6634_v50 = vand.u32 4294901760, %v4320_v25 }
  0x8a   : > { %6631 = vst [vmem:[#allocation100_spill] sm:$0xff] %v4334_v39  ;;  %891 = vmatprep.subr.mxu1 %v890_v17  ;;  %6632 = vst [vmem:[#allocation101_spill] sm:$0xff] %v4346_v5  ;;  %v6633_v17 = vand.u32 4294901760, %v4309_v18  ;;  %v6274_v58 = vand.u32 4294901760, %v4334_v39  ;;  %v191_v54 = vld [vmem:[%s3577_s16] sm:$0xff] }
  0x8b   : > { %897 = vmatpush2.msra.mxu1 %v896_v0  ;;  %v902_v45 = vand.u32 4294901760, %v901_v40  ;;  %v908_v34 = vand.u32 4294901760, %v907_v55  ;;  %v919_v27 = vsub.f32 %v4320_v25, %v6634_v50  ;;  %588 = vmatpush2.msra.mxu0 %v4342_v63  ;;  %v4365_v40 = vsub.f32 %v4213_v48, %v4243_v61 }
  0x8c   : > { %v913_v35 = vsub.f32 %v4309_v18, %v6633_v17  ;;  %v925_v18 = vsub.f32 %v4334_v39, %v6274_v58  ;;  %590 = vmatprep.subr.mxu0 %v4355_v12  ;;  %v4372_v55 = vand.u32 4294901760, %v4348_v62  ;;  %v4376_v50 = vsub.f32 %v4236_v26, %v4263_v57 }
  0x8d   : > { %6635 = vst [vmem:[#allocation102_spill] sm:$0xff] %v4365_v40  ;;  %903 = vmatprep.subr.mxu1 %v902_v45  ;;  %v920_v0 = vand.u32 4294901760, %v919_v27  ;;  %v6637_v48 = vand.u32 4294901760, %v4346_v5  ;;  %v193_v25 = vcombine.high %v191_v54, %v191_v54  ;;  %v196_v61 = vsel %vm195_vm0, %v191_v54, 0.0 }
  0x8e   : > { %v914_v17 = vand.u32 4294901760, %v913_v35  ;;  %6636 = vst [vmem:[#allocation103_spill] sm:$0xff] %v4376_v50  ;;  %909 = vmatpush2.msra.mxu1 %v908_v34  ;;  %v6285_v35 = vand.u32 4294901760, %v4365_v40  ;;  %v926_v58 = vand.u32 4294901760, %v925_v18  ;;  %592 = vmatpush2.msra.mxu0 %v4372_v55  ;;  %v6291_v39 = vand.u32 4294901760, %v4376_v50 }
  0x8f   : > { %v931_v45 = vsub.f32 %v4346_v5, %v6637_v48  ;;  %v210_v26 = vsel %vm195_vm0, %v191_v54, -inf  ;;  %v197_v48 = vrot.slane %v196_v61, 4  ;;  %v203_v5 = vsel %vm195_vm0, %v193_v25, 0.0  ;;  %1005 = vmatprep.subr.mxu0 %v3612_v24 }
  0x90   : > { %915 = vmatprep.subr.mxu1 %v914_v17  ;;  %v937_v27 = vsub.f32 %v4365_v40, %v6285_v35  ;;  %v943_v18 = vsub.f32 %v4376_v50, %v6291_v39  ;;  %v204_v17 = vrot.slane %v203_v5, 4  ;;  %v211_v57 = vrot.slane %v210_v26, 4 }
  0x91   : > { %921 = vmatpush2.msra.mxu1 %v920_v0  ;;  %v932_v34 = vand.u32 4294901760, %v931_v45  ;;  %v217_v54 = vsel %vm195_vm0, %v193_v25, -inf  ;;  %v198_v45 = vadd.f32 %v197_v48, %v196_v61  ;;  %v4397_v35 = vsub.f32 %v4245_v6, %v4276_v59 }
  0x92   : > { %927 = vmatprep.subr.mxu1 %v926_v58  ;;  %v938_v0 = vand.u32 4294901760, %v937_v27  ;;  %v218_v60 = vrot.slane %v217_v54, 4  ;;  %v944_v40 = vand.u32 4294901760, %v943_v18  ;;  %v205_v44 = vadd.f32 %v204_v17, %v203_v5 }
  0x93   : > { %933 = vmatpush2.msra.mxu1 %v932_v34  ;;  %v212_v24 = vmax.f32 %v210_v26, %v211_v57  ;;  %v4401_v58 = vsub.f32 %v4256_v7, %v4287_v43  ;;  %v199_v39 = vrot.slane %v198_v45, 2  ;;  %v6294_v25 = vand.u32 4294901760, %v4397_v35 }
  0x94   : > { %939 = vmatprep.subr.mxu1 %v938_v0  ;;  %v219_v50 = vmax.f32 %v217_v54, %v218_v60  ;;  %v4406_v61 = vsub.f32 %v4269_v33, %v4300_v2  ;;  %v206_v34 = vrot.slane %v205_v44, 2  ;;  %v4411_v57 = vsub.f32 %v4278_v53, %v4312_v13 }
  0x95   : > { %945 = vmatpush2.msra.mxu1 %v944_v40  ;;  %v213_v6 = vrot.slane %v212_v24, 2  ;;  %v6295_v27 = vand.u32 4294901760, %v4401_v58  ;;  %v200_v7 = vadd.f32 %v199_v39, %v198_v45  ;;  %v949_v60 = vsub.f32 %v4397_v35, %v6294_v25 }
  0x96   : > { %v220_v5 = vrot.slane %v219_v50, 2  ;;  %v6296_v26 = vand.u32 4294901760, %v4406_v61  ;;  %v207_v48 = vadd.f32 %v206_v34, %v205_v44  ;;  %v6297_v18 = vand.u32 4294901760, %v4411_v57 }
  0x97   : > { %v214_v33 = vmax.f32 %v212_v24, %v213_v6  ;;  %v955_v40 = vsub.f32 %v4401_v58, %v6295_v27  ;;  %v201_v17 = vrot.slane %v200_v7, 1  ;;  %v950_v53 = vand.u32 4294901760, %v949_v60 }
  0x98   : > { %v221_v54 = vmax.f32 %v219_v50, %v220_v5  ;;  %v961_v39 = vsub.f32 %v4406_v61, %v6296_v26  ;;  %v208_v0 = vrot.slane %v207_v48, 1  ;;  %v967_v24 = vsub.f32 %v4411_v57, %v6297_v18 }
  0x99   : > { %v215_v45 = vrot.slane %v214_v33, 1  ;;  %v956_v25 = vand.u32 4294901760, %v955_v40  ;;  %v202_v44 = vadd.f32 %v201_v17, %v200_v7  ;;  %951 = vmatprep.subr.mxu1 %v950_v53  ;;  %v4429_v27 = vsub.f32 %v4289_v52, %v4323_v49 }
  0x9a   : > { %v222_v34 = vrot.slane %v221_v54, 1  ;;  %v962_v6 = vand.u32 4294901760, %v961_v39  ;;  %v209_v50 = vadd.f32 %v208_v0, %v207_v48  ;;  %v968_v60 = vand.u32 4294901760, %v967_v24 }
  0x9b   : > { %v216_v5 = vmax.f32 %v214_v33, %v215_v45  ;;  %957 = vmatpush2.msra.mxu1 %v956_v25  ;;  %v4433_v26 = vsub.f32 %v4314_v19, %v4342_v63  ;;  %v6303_v18 = vand.u32 4294901760, %v4429_v27  ;;  %v4438_v7 = vsub.f32 %v4325_v32, %v4355_v12 }
  0x9c   : > { %v223_v40 = vmax.f32 %v221_v54, %v222_v34  ;;  %963 = vmatprep.subr.mxu1 %v962_v6  ;;  %v4442_v52 = vsub.f32 %v4348_v62, %v4372_v55  ;;  %v230_v48 = vcombine.low %v202_v44, %v209_v50  ;;  %v6638_v44 = vlaneseq }
  0x9d   : > { %969 = vmatpush2.msra.mxu1 %v968_v60  ;;  %v6302_v25 = vand.u32 4294901760, %v4433_v26  ;;  %v973_v19 = vsub.f32 %v4429_v27, %v6303_v18  ;;  %v6301_v17 = vand.u32 4294901760, %v4438_v7  ;;  %v6639_v34 = vmov 0  ;;  %v6658_v18 = vld [vmem:[#allocation31_spill] sm:$0xff] }
  0x9e   : > { %v253_v33 = vcombine.low %v216_v5, %v223_v40  ;;  %v6300_v54 = vand.u32 4294901760, %v4442_v52  ;;  %v237_v32 = vrot.slane %v230_v48, %v3601_v20  ;;  %vm4463_vm1 = vcmp.lt.s32.totalorder %v6638_v44, 256 }
  0x9f   : > { %v979_v62 = vsub.f32 %v4433_v26, %v6302_v25  ;;  %v974_v39 = vand.u32 4294901760, %v973_v19  ;;  %v985_v0 = vsub.f32 %v4438_v7, %v6301_v17  ;;  %v6640_v34 = vsel %vm4463_vm1, 4294967295, %v6639_v34  ;;  %v6656_v17 = vld [vmem:[#allocation29_spill] sm:$0xff]  ;;  %v6657_v25 = vld [vmem:[#allocation28_spill] sm:$0xff] }
  0xa0   : > { %v260_v53 = vrot.slane %v253_v33, %v3601_v20  ;;  %v991_v45 = vsub.f32 %v4442_v52, %v6300_v54  ;;  %v244_v24 = vrot.slane %v237_v32, %v3601_v20  ;;  %6641 = vst [vmem:[#allocation104_spill] sm:$0xff] %v6640_v34  ;;  %v6298_v40 = vsub.s32 0, %v3584_v4  ;;  %v6655_v54 = vld [vmem:[#allocation26_spill] sm:$0xff]  ;;  %v6660_v34 = vld [vmem:[#allocation33_spill] sm:$0xff] }
  0xa1   : > { %v980_v6 = vand.u32 4294901760, %v979_v62  ;;  %975 = vmatprep.subr.mxu1 %v974_v39  ;;  %v986_v5 = vand.u32 4294901760, %v985_v0  ;;  %v6299_v48 = vsub.s32 1, %v3584_v4  ;;  %v6662_v4 = vld [vmem:[#allocation35_spill] sm:$0xff] }
  0xa2   : > { %v267_v50 = vrot.slane %v260_v53, %v3601_v20  ;;  %v992_v60 = vand.u32 4294901760, %v991_v45  ;;  %250 = vst.msk [vmem:[#allocation2] sm:$0x3] %vm4463_vm1, %v244_v24  ;;  %v6661_v20 = vld [vmem:[#allocation32_spill] sm:$0xff] }
  0xa3   : > { %981 = vmatpush2.msra.mxu1 %v980_v6 }
  0xa4   : > { %269 = vst.msk [vmem:[#allocation3] sm:$0x3] %vm4463_vm1, %v267_v50  ;;  %987 = vmatprep.subr.mxu1 %v986_v5 }
  0xa5   : > { %993 = vmatpush2.msra.mxu1 %v992_v60  ;;  %v6644_v60 = vld [vmem:[#allocation17_spill] sm:$0xff] }
  0xa6   : > { %1207 = vmatprep.subr.mxu1 %v3586_v8 }
  0xab   : > { %v324_v33 = vld [vmem:[#allocation3] sm:$0x3] }
  0xac   : > { %v458_v19 = vrot.slane %v324_v33, %v6298_v40  ;;  %v462_v32 = vrot.slane %v324_v33, %v6299_v48  ;;  %v6645_v33 = vld [vmem:[#allocation16_spill] sm:$0xff]  ;;  %v6654_v48 = vld [vmem:[#allocation27_spill] sm:$0xff] }
  0xad   : > { %v6653_v40 = vld [vmem:[#allocation24_spill] sm:$0xff] }
  0xae   : > { %v4479_v62 = vand.u32 4294901760, %v462_v32  ;;  %v4481_v53 = vand.u32 4294901760, %v458_v19 }
  0xb0   : > { %6642 = vst [vmem:[#allocation105_spill] sm:$0xff] %v4479_v62  ;;  %6643 = vst [vmem:[#allocation106_spill] sm:$0xff] %v4481_v53  ;;  %v4484_v39 = vsub.f32 %v462_v32, %v4479_v62  ;;  %v4487_v0 = vsub.f32 %v458_v19, %v4481_v53  ;;  %995 = vmatprep.mubr.f32.mxu1 %v4479_v62  ;;  %v6646_v19 = vld [vmem:[#allocation19_spill] sm:$0xff]  ;;  %v6647_v32 = vld [vmem:[#allocation18_spill] sm:$0xff] }
  0xb1   : > { %997 = vmatmul.mubr.f32.vlgmr.msra.gmra.mxu1 %v4481_v53  ;;  %v6663_v53 = vld [vmem:[#allocation34_spill] sm:$0xff]  ;;  %v6664_v62 = vld [vmem:[#allocation37_spill] sm:$0xff] }
  0xb2   : > { %v595_v45 = vand.u32 4294901760, %v4484_v39  ;;  %v6304_v24 = vand.u32 4294901760, %v4487_v0  ;;  %1209 = vmatpush1.msra.mxu1 %v3588_v9 }
  0xb3   : > { %1211 = vmatprep.subr.mxu1 %v3590_v10 }
  0xb4   : > { %v596_v44 = vsub.f32 %v4484_v39, %v595_v45  ;;  %v602_v6 = vsub.f32 %v4487_v0, %v6304_v24  ;;  %1213 = vmatpush1.msra.mxu1 %v3592_v14  ;;  %1337 = vmatprep.mubr.f32.mxu1 %v595_v45  ;;  %v6648_v45 = vld [vmem:[#allocation21_spill] sm:$0xff]  ;;  %v6659_v24 = vld [vmem:[#allocation30_spill] sm:$0xff] }
  0xb5   : > { %1215 = vmatprep.subr.mxu1 %v3594_v15 }
  0xb6   : > { %v597_v50 = vand.u32 4294901760, %v596_v44  ;;  %v603_v5 = vand.u32 4294901760, %v602_v6  ;;  %1217 = vmatpush1.msra.mxu1 %v3596_v16  ;;  %v6649_v44 = vld [vmem:[#allocation20_spill] sm:$0xff]  ;;  %v6650_v6 = vld [vmem:[#allocation23_spill] sm:$0xff] }
  0xb7   : > { %1219 = vmatprep.subr.mxu1 %v3604_v21 }
  0xb8   : > { %598 = vmatprep.mubr.f32.mxu0 %v597_v50  ;;  %1221 = vmatpush1.msra.mxu1 %v3606_v22  ;;  %v6651_v50 = vld [vmem:[#allocation22_spill] sm:$0xff] }
  0xb9   : > { %604 = vmatmul.mubr.f32.vlgmr.msra.gmra.mxu0 %v603_v5  ;;  %1223 = vmatprep.subr.mxu1 %v3609_v23  ;;  %v6652_v5 = vld [vmem:[#allocation25_spill] sm:$0xff] }
  0xba   : > { %1008 = vmatpush1.msra.mxu0 %v3625_v29  ;;  %1225 = vmatpush1.msra.mxu1 %v3622_v28 }
  0xbb   : > { %1011 = vmatprep.subr.mxu0 %v3631_v31  ;;  %1227 = vmatprep.subr.mxu1 %v3628_v30 }
  0xbc   : > { %1014 = vmatpush1.msra.mxu0 %v3645_v37  ;;  %1229 = vmatpush1.msra.mxu1 %v3642_v36 }
  0xbd   : > { %1017 = vmatprep.subr.mxu0 %v3654_v41  ;;  %1231 = vmatprep.subr.mxu1 %v3648_v38 }
  0xbe   : > { %1020 = vmatpush1.msra.mxu0 %v3667_v46  ;;  %1233 = vmatpush1.msra.mxu1 %v3657_v42 }
  0xbf   : > { %1023 = vmatprep.subr.mxu0 %v3681_v51  ;;  %1235 = vmatprep.subr.mxu1 %v3670_v47 }
  0xc0   : > { %1026 = vmatpush1.msra.mxu0 %v3707_v1  ;;  %1237 = vmatpush1.msra.mxu1 %v3691_v56 }
  0xc1   : > { %1029 = vmatprep.subr.mxu0 %v3720_v11  ;;  %1239 = vmatprep.subr.mxu1 %v3710_v3 }
  0xc2   : > { %1032 = vmatpush1.msra.mxu0 %v6644_v60  ;;  %1241 = vmatpush1.msra.mxu1 %v6645_v33 }
  0xc3   : > { %1035 = vmatprep.subr.mxu0 %v6646_v19  ;;  %1243 = vmatprep.subr.mxu1 %v6647_v32 }
  0xc4   : > { %1038 = vmatpush1.msra.mxu0 %v6648_v45  ;;  %1245 = vmatpush1.msra.mxu1 %v6649_v44 }
  0xc5   : > { %1041 = vmatprep.subr.mxu0 %v6650_v6  ;;  %1247 = vmatprep.subr.mxu1 %v6651_v50  ;;  %v6667_v50 = vld [vmem:[#allocation38_spill] sm:$0xff] }
  0xc6   : > { %1044 = vmatpush1.msra.mxu0 %v6652_v5  ;;  %1249 = vmatpush1.msra.mxu1 %v6653_v40  ;;  %v6665_v40 = vld [vmem:[#allocation36_spill] sm:$0xff] }
  0xc7   : > { %1047 = vmatprep.subr.mxu0 %v6654_v48  ;;  %1251 = vmatprep.subr.mxu1 %v6655_v54  ;;  %v6666_v54 = vld [vmem:[#allocation39_spill] sm:$0xff] }
  0xc8   : > { %1050 = vmatpush1.msra.mxu0 %v6656_v17  ;;  %1253 = vmatpush1.msra.mxu1 %v6657_v25  ;;  %v6668_v25 = vld [vmem:[#allocation41_spill] sm:$0xff] }
  0xc9   : > { %1053 = vmatprep.subr.mxu0 %v6658_v18  ;;  %1255 = vmatprep.subr.mxu1 %v6659_v24  ;;  %v6669_v18 = vld [vmem:[#allocation40_spill] sm:$0xff]  ;;  %v6670_v24 = vld [vmem:[#allocation43_spill] sm:$0xff] }
  0xca   : > { %1056 = vmatpush1.msra.mxu0 %v6660_v34  ;;  %1257 = vmatpush1.msra.mxu1 %v6661_v20  ;;  %v6671_v34 = vld [vmem:[#allocation42_spill] sm:$0xff]  ;;  %v6672_v20 = vld [vmem:[#allocation45_spill] sm:$0xff] }
  0xcb   : > { %1059 = vmatprep.subr.mxu0 %v6662_v4  ;;  %1259 = vmatprep.subr.mxu1 %v6663_v53  ;;  %v6673_v4 = vld [vmem:[#allocation44_spill] sm:$0xff]  ;;  %v6674_v53 = vld [vmem:[#allocation47_spill] sm:$0xff] }
  0xcc   : > { %1062 = vmatpush1.msra.mxu0 %v6664_v62  ;;  %1261 = vmatpush1.msra.mxu1 %v6665_v40  ;;  %v6675_v62 = vld [vmem:[#allocation46_spill] sm:$0xff]  ;;  %v6676_v40 = vld [vmem:[#allocation49_spill] sm:$0xff] }
  0xcd   : > { %1065 = vmatprep.subr.mxu0 %v6666_v54  ;;  %1263 = vmatprep.subr.mxu1 %v6667_v50  ;;  %v6677_v54 = vld [vmem:[#allocation48_spill] sm:$0xff]  ;;  %v6678_v50 = vld [vmem:[#allocation51_spill] sm:$0xff] }
  0xce   : > { %1068 = vmatpush1.msra.mxu0 %v6668_v25  ;;  %1265 = vmatpush1.msra.mxu1 %v6669_v18  ;;  %v6679_v25 = vld [vmem:[#allocation50_spill] sm:$0xff]  ;;  %v6680_v18 = vld [vmem:[#allocation53_spill] sm:$0xff] }
  0xcf   : > { %1071 = vmatprep.subr.mxu0 %v6670_v24  ;;  %1267 = vmatprep.subr.mxu1 %v6671_v34  ;;  %v6681_v24 = vld [vmem:[#allocation52_spill] sm:$0xff]  ;;  %v6682_v34 = vld [vmem:[#allocation55_spill] sm:$0xff] }
  0xd0   : > { %1074 = vmatpush1.msra.mxu0 %v6672_v20  ;;  %1269 = vmatpush1.msra.mxu1 %v6673_v4  ;;  %v6683_v20 = vld [vmem:[#allocation54_spill] sm:$0xff]  ;;  %v6684_v4 = vld [vmem:[#allocation57_spill] sm:$0xff] }
  0xd1   : > { %1077 = vmatprep.subr.mxu0 %v6674_v53  ;;  %1271 = vmatprep.subr.mxu1 %v6675_v62  ;;  %v6685_v53 = vld [vmem:[#allocation56_spill] sm:$0xff]  ;;  %v6686_v62 = vld [vmem:[#allocation59_spill] sm:$0xff] }
  0xd2   : > { %1080 = vmatpush1.msra.mxu0 %v6676_v40  ;;  %1273 = vmatpush2.msra.mxu1 %v6677_v54  ;;  %v6687_v40 = vld [vmem:[#allocation58_spill] sm:$0xff]  ;;  %v6688_v54 = vld [vmem:[#allocation61_spill] sm:$0xff] }
  0xd3   : > { %1083 = vmatprep.subr.mxu0 %v6678_v50  ;;  %1275 = vmatprep.subr.mxu1 %v6679_v25  ;;  %v6689_v50 = vld [vmem:[#allocation60_spill] sm:$0xff]  ;;  %v6690_v25 = vld [vmem:[#allocation63_spill] sm:$0xff] }
  0xd4   : > { %1086 = vmatpush1.msra.mxu0 %v6680_v18  ;;  %1277 = vmatpush2.msra.mxu1 %v6681_v24  ;;  %v6691_v18 = vld [vmem:[#allocation62_spill] sm:$0xff]  ;;  %v6692_v24 = vld [vmem:[#allocation65_spill] sm:$0xff] }
  0xd5   : > { %1089 = vmatprep.subr.mxu0 %v6682_v34  ;;  %1279 = vmatprep.subr.mxu1 %v6683_v20  ;;  %v6693_v34 = vld [vmem:[#allocation64_spill] sm:$0xff]  ;;  %v6694_v20 = vld [vmem:[#allocation67_spill] sm:$0xff] }
  0xd6   : > { %1092 = vmatpush1.msra.mxu0 %v6684_v4  ;;  %1281 = vmatpush2.msra.mxu1 %v6685_v53  ;;  %v6695_v4 = vld [vmem:[#allocation66_spill] sm:$0xff]  ;;  %v6696_v53 = vld [vmem:[#allocation69_spill] sm:$0xff] }
  0xd7   : > { %1095 = vmatprep.subr.mxu0 %v6686_v62  ;;  %1283 = vmatprep.subr.mxu1 %v6687_v40  ;;  %v6697_v62 = vld [vmem:[#allocation68_spill] sm:$0xff]  ;;  %v6698_v40 = vld [vmem:[#allocation71_spill] sm:$0xff] }
  0xd8   : > { %1098 = vmatpush1.msra.mxu0 %v6688_v54  ;;  %1285 = vmatpush2.msra.mxu1 %v6689_v50  ;;  %v6699_v54 = vld [vmem:[#allocation70_spill] sm:$0xff]  ;;  %v6700_v50 = vld [vmem:[#allocation73_spill] sm:$0xff] }
  0xd9   : > { %1101 = vmatprep.subr.mxu0 %v6690_v25  ;;  %1287 = vmatprep.subr.mxu1 %v6691_v18  ;;  %v6701_v25 = vld [vmem:[#allocation72_spill] sm:$0xff]  ;;  %v6702_v18 = vld [vmem:[#allocation75_spill] sm:$0xff] }
  0xda   : > { %1104 = vmatpush2.msra.mxu0 %v6692_v24  ;;  %1289 = vmatpush2.msra.mxu1 %v6693_v34  ;;  %v6703_v24 = vld [vmem:[#allocation74_spill] sm:$0xff]  ;;  %v6704_v34 = vld [vmem:[#allocation77_spill] sm:$0xff] }
  0xdb   : > { %1107 = vmatprep.subr.mxu0 %v6694_v20  ;;  %1291 = vmatprep.subr.mxu1 %v6695_v4  ;;  %v6705_v20 = vld [vmem:[#allocation76_spill] sm:$0xff]  ;;  %v6706_v4 = vld [vmem:[#allocation79_spill] sm:$0xff] }
  0xdc   : > { %1110 = vmatpush2.msra.mxu0 %v6696_v53  ;;  %1293 = vmatpush2.msra.mxu1 %v6697_v62  ;;  %v6707_v53 = vld [vmem:[#allocation78_spill] sm:$0xff]  ;;  %v6708_v62 = vld [vmem:[#allocation81_spill] sm:$0xff] }
  0xdd   : > { %1113 = vmatprep.subr.mxu0 %v6698_v40  ;;  %1295 = vmatprep.subr.mxu1 %v6699_v54  ;;  %v6709_v40 = vld [vmem:[#allocation80_spill] sm:$0xff]  ;;  %v6710_v54 = vld [vmem:[#allocation83_spill] sm:$0xff] }
  0xde   : > { %1116 = vmatpush2.msra.mxu0 %v6700_v50  ;;  %1297 = vmatpush2.msra.mxu1 %v6701_v25  ;;  %v6711_v50 = vld [vmem:[#allocation82_spill] sm:$0xff]  ;;  %v6712_v25 = vld [vmem:[#allocation85_spill] sm:$0xff] }
  0xdf   : > { %1119 = vmatprep.subr.mxu0 %v6702_v18  ;;  %1299 = vmatprep.subr.mxu1 %v6703_v24  ;;  %v6713_v18 = vld [vmem:[#allocation84_spill] sm:$0xff]  ;;  %v6714_v24 = vld [vmem:[#allocation87_spill] sm:$0xff] }
  0xe0   : > { %1122 = vmatpush2.msra.mxu0 %v6704_v34  ;;  %1301 = vmatpush2.msra.mxu1 %v6705_v20  ;;  %v6715_v34 = vld [vmem:[#allocation86_spill] sm:$0xff]  ;;  %v6716_v20 = vld [vmem:[#allocation89_spill] sm:$0xff] }
  0xe1   : > { %1125 = vmatprep.subr.mxu0 %v6706_v4  ;;  %1303 = vmatprep.subr.mxu1 %v6707_v53  ;;  %v6717_v4 = vld [vmem:[#allocation88_spill] sm:$0xff]  ;;  %v6718_v53 = vld [vmem:[#allocation91_spill] sm:$0xff] }
  0xe2   : > { %1128 = vmatpush2.msra.mxu0 %v6708_v62  ;;  %1305 = vmatpush2.msra.mxu1 %v6709_v40  ;;  %v6719_v62 = vld [vmem:[#allocation90_spill] sm:$0xff]  ;;  %v6720_v40 = vld [vmem:[#allocation93_spill] sm:$0xff] }
  0xe3   : > { %1131 = vmatprep.subr.mxu0 %v6710_v54  ;;  %1307 = vmatprep.subr.mxu1 %v6711_v50  ;;  %v6721_v50 = vld [vmem:[#allocation95_spill] sm:$0xff] }
  0xe4   : > { %1134 = vmatpush2.msra.mxu0 %v6712_v25  ;;  %1309 = vmatpush2.msra.mxu1 %v6713_v18  ;;  %v6722_v25 = vld [vmem:[#allocation92_spill] sm:$0xff] }
  0xe5   : > { %1137 = vmatprep.subr.mxu0 %v6714_v24  ;;  %1311 = vmatprep.subr.mxu1 %v6715_v34  ;;  %v6723_v18 = vld [vmem:[#allocation96_spill] sm:$0xff]  ;;  %v6724_v34 = vld [vmem:[#allocation97_spill] sm:$0xff] }
  0xe6   : > { %1140 = vmatpush2.msra.mxu0 %v6716_v20  ;;  %1313 = vmatpush2.msra.mxu1 %v6717_v4  ;;  %v6725_v4 = vld [vmem:[#allocation99_spill] sm:$0xff] }
  0xe7   : > { %1143 = vmatprep.subr.mxu0 %v6718_v53  ;;  %1315 = vmatprep.subr.mxu1 %v6719_v62  ;;  %v6726_v62 = vld [vmem:[#allocation100_spill] sm:$0xff] }
  0xe8   : > { %1146 = vmatpush2.msra.mxu0 %v6720_v40  ;;  %1197 = vmatprep.mubr.f32.mxu0 %v4484_v39  ;;  %v6727_v39 = vld [vmem:[#allocation101_spill] sm:$0xff] }
  0xe9   : > { %1149 = vmatprep.subr.mxu0 %v6721_v50  ;;  %1317 = vmatpush2.msra.mxu1 %v6722_v25  ;;  %v6728_v25 = vld [vmem:[#allocation102_spill] sm:$0xff] }
  0xea   : > { %1152 = vmatpush2.msra.mxu0 %v6723_v18  ;;  %1319 = vmatprep.subr.mxu1 %v4276_v59  ;;  %v6729_v59 = vld [vmem:[#allocation103_spill] sm:$0xff] }
  0xeb   : > { %1155 = vmatprep.subr.mxu0 %v6724_v34  ;;  %1321 = vmatpush2.msra.mxu1 %v4287_v43 }
  0xec   : > { %1158 = vmatpush2.msra.mxu0 %v6725_v4  ;;  %1323 = vmatprep.subr.mxu1 %v4300_v2 }
  0xed   : > { %1161 = vmatprep.subr.mxu0 %v6726_v62  ;;  %1325 = vmatpush2.msra.mxu1 %v4312_v13  ;;  %v6730_v13 = vand.u32 4294901760, %v4487_v0 }
  0xee   : > { %1164 = vmatpush2.msra.mxu0 %v6727_v39  ;;  %1327 = vmatprep.subr.mxu1 %v4323_v49 }
  0xef   : > { %1167 = vmatprep.subr.mxu0 %v6728_v25  ;;  %1329 = vmatpush2.msra.mxu1 %v4342_v63 }
  0xf0   : > { %1170 = vmatpush2.msra.mxu0 %v6729_v59  ;;  %1331 = vmatprep.subr.mxu1 %v4355_v12 }
  0xf1   : > { %1173 = vmatprep.subr.mxu0 %v4397_v35  ;;  %1333 = vmatpush2.msra.mxu1 %v4372_v55 }
  0xf2   : > { %1176 = vmatpush2.msra.mxu0 %v4401_v58  ;;  %1341 = vmatmul.mubr.f32.vlgmr.msra.gmra.mxu1 %v6730_v13  ;;  %v6733_v13 = vand.u32 4294901760, %v3625_v29  ;;  %v6742_v29 = vand.u32 4294901760, %v6646_v19 }
  0xf3   : > { %1179 = vmatprep.subr.mxu0 %v4406_v61  ;;  %1613 = vmatprep.subr.mxu1 %v3586_v8  ;;  %v6731_v8 = vld [vmem:[#allocation15_spill] sm:$0xff] }
  0xf4   : > { %1182 = vmatpush2.msra.mxu0 %v4411_v57  ;;  %1615 = vmatpush1.msra.mxu1 %v3588_v9  ;;  %v6732_v9 = vand.u32 4294901760, %v6731_v8 }
  0xf5   : > { %1185 = vmatprep.subr.mxu0 %v4429_v27  ;;  %1617 = vmatprep.subr.mxu1 %v3590_v10  ;;  %v6734_v10 = vand.u32 4294901760, %v3631_v31  ;;  %v6744_v31 = vand.u32 4294901760, %v6650_v6  ;;  %v6766_v6 = vld [vmem:[#allocation34_spill] sm:$0xff] }
  0xf6   : > { %1188 = vmatpush2.msra.mxu0 %v4433_v26  ;;  %1619 = vmatpush1.msra.mxu1 %v3592_v14  ;;  %v6735_v14 = vand.u32 4294901760, %v3645_v37  ;;  %v6746_v37 = vand.u32 4294901760, %v6654_v48  ;;  %v6757_v48 = vld [vmem:[#allocation28_spill] sm:$0xff] }
  0xf7   : > { %1191 = vmatprep.subr.mxu0 %v4438_v7  ;;  %1621 = vmatprep.subr.mxu1 %v3594_v15  ;;  %v6736_v15 = vand.u32 4294901760, %v3654_v41  ;;  %v6748_v41 = vld [vmem:[#allocation22_spill] sm:$0xff] }
  0xf8   : > { %1194 = vmatpush2.msra.mxu0 %v4442_v52  ;;  %1623 = vmatpush1.msra.mxu1 %v3596_v16  ;;  %v6737_v16 = vand.u32 4294901760, %v3667_v46 }
  0xf9   : > { %1200 = vmatmul.mubr.f32.vlgmr.msra.gmra.mxu0 %v4487_v0  ;;  %1350 = vmatprep.subr.mxu0 %v6732_v9  ;;  %v6758_v0 = vld [vmem:[#allocation37_spill] sm:$0xff]  ;;  %v6769_v9 = vld [vmem:[#allocation36_spill] sm:$0xff] }
  0xfa   : > { %1354 = vmatpush1.msra.mxu0 %v6733_v13  ;;  %1625 = vmatprep.subr.mxu1 %v3604_v21  ;;  %v6738_v21 = vand.u32 4294901760, %v3681_v51  ;;  %v6752_v51 = vld [vmem:[#allocation33_spill] sm:$0xff] }
  0xfb   : > { %1358 = vmatprep.subr.mxu0 %v6734_v10  ;;  %1627 = vmatpush1.msra.mxu1 %v3606_v22  ;;  %v6739_v22 = vand.u32 4294901760, %v3707_v1  ;;  %v6754_v1 = vld [vmem:[#allocation26_spill] sm:$0xff]  ;;  %v6770_v13 = vld [vmem:[#allocation45_spill] sm:$0xff] }
  0xfc   : > { %1362 = vmatpush1.msra.mxu0 %v6735_v14  ;;  %1629 = vmatprep.subr.mxu1 %v3609_v23  ;;  %v6740_v23 = vand.u32 4294901760, %v3720_v11  ;;  %v6771_v10 = vand.u32 4294901760, %v6770_v13  ;;  %v6772_v14 = vld [vmem:[#allocation38_spill] sm:$0xff] }
  0xfd   : > { %1366 = vmatprep.subr.mxu0 %v6736_v15  ;;  %1631 = vmatpush1.msra.mxu1 %v3622_v28  ;;  %v6741_v28 = vand.u32 4294901760, %v6644_v60  ;;  %v6760_v60 = vld [vmem:[#allocation30_spill] sm:$0xff]  ;;  %v6773_v15 = vld [vmem:[#allocation47_spill] sm:$0xff] }
  0xfe   : > { %1370 = vmatpush1.msra.mxu0 %v6737_v16  ;;  %1633 = vmatprep.subr.mxu1 %v3628_v30  ;;  %v6743_v30 = vand.u32 4294901760, %v6648_v45  ;;  %v6764_v45 = vld [vmem:[#allocation41_spill] sm:$0xff]  ;;  %v6774_v16 = vand.u32 4294901760, %v6773_v15 }
  0xff   : > { %1374 = vmatprep.subr.mxu0 %v6738_v21  ;;  %1635 = vmatpush1.msra.mxu1 %v3642_v36  ;;  %v6745_v36 = vand.u32 4294901760, %v6652_v5  ;;  %v6767_v5 = vld [vmem:[#allocation43_spill] sm:$0xff]  ;;  %v6775_v21 = vld [vmem:[#allocation40_spill] sm:$0xff]  ;;  %v6802_v15 = vld [vmem:[#allocation65_spill] sm:$0xff] }
 0x100   : > { %1378 = vmatpush1.msra.mxu0 %v6739_v22  ;;  %1637 = vmatprep.subr.mxu1 %v3648_v38  ;;  %v6747_v38 = vand.u32 4294901760, %v6656_v17  ;;  %v6759_v17 = vand.u32 4294901760, %v6758_v0  ;;  %v6768_v8 = vand.u32 4294901760, %v6767_v5  ;;  %v6776_v22 = vld [vmem:[#allocation49_spill] sm:$0xff] }
 0x101   : > { %1382 = vmatprep.subr.mxu0 %v6740_v23  ;;  %1639 = vmatpush1.msra.mxu1 %v3657_v42  ;;  %v6749_v42 = vld [vmem:[#allocation31_spill] sm:$0xff]  ;;  %v6777_v23 = vand.u32 4294901760, %v6776_v22  ;;  %v352_v5 = vld [vmem:[#allocation4 + $0xd8] sm:$0xff] }
 0x102   : > { %1386 = vmatpush1.msra.mxu0 %v6741_v28  ;;  %1641 = vmatprep.subr.mxu1 %v3670_v47  ;;  %v6750_v46 = vand.u32 4294901760, %v6749_v42  ;;  %v6751_v47 = vld [vmem:[#allocation24_spill] sm:$0xff]  ;;  %v6778_v28 = vld [vmem:[#allocation42_spill] sm:$0xff] }
 0x103   : > { %1390 = vmatprep.subr.mxu0 %v6742_v29  ;;  %1643 = vmatpush1.msra.mxu1 %v3691_v56  ;;  %v6753_v56 = vand.u32 4294901760, %v6752_v51  ;;  %v6779_v29 = vld [vmem:[#allocation51_spill] sm:$0xff]  ;;  %v6784_v42 = vld [vmem:[#allocation46_spill] sm:$0xff]  ;;  %v6787_v51 = vld [vmem:[#allocation48_spill] sm:$0xff] }
 0x104   : > { %1394 = vmatpush1.msra.mxu0 %v6743_v30  ;;  %1645 = vmatprep.subr.mxu1 %v3710_v3  ;;  %v6755_v3 = vld [vmem:[#allocation35_spill] sm:$0xff]  ;;  %v6780_v30 = vand.u32 4294901760, %v6779_v29 }
 0x105   : > { %1398 = vmatprep.subr.mxu0 %v6744_v31  ;;  %1647 = vmatpush1.msra.mxu1 %v6645_v33  ;;  %v6756_v11 = vand.u32 4294901760, %v6755_v3  ;;  %v6761_v33 = vld [vmem:[#allocation39_spill] sm:$0xff]  ;;  %v6781_v31 = vld [vmem:[#allocation44_spill] sm:$0xff] }
 0x106   : > { %1402 = vmatpush1.msra.mxu0 %v6745_v36  ;;  %1649 = vmatprep.subr.mxu1 %v6647_v32  ;;  %v6762_v19 = vand.u32 4294901760, %v6761_v33  ;;  %v6763_v32 = vld [vmem:[#allocation32_spill] sm:$0xff]  ;;  %v356_v36 = vld [vmem:[#allocation4 + $0xf8] sm:$0xff]  ;;  %v6807_v29 = vld [vmem:[#allocation67_spill] sm:$0xff] }
 0x107   : > { %1406 = vmatprep.subr.mxu0 %v6746_v37  ;;  %1651 = vmatpush1.msra.mxu1 %v6649_v44  ;;  %v6765_v44 = vand.u32 4294901760, %v6764_v45  ;;  %v355_v37 = vld [vmem:[#allocation4 + $0xf0] sm:$0xff] }
 0x108   : > { %1410 = vmatpush1.msra.mxu0 %v6747_v38  ;;  %1653 = vmatprep.subr.mxu1 %v6748_v41  ;;  %v6782_v38 = vld [vmem:[#allocation53_spill] sm:$0xff]  ;;  %v4724_v0 = vand.u32 4294901760, %v355_v37 }
 0x109   : > { %1414 = vmatprep.subr.mxu0 %v6750_v46  ;;  %1655 = vmatpush1.msra.mxu1 %v6751_v47  ;;  %v6783_v41 = vand.u32 4294901760, %v6782_v38  ;;  %v6785_v46 = vld [vmem:[#allocation55_spill] sm:$0xff]  ;;  %v4751_v38 = vand.u32 4294901760, %v352_v5 }
 0x10a   : > { %1418 = vmatpush1.msra.mxu0 %v6753_v56  ;;  %1657 = vmatprep.subr.mxu1 %v6754_v1  ;;  %v6786_v47 = vand.u32 4294901760, %v6785_v46  ;;  %v354_v56 = vld [vmem:[#allocation4 + $0xe8] sm:$0xff]  ;;  %v6788_v1 = vld [vmem:[#allocation57_spill] sm:$0xff]  ;;  %v4743_v22 = vsub.f32 %v355_v37, %v4724_v0 }
 0x10b   : > { %1422 = vmatprep.subr.mxu0 %v6756_v11  ;;  %1659 = vmatpush1.msra.mxu1 %v6757_v48  ;;  %v6789_v3 = vand.u32 4294901760, %v6788_v1  ;;  %v6790_v11 = vld [vmem:[#allocation50_spill] sm:$0xff]  ;;  %v4722_v48 = vand.u32 4294901760, %v356_v36  ;;  %6810 = vst [vmem:[#allocation21_spill] sm:$0xff] %v4751_v38  ;;  %v6812_v46 = vld [vmem:[#allocation69_spill] sm:$0xff] }
 0x10c   : > { %1426 = vmatpush1.msra.mxu0 %v6759_v17  ;;  %1661 = vmatprep.subr.mxu1 %v6760_v60  ;;  %v353_v17 = vld [vmem:[#allocation4 + $0xe0] sm:$0xff]  ;;  %6805 = vst [vmem:[#allocation19_spill] sm:$0xff] %v4743_v22  ;;  %v347_v37 = vld [vmem:[#allocation4 + $0xb0] sm:$0xff] }
 0x10d   : > { %1430 = vmatprep.subr.mxu0 %v6762_v19  ;;  %1663 = vmatpush1.msra.mxu1 %v6763_v32  ;;  %v6791_v60 = vld [vmem:[#allocation59_spill] sm:$0xff]  ;;  %v6793_v19 = vld [vmem:[#allocation52_spill] sm:$0xff]  ;;  %v6794_v32 = vld [vmem:[#allocation61_spill] sm:$0xff] }
 0x10e   : > { %1434 = vmatpush1.msra.mxu0 %v6765_v44  ;;  %1665 = vmatprep.subr.mxu1 %v6766_v6  ;;  %v6792_v33 = vand.u32 4294901760, %v6791_v60  ;;  %v6795_v45 = vand.u32 4294901760, %v6794_v32  ;;  %v6796_v44 = vld [vmem:[#allocation54_spill] sm:$0xff]  ;;  %v4732_v6 = vand.u32 4294901760, %v354_v56  ;;  %v6821_v32 = vld [vmem:[#allocation73_spill] sm:$0xff] }
 0x10f   : > { %1438 = vmatprep.subr.mxu0 %v6768_v8  ;;  %1667 = vmatpush1.msra.mxu1 %v6769_v9  ;;  %v351_v8 = vld [vmem:[#allocation4 + $0xd0] sm:$0xff]  ;;  %v6798_v9 = vld [vmem:[#allocation63_spill] sm:$0xff] }
 0x110   : > { %1442 = vmatpush1.msra.mxu0 %v6771_v10  ;;  %1669 = vmatprep.subr.mxu1 %v6772_v14  ;;  %6797 = vst [vmem:[#allocation17_spill] sm:$0xff] %v4732_v6  ;;  %v6799_v13 = vand.u32 4294901760, %v6798_v9  ;;  %v6800_v10 = vld [vmem:[#allocation56_spill] sm:$0xff]  ;;  %v4737_v14 = vand.u32 4294901760, %v353_v17  ;;  %v4759_v1 = vsub.f32 %v354_v56, %v4732_v6 }
 0x111   : > { %1446 = vmatprep.subr.mxu0 %v6774_v16  ;;  %1671 = vmatpush1.msra.mxu1 %v6775_v21  ;;  %v6803_v16 = vand.u32 4294901760, %v6802_v15  ;;  %v6804_v21 = vld [vmem:[#allocation58_spill] sm:$0xff]  ;;  %v6825_v15 = vld [vmem:[#allocation75_spill] sm:$0xff] }
 0x112   : > { %1450 = vmatpush1.msra.mxu0 %v6777_v23  ;;  %1673 = vmatprep.subr.mxu1 %v6778_v28  ;;  %6801 = vst [vmem:[#allocation16_spill] sm:$0xff] %v4737_v14  ;;  %v349_v23 = vld [vmem:[#allocation4 + $0xc0] sm:$0xff]  ;;  %v4746_v28 = vsub.f32 %v356_v36, %v4722_v48  ;;  %6815 = vst [vmem:[#allocation23_spill] sm:$0xff] %v4759_v1  ;;  %v4765_v60 = vsub.f32 %v353_v17, %v4737_v14  ;;  %v6827_v17 = vld [vmem:[#allocation68_spill] sm:$0xff] }
 0x113   : > { %1454 = vmatprep.subr.mxu0 %v6780_v30  ;;  %1675 = vmatpush1.msra.mxu1 %v6781_v31  ;;  %v6808_v30 = vand.u32 4294901760, %v6807_v29  ;;  %v6809_v31 = vld [vmem:[#allocation60_spill] sm:$0xff]  ;;  %v6816_v36 = vld [vmem:[#allocation71_spill] sm:$0xff]  ;;  %v4782_v29 = vand.u32 4294901760, %v347_v37 }
 0x114   : > { %1458 = vmatpush1.msra.mxu0 %v6783_v41  ;;  %1677 = vmatprep.subr.mxu1 %v6784_v42  ;;  %6806 = vst [vmem:[#allocation18_spill] sm:$0xff] %v4746_v28  ;;  %v4753_v41 = vand.u32 4294901760, %v351_v8  ;;  %v350_v42 = vld [vmem:[#allocation4 + $0xc8] sm:$0xff]  ;;  %6819 = vst [vmem:[#allocation25_spill] sm:$0xff] %v4765_v60  ;;  %v6316_v56 = vand.u32 4294901760, %v4746_v28 }
 0x115   : > { %1462 = vmatprep.subr.mxu0 %v6786_v47  ;;  %1679 = vmatpush2.msra.mxu1 %v6787_v51  ;;  %v6813_v47 = vand.u32 4294901760, %v6812_v46  ;;  %v6814_v51 = vld [vmem:[#allocation62_spill] sm:$0xff]  ;;  %v4772_v9 = vand.u32 4294901760, %v350_v42  ;;  %6829 = vst [vmem:[#allocation87_spill] sm:$0xff] %v4782_v29  ;;  %v6831_v46 = vld [vmem:[#allocation77_spill] sm:$0xff] }
 0x116   : > { %1466 = vmatpush1.msra.mxu0 %v6789_v3  ;;  %1681 = vmatprep.subr.mxu1 %v6790_v11  ;;  %6811 = vst [vmem:[#allocation20_spill] sm:$0xff] %v4753_v41  ;;  %v6817_v3 = vand.u32 4294901760, %v6816_v36  ;;  %v6818_v11 = vld [vmem:[#allocation64_spill] sm:$0xff] }
 0x117   : > { %1470 = vmatprep.subr.mxu0 %v6792_v33  ;;  %1683 = vmatpush2.msra.mxu1 %v6793_v19  ;;  %v4767_v33 = vand.u32 4294901760, %v349_v23  ;;  %v348_v19 = vld [vmem:[#allocation4 + $0xb8] sm:$0xff]  ;;  %6824 = vst [vmem:[#allocation29_spill] sm:$0xff] %v4772_v9 }
 0x118   : > { %1474 = vmatpush1.msra.mxu0 %v6795_v45  ;;  %1685 = vmatprep.subr.mxu1 %v6796_v44  ;;  %v6822_v45 = vand.u32 4294901760, %v6821_v32  ;;  %v6823_v44 = vld [vmem:[#allocation66_spill] sm:$0xff]  ;;  %v4790_v36 = vand.u32 4294901760, %v348_v19 }
 0x119   : > { %1478 = vmatprep.subr.mxu0 %v6799_v13  ;;  %1687 = vmatpush2.msra.mxu1 %v6800_v10  ;;  %6820 = vst [vmem:[#allocation27_spill] sm:$0xff] %v4767_v33  ;;  %v6317_v13 = vand.u32 4294901760, %v4743_v22  ;;  %v346_v10 = vld [vmem:[#allocation4 + $0xa8] sm:$0xff] }
 0x11a   : > { %1482 = vmatpush2.msra.mxu0 %v6803_v16  ;;  %1689 = vmatprep.subr.mxu1 %v6804_v21  ;;  %v6826_v16 = vand.u32 4294901760, %v6825_v15  ;;  %v4780_v21 = vsub.f32 %v351_v8, %v4753_v41  ;;  %6834 = vst [vmem:[#allocation91_spill] sm:$0xff] %v4790_v36  ;;  %v6837_v8 = vld [vmem:[#allocation72_spill] sm:$0xff] }
 0x11b   : > { %1486 = vmatprep.subr.mxu0 %v6808_v30  ;;  %1691 = vmatpush2.msra.mxu1 %v6809_v31  ;;  %v345_v30 = vld [vmem:[#allocation4 + $0xa0] sm:$0xff]  ;;  %v4785_v31 = vsub.f32 %v352_v5, %v4751_v38  ;;  %v343_v15 = vld [vmem:[#allocation4 + $0x90] sm:$0xff] }
 0x11c   : > { %1490 = vmatpush2.msra.mxu0 %v6813_v47  ;;  %1693 = vmatprep.subr.mxu1 %v6814_v51  ;;  %6828 = vst [vmem:[#allocation83_spill] sm:$0xff] %v4780_v21  ;;  %v6832_v47 = vand.u32 4294901760, %v6831_v46  ;;  %v6833_v51 = vld [vmem:[#allocation70_spill] sm:$0xff] }
 0x11d   : > { %1494 = vmatprep.subr.mxu0 %v6817_v3  ;;  %1695 = vmatpush2.msra.mxu1 %v6818_v11  ;;  %6830 = vst [vmem:[#allocation89_spill] sm:$0xff] %v4785_v31  ;;  %v6835_v11 = vld [vmem:[#allocation79_spill] sm:$0xff]  ;;  %v6842_v46 = vld [vmem:[#allocation74_spill] sm:$0xff] }
 0x11e   : > { %1498 = vmatpush2.msra.mxu0 %v6822_v45  ;;  %1697 = vmatprep.subr.mxu1 %v6823_v44  ;;  %v6836_v32 = vand.u32 4294901760, %v6835_v11  ;;  %v4797_v45 = vsub.f32 %v349_v23, %v4767_v33  ;;  %v4799_v44 = vand.u32 4294901760, %v346_v10  ;;  %v4813_v23 = vsub.f32 %v4743_v22, %v6317_v13  ;;  %v344_v11 = vld [vmem:[#allocation4 + $0x98] sm:$0xff] }
 0x11f   : > { %1502 = vmatprep.subr.mxu0 %v6826_v16  ;;  %1699 = vmatpush2.msra.mxu1 %v6827_v17  ;;  %v6840_v16 = vld [vmem:[#allocation81_spill] sm:$0xff]  ;;  %v6850_v3 = vld [vmem:[#allocation78_spill] sm:$0xff] }
 0x120   : > { %1506 = vmatpush2.msra.mxu0 %v6832_v47  ;;  %1701 = vmatprep.subr.mxu1 %v6833_v51  ;;  %6838 = vst [vmem:[#allocation93_spill] sm:$0xff] %v4797_v45  ;;  %6839 = vst [vmem:[#allocation95_spill] sm:$0xff] %v4799_v44  ;;  %v6841_v17 = vand.u32 4294901760, %v6840_v16  ;;  %v4808_v47 = vsub.f32 %v4746_v28, %v6316_v56  ;;  %v4815_v51 = vand.u32 4294901760, %v345_v30  ;;  %v6846_v16 = vld [vmem:[#allocation76_spill] sm:$0xff]  ;;  %v6848_v13 = vld [vmem:[#allocation85_spill] sm:$0xff] }
 0x121   : > { %1510 = vmatprep.subr.mxu0 %v6836_v32  ;;  %1703 = vmatpush2.msra.mxu1 %v6837_v8  ;;  %v4818_v32 = vsub.f32 %v350_v42, %v4772_v9  ;;  %v6845_v8 = vand.u32 4294901760, %v6710_v54  ;;  %v6849_v5 = vand.u32 4294901760, %v6848_v13  ;;  %v6851_v42 = vand.u32 4294901760, %v4759_v1  ;;  %v6855_v56 = vld [vmem:[#allocation80_spill] sm:$0xff] }
 0x122   : > { %1514 = vmatpush2.msra.mxu0 %v6841_v17  ;;  %1705 = vmatprep.subr.mxu1 %v6842_v46  ;;  %6843 = vst [vmem:[#allocation96_spill] sm:$0xff] %v4815_v51  ;;  %v4824_v17 = vsub.f32 %v347_v37, %v4782_v29  ;;  %v4836_v54 = vand.u32 4294901760, %v343_v15  ;;  %v4839_v37 = vsub.f32 %v348_v19, %v4790_v36  ;;  %v6856_v13 = vand.u32 4294901760, %v4765_v60  ;;  %v6863_v46 = vld [vmem:[#allocation84_spill] sm:$0xff] }
 0x123   : > { %6844 = vst [vmem:[#allocation97_spill] sm:$0xff] %v4818_v32  ;;  %1518 = vmatprep.subr.mxu0 %v6845_v8  ;;  %1707 = vmatpush2.msra.mxu1 %v6846_v16  ;;  %v4834_v22 = vsub.f32 %v4759_v1, %v6851_v42  ;;  %v342_v8 = vld [vmem:[#allocation4 + $0x88] sm:$0xff]  ;;  %v6854_v16 = vand.u32 4294901760, %v6714_v24  ;;  %v341_v42 = vld [vmem:[#allocation4 + $0x80] sm:$0xff]  ;;  %v4853_v1 = vsub.f32 %v346_v10, %v4799_v44  ;;  %v6859_v19 = vand.u32 4294901760, %v6716_v20 }
 0x124   : > { %6847 = vst [vmem:[#allocation99_spill] sm:$0xff] %v4824_v17  ;;  %1522 = vmatpush2.msra.mxu0 %v6849_v5  ;;  %1709 = vmatprep.subr.mxu1 %v6850_v3  ;;  %6852 = vst [vmem:[#allocation100_spill] sm:$0xff] %v4836_v54  ;;  %v4847_v3 = vsub.f32 %v4765_v60, %v6856_v13  ;;  %v4849_v5 = vand.u32 4294901760, %v344_v11  ;;  %v6860_v24 = vld [vmem:[#allocation82_spill] sm:$0xff]  ;;  %v4861_v13 = vsub.f32 %v345_v30, %v4815_v51  ;;  %v6872_v51 = vld [vmem:[#allocation88_spill] sm:$0xff] }
 0x125   : > { %6853 = vst [vmem:[#allocation101_spill] sm:$0xff] %v4839_v37  ;;  %1526 = vmatprep.subr.mxu0 %v6854_v16  ;;  %1711 = vmatpush2.msra.mxu1 %v6855_v56  ;;  %6858 = vst [vmem:[#allocation103_spill] sm:$0xff] %v4853_v1  ;;  %v6862_v28 = vand.u32 4294901760, %v6718_v53  ;;  %v6864_v10 = vand.u32 4294901760, %v4785_v31  ;;  %v4877_v16 = vand.u32 4294901760, %v342_v8  ;;  %v340_v30 = vld [vmem:[#allocation4 + $0x78] sm:$0xff] }
 0x126   : > { %6857 = vst [vmem:[#allocation102_spill] sm:$0xff] %v4849_v5  ;;  %1530 = vmatpush2.msra.mxu0 %v6859_v19  ;;  %1713 = vmatprep.subr.mxu1 %v6860_v24  ;;  %6861 = vst [vmem:[#allocation15_spill] sm:$0xff] %v4861_v13  ;;  %v6865_v19 = vand.u32 4294901760, %v4780_v21  ;;  %v339_v56 = vld [vmem:[#allocation4 + $0x70] sm:$0xff]  ;;  %v6867_v53 = vand.u32 4294901760, %v6720_v40  ;;  %v6873_v40 = vand.u32 4294901760, %v4797_v45 }
 0x127   : > { %1534 = vmatprep.subr.mxu0 %v6862_v28  ;;  %1715 = vmatpush2.msra.mxu1 %v6863_v46  ;;  %v4870_v20 = vsub.f32 %v4785_v31, %v6864_v10  ;;  %6866 = vst [vmem:[#allocation22_spill] sm:$0xff] %v4877_v16  ;;  %v6868_v28 = vld [vmem:[#allocation86_spill] sm:$0xff]  ;;  %v4885_v10 = vsub.f32 %v343_v15, %v4836_v54  ;;  %v4887_v31 = vand.u32 4294901760, %v341_v42  ;;  %v4911_v60 = vand.u32 4294901760, %v340_v30  ;;  %v6881_v54 = vld [vmem:[#allocation105_spill] sm:$0xff] }
 0x128   : > { %v4875_v24 = vsub.f32 %v4780_v21, %v6865_v19  ;;  %1538 = vmatpush2.msra.mxu0 %v6867_v53  ;;  %1717 = vmatprep.subr.mxu1 %v6868_v28  ;;  %v6871_v21 = vand.u32 4294901760, %v6721_v50  ;;  %v4897_v53 = vsub.f32 %v4797_v45, %v6873_v40  ;;  %v337_v15 = vld [vmem:[#allocation4 + $0x60] sm:$0xff]  ;;  %v4901_v46 = vsub.f32 %v344_v11, %v4849_v5  ;;  %v338_v45 = vld [vmem:[#allocation4 + $0x68] sm:$0xff] }
 0x129   : > { %6869 = vst [vmem:[#allocation31_spill] sm:$0xff] %v4885_v10  ;;  %6870 = vst [vmem:[#allocation24_spill] sm:$0xff] %v4887_v31  ;;  %1719 = vmatpush2.msra.mxu1 %v6872_v51  ;;  %v6875_v19 = vand.u32 4294901760, %v6723_v18  ;;  %v6876_v50 = vld [vmem:[#allocation90_spill] sm:$0xff]  ;;  %v4913_v40 = vand.u32 4294901760, %v339_v56  ;;  %v6880_v11 = vand.u32 4294901760, %v6724_v34  ;;  %1604 = vmatprep.mubr.f32.mxu0 %v6881_v54  ;;  %v4933_v34 = vsub.f32 %v341_v42, %v4887_v31 }
 0x12a   : > { %1542 = vmatprep.subr.mxu0 %v6871_v21  ;;  %6874 = vst [vmem:[#allocation33_spill] sm:$0xff] %v4901_v46  ;;  %1721 = vmatprep.subr.mxu1 %v6876_v50  ;;  %v6877_v21 = vand.u32 4294901760, %v4818_v32  ;;  %6878 = vst [vmem:[#allocation26_spill] sm:$0xff] %v4911_v60  ;;  %v6882_v50 = vand.u32 4294901760, %v4824_v17  ;;  %v6884_v5 = vand.u32 4294901760, %v6725_v4  ;;  %v6885_v28 = vld [vmem:[#allocation92_spill] sm:$0xff] }
 0x12b   : > { %1546 = vmatpush2.msra.mxu0 %v6875_v19  ;;  %6879 = vst [vmem:[#allocation35_spill] sm:$0xff] %v4913_v40  ;;  %1723 = vmatpush2.msra.mxu1 %v6885_v28  ;;  %6886 = vst [vmem:[#allocation37_spill] sm:$0xff] %v4933_v34  ;;  %v4940_v18 = vand.u32 4294901760, %v337_v15  ;;  %v6890_v4 = vld [vmem:[#allocation94_spill] sm:$0xff]  ;;  %v4947_v42 = vand.u32 4294901760, %v338_v45  ;;  %v6892_v28 = vand.u32 4294901760, %v4853_v1 }
 0x12c   : > { %v4909_v51 = vsub.f32 %v4818_v32, %v6877_v21  ;;  %1550 = vmatprep.subr.mxu0 %v6880_v11  ;;  %v4924_v21 = vsub.f32 %v4824_v17, %v6882_v50  ;;  %v4927_v32 = vsub.f32 %v342_v8, %v4877_v16  ;;  %v6887_v11 = vand.u32 4294901760, %v4839_v37  ;;  %v336_v50 = vld [vmem:[#allocation4 + $0x58] sm:$0xff]  ;;  %v335_v17 = vld [vmem:[#allocation4 + $0x50] sm:$0xff]  ;;  %1725 = vmatprep.subr.mxu1 %v6890_v4  ;;  %v333_v8 = vld [vmem:[#allocation4 + $0x40] sm:$0xff] }
 0x12d   : > { %1554 = vmatpush2.msra.mxu0 %v6884_v5  ;;  %6888 = vst [vmem:[#allocation30_spill] sm:$0xff] %v4940_v18  ;;  %v6889_v16 = vand.u32 4294901760, %v6726_v62  ;;  %6891 = vst [vmem:[#allocation39_spill] sm:$0xff] %v4947_v42  ;;  %v6893_v31 = vand.u32 4294901760, %v6727_v39  ;;  %1727 = vmatpush2.msra.mxu1 %v4287_v43  ;;  %v6895_v4 = vand.u32 4294901760, %v4861_v13  ;;  %v4974_v39 = vand.u32 4294901760, %v336_v50 }
 0x12e   : > { %6883 = vst [vmem:[#allocation28_spill] sm:$0xff] %v4927_v32  ;;  %v4938_v19 = vsub.f32 %v4839_v37, %v6887_v11  ;;  %v4952_v11 = vsub.f32 %v4853_v1, %v6892_v28  ;;  %v4968_v28 = vsub.f32 %v340_v30, %v4911_v60  ;;  %v6897_v37 = vand.u32 4294901760, %v6728_v25  ;;  %1729 = vmatprep.subr.mxu1 %v4300_v2  ;;  %v331_v1 = vld [vmem:[#allocation4 + $0x30] sm:$0xff]  ;;  %v332_v30 = vld [vmem:[#allocation4 + $0x38] sm:$0xff] }
 0x12f   : > { %1558 = vmatprep.subr.mxu0 %v6889_v16  ;;  %v4960_v16 = vsub.f32 %v339_v56, %v4913_v40  ;;  %v4965_v5 = vsub.f32 %v4861_v13, %v6895_v4  ;;  %6898 = vst [vmem:[#allocation34_spill] sm:$0xff] %v4974_v39  ;;  %v334_v56 = vld [vmem:[#allocation4 + $0x48] sm:$0xff]  ;;  %v6900_v4 = vand.u32 4294901760, %v6729_v59  ;;  %v6901_v13 = vld [vmem:[#allocation98_spill] sm:$0xff]  ;;  %v4984_v25 = vsub.f32 %v337_v15, %v4940_v18 }
 0x130   : > { %1562 = vmatpush2.msra.mxu0 %v6893_v31  ;;  %6896 = vst [vmem:[#allocation41_spill] sm:$0xff] %v4968_v28  ;;  %v4976_v31 = vand.u32 4294901760, %v335_v17  ;;  %1731 = vmatpush2.msra.mxu1 %v6901_v13  ;;  %v6903_v2 = vand.u32 4294901760, %v4885_v10  ;;  %v6904_v62 = vand.u32 4294901760, %v4397_v35  ;;  %v6905_v13 = vand.u32 4294901760, %v4901_v46  ;;  %v329_v59 = vld [vmem:[#allocation4 + $0x20] sm:$0xff] }
 0x131   : > { %6894 = vst [vmem:[#allocation32_spill] sm:$0xff] %v4960_v16  ;;  %1566 = vmatprep.subr.mxu0 %v6897_v37  ;;  %6902 = vst [vmem:[#allocation36_spill] sm:$0xff] %v4984_v25  ;;  %1733 = vmatprep.subr.mxu1 %v4323_v49  ;;  %v6908_v43 = vand.u32 4294901760, %v4401_v58  ;;  %v5010_v35 = vand.u32 4294901760, %v334_v56  ;;  %v6912_v58 = vand.u32 4294901760, %v4927_v32  ;;  %v330_v49 = vld [vmem:[#allocation4 + $0x28] sm:$0xff] }
 0x132   : > { %6899 = vst [vmem:[#allocation43_spill] sm:$0xff] %v4976_v31  ;;  %1570 = vmatpush2.msra.mxu0 %v6900_v4  ;;  %v4989_v37 = vsub.f32 %v4885_v10, %v6903_v2  ;;  %v4999_v15 = vsub.f32 %v4901_v46, %v6905_v13  ;;  %v5001_v4 = vand.u32 4294901760, %v333_v8  ;;  %v5004_v2 = vsub.f32 %v338_v45, %v4947_v42  ;;  %v325_v46 = vld [vmem:[#allocation4] sm:$0xff] }
 0x133   : > { %1574 = vmatprep.subr.mxu0 %v6904_v62  ;;  %1735 = vmatpush2.msra.mxu1 %v4342_v63  ;;  %6909 = vst [vmem:[#allocation47_spill] sm:$0xff] %v5010_v35  ;;  %v6910_v10 = vand.u32 4294901760, %v4406_v61  ;;  %v5018_v45 = vsub.f32 %v335_v17, %v4976_v31  ;;  %v5023_v63 = vsub.f32 %v4927_v32, %v6912_v58  ;;  %v6915_v13 = vand.u32 4294901760, %v4411_v57 }
 0x134   : > { %6906 = vst [vmem:[#allocation45_spill] sm:$0xff] %v5001_v4  ;;  %6907 = vst [vmem:[#allocation38_spill] sm:$0xff] %v5004_v2  ;;  %1578 = vmatpush2.msra.mxu0 %v6908_v43  ;;  %1737 = vmatprep.subr.mxu1 %v4355_v12  ;;  %v5025_v43 = vand.u32 4294901760, %v331_v1  ;;  %v5028_v62 = vsub.f32 %v336_v50, %v4974_v39  ;;  %v6916_v61 = vand.u32 4294901760, %v4933_v34  ;;  %v6918_v32 = vand.u32 4294901760, %v4429_v27  ;;  %v328_v50 = vld [vmem:[#allocation4 + $0x18] sm:$0xff] }
 0x135   : > { %1582 = vmatprep.subr.mxu0 %v6910_v10  ;;  %6911 = vst [vmem:[#allocation40_spill] sm:$0xff] %v5018_v45  ;;  %1739 = vmatpush2.msra.mxu1 %v4372_v55  ;;  %v5039_v10 = vand.u32 4294901760, %v332_v30  ;;  %v5047_v55 = vsub.f32 %v333_v8, %v5001_v4  ;;  %v6921_v12 = vand.u32 4294901760, %v4433_v26  ;;  %v6923_v27 = vand.u32 4294901760, %v4968_v28 }
 0x136   : > { %6913 = vst [vmem:[#allocation49_spill] sm:$0xff] %v5025_v43  ;;  %6914 = vst [vmem:[#allocation42_spill] sm:$0xff] %v5028_v62  ;;  %1586 = vmatpush2.msra.mxu0 %v6915_v13  ;;  %v5037_v17 = vsub.f32 %v4933_v34, %v6916_v61  ;;  %1741 = vmatprep.mubr.f32.mxu1 %v6881_v54  ;;  %v5050_v13 = vand.u32 4294901760, %v329_v59  ;;  %v327_v61 = vld [vmem:[#allocation4 + $0x10] sm:$0xff]  ;;  %v6922_v34 = vld [vmem:[#allocation106_spill] sm:$0xff]  ;;  %v6924_v54 = vand.u32 4294901760, %v4960_v16 }
 0x137   : > { %6917 = vst [vmem:[#allocation51_spill] sm:$0xff] %v5039_v10  ;;  %1590 = vmatprep.subr.mxu0 %v6918_v32  ;;  %6919 = vst [vmem:[#allocation44_spill] sm:$0xff] %v5047_v55  ;;  %1743 = vmatmul.mubr.f32.vlgmr.msra.gmra.mxu1 %v6922_v34  ;;  %v5058_v32 = vsub.f32 %v4968_v28, %v6923_v27  ;;  %v5065_v57 = vand.u32 4294901760, %v330_v49  ;;  %v5068_v58 = vsub.f32 %v334_v56, %v5010_v35 }
 0x138   : > { %6920 = vst [vmem:[#allocation53_spill] sm:$0xff] %v5050_v13  ;;  %1594 = vmatpush2.msra.mxu0 %v6921_v12  ;;  %v5063_v8 = vsub.f32 %v4960_v16, %v6924_v54  ;;  %v6927_v26 = vand.u32 4294901760, %v4438_v7  ;;  %v6928_v12 = vand.u32 4294901760, %v4808_v47  ;;  %v5076_v28 = vsub.f32 %v331_v1, %v5025_v43  ;;  %v387_v54 = vld [vmem:[#allocation4 + $0x1f0] sm:$0xff] }
 0x139   : > { %6925 = vst [vmem:[#allocation46_spill] sm:$0xff] %v5065_v57  ;;  %6926 = vst [vmem:[#allocation55_spill] sm:$0xff] %v5068_v58  ;;  %v6930_v4 = vand.u32 4294901760, %v4442_v52  ;;  %v6931_v56 = vand.u32 4294901760, %v4813_v23  ;;  %v6932_v47 = vand.u32 4294901760, %v4984_v25  ;;  %v5090_v1 = vand.u32 4294901760, %v327_v61 }
 0x13a   : > { %1598 = vmatprep.subr.mxu0 %v6927_v26  ;;  %1910 = vmatprep.subr.mxu1 %v6928_v12  ;;  %6929 = vst [vmem:[#allocation48_spill] sm:$0xff] %v5076_v28  ;;  %v326_v12 = vld [vmem:[#allocation4 + $0x8] sm:$0xff]  ;;  %v5093_v27 = vsub.f32 %v332_v30, %v5039_v10  ;;  %v6935_v52 = vand.u32 4294901760, %v5004_v2  ;;  %v6938_v30 = vand.u32 4294901760, %v4834_v22  ;;  %v6942_v22 = vand.u32 4294901760, %v5018_v45 }
 0x13b   : > { %1602 = vmatpush2.msra.mxu0 %v6930_v4  ;;  %1916 = vmatpush1.msra.mxu1 %v6931_v56  ;;  %v5088_v26 = vsub.f32 %v4984_v25, %v6932_v47  ;;  %6933 = vst [vmem:[#allocation57_spill] sm:$0xff] %v5090_v1  ;;  %v5103_v4 = vsub.f32 %v329_v59, %v5050_v13  ;;  %v5105_v56 = vand.u32 4294901760, %v328_v50  ;;  %v6940_v59 = vand.u32 4294901760, %v4847_v3 }
 0x13c   : > { %6934 = vst [vmem:[#allocation50_spill] sm:$0xff] %v5093_v27  ;;  %1606 = vmatmul.mubr.f32.vlgmr.msra.gmra.mxu0 %v6922_v34  ;;  %1761 = vmatprep.subr.mxu0 %v4722_v48  ;;  %v5100_v23 = vsub.f32 %v5004_v2, %v6935_v52  ;;  %v5114_v52 = vand.u32 4294901760, %v325_v46  ;;  %v6941_v47 = vand.u32 4294901760, %v5028_v62  ;;  %v5129_v7 = vand.u32 4294901760, %v326_v12  ;;  %v388_v34 = vld [vmem:[#allocation4 + $0x1f8] sm:$0xff] }
 0x13d   : > { %6936 = vst [vmem:[#allocation59_spill] sm:$0xff] %v5103_v4  ;;  %6937 = vst [vmem:[#allocation52_spill] sm:$0xff] %v5105_v56  ;;  %1763 = vmatpush1.msra.mxu0 %v4724_v0  ;;  %1922 = vmatprep.subr.mxu1 %v6938_v30  ;;  %v5127_v30 = vsub.f32 %v5018_v45, %v6942_v22  ;;  %v5132_v16 = vsub.f32 %v330_v49, %v5065_v57  ;;  %v6945_v3 = vand.u32 4294901760, %v4870_v20  ;;  %v385_v45 = vld [vmem:[#allocation4 + $0x1e0] sm:$0xff] }
 0x13e   : > { %6939 = vst [vmem:[#allocation61_spill] sm:$0xff] %v5114_v52  ;;  %1765 = vmatprep.subr.mxu0 %v4732_v6  ;;  %1928 = vmatpush1.msra.mxu1 %v6940_v59  ;;  %v5122_v25 = vsub.f32 %v5028_v62, %v6941_v47  ;;  %6943 = vst [vmem:[#allocation54_spill] sm:$0xff] %v5129_v7  ;;  %v5139_v47 = vsub.f32 %v327_v61, %v5090_v1  ;;  %v6947_v49 = vand.u32 4294901760, %v4875_v24  ;;  %v386_v61 = vld [vmem:[#allocation4 + $0x1e8] sm:$0xff] }
 0x13f   : > { %6944 = vst [vmem:[#allocation63_spill] sm:$0xff] %v5132_v16  ;;  %1767 = vmatpush1.msra.mxu0 %v4737_v14  ;;  %1934 = vmatprep.subr.mxu1 %v6945_v3  ;;  %v6948_v20 = vand.u32 4294901760, %v5047_v55  ;;  %v5152_v59 = vand.u32 4294901760, %v387_v54  ;;  %v5155_v62 = vsub.f32 %v328_v50, %v5105_v56  ;;  %v6951_v22 = vand.u32 4294901760, %v4909_v51  ;;  %v384_v51 = vld [vmem:[#allocation4 + $0x1d8] sm:$0xff] }
 0x140   : > { %6946 = vst [vmem:[#allocation56_spill] sm:$0xff] %v5139_v47  ;;  %1769 = vmatprep.subr.mxu0 %v4751_v38  ;;  %1940 = vmatpush1.msra.mxu1 %v6947_v49  ;;  %v6952_v24 = vand.u32 4294901760, %v5068_v58  ;;  %v5166_v2 = vsub.f32 %v325_v46, %v5114_v52  ;;  %v6955_v50 = vand.u32 4294901760, %v4897_v53  ;;  %v6957_v46 = vand.u32 4294901760, %v4938_v19  ;;  %v6984_v38 = vld [vmem:[#allocation22_spill] sm:$0xff] }
 0x141   : > { %v5150_v3 = vsub.f32 %v5047_v55, %v6948_v20  ;;  %6949 = vst [vmem:[#allocation65_spill] sm:$0xff] %v5152_v59  ;;  %6950 = vst [vmem:[#allocation58_spill] sm:$0xff] %v5155_v62  ;;  %1771 = vmatpush1.msra.mxu0 %v4753_v41  ;;  %1946 = vmatprep.subr.mxu1 %v6951_v22  ;;  %v5168_v20 = vand.u32 4294901760, %v388_v34  ;;  %v6958_v55 = vand.u32 4294901760, %v5093_v27  ;;  %v6959_v53 = vand.u32 4294901760, %v5076_v28 }
 0x142   : > { %v5163_v49 = vsub.f32 %v5068_v58, %v6952_v24  ;;  %6953 = vst [vmem:[#allocation67_spill] sm:$0xff] %v5166_v2  ;;  %1773 = vmatprep.subr.mxu0 %v4772_v9  ;;  %1952 = vmatpush1.msra.mxu1 %v6955_v50  ;;  %v5177_v24 = vand.u32 4294901760, %v385_v45  ;;  %v383_v58 = vld [vmem:[#allocation4 + $0x1d0] sm:$0xff]  ;;  %v5192_v22 = vand.u32 4294901760, %v386_v61  ;;  %v5195_v41 = vsub.f32 %v326_v12, %v5129_v7 }
 0x143   : > { %6954 = vst [vmem:[#allocation60_spill] sm:$0xff] %v5168_v20  ;;  %1775 = vmatpush1.msra.mxu0 %v4767_v33  ;;  %1958 = vmatprep.subr.mxu1 %v6957_v46  ;;  %v5185_v9 = vsub.f32 %v5093_v27, %v6958_v55  ;;  %v5190_v50 = vsub.f32 %v5076_v28, %v6959_v53  ;;  %v6962_v19 = vand.u32 4294901760, %v4924_v21  ;;  %v381_v28 = vld [vmem:[#allocation4 + $0x1c0] sm:$0xff]  ;;  %v6964_v12 = vand.u32 4294901760, %v4952_v11 }
 0x144   : > { %6956 = vst [vmem:[#allocation69_spill] sm:$0xff] %v5177_v24  ;;  %6960 = vst [vmem:[#allocation62_spill] sm:$0xff] %v5192_v22  ;;  %1777 = vmatprep.subr.mxu0 %v4790_v36  ;;  %v5202_v55 = vsub.f32 %v387_v54, %v5152_v59  ;;  %v6965_v21 = vand.u32 4294901760, %v5103_v4  ;;  %v5215_v46 = vand.u32 4294901760, %v383_v58  ;;  %v382_v54 = vld [vmem:[#allocation4 + $0x1c8] sm:$0xff]  ;;  %v5218_v27 = vsub.f32 %v388_v34, %v5168_v20 }
 0x145   : > { %6961 = vst [vmem:[#allocation71_spill] sm:$0xff] %v5195_v41  ;;  %1964 = vmatpush1.msra.mxu1 %v6962_v19  ;;  %1779 = vmatpush1.msra.mxu0 %v4782_v29  ;;  %v6968_v53 = vand.u32 4294901760, %v4965_v5  ;;  %v6969_v11 = vand.u32 4294901760, %v5132_v16  ;;  %v5229_v36 = vsub.f32 %v385_v45, %v5177_v24  ;;  %v6972_v29 = vld [vmem:[#allocation96_spill] sm:$0xff]  ;;  %v6973_v34 = vand.u32 4294901760, %v4999_v15  ;;  %v6975_v45 = vld [vmem:[#allocation102_spill] sm:$0xff] }
 0x146   : > { %6963 = vst [vmem:[#allocation64_spill] sm:$0xff] %v5202_v55  ;;  %1970 = vmatprep.subr.mxu1 %v6964_v12  ;;  %v5213_v19 = vsub.f32 %v5103_v4, %v6965_v21  ;;  %6966 = vst [vmem:[#allocation73_spill] sm:$0xff] %v5215_v46  ;;  %1781 = vmatprep.subr.mxu0 %v4799_v44  ;;  %v5231_v21 = vand.u32 4294901760, %v384_v51  ;;  %v6976_v33 = vand.u32 4294901760, %v4989_v37  ;;  %v6977_v4 = vand.u32 4294901760, %v5155_v62  ;;  %v380_v5 = vld [vmem:[#allocation4 + $0x1b8] sm:$0xff] }
 0x147   : > { %6967 = vst [vmem:[#allocation66_spill] sm:$0xff] %v5218_v27  ;;  %1976 = vmatpush1.msra.mxu1 %v6968_v53  ;;  %v5226_v12 = vsub.f32 %v5132_v16, %v6969_v11  ;;  %6970 = vst [vmem:[#allocation75_spill] sm:$0xff] %v5229_v36  ;;  %1783 = vmatpush1.msra.mxu0 %v6972_v29  ;;  %v5240_v11 = vand.u32 4294901760, %v381_v28  ;;  %v379_v16 = vld [vmem:[#allocation4 + $0x1b0] sm:$0xff]  ;;  %v6978_v15 = vand.u32 4294901760, %v5139_v47  ;;  %v5255_v53 = vand.u32 4294901760, %v382_v54 }
 0x148   : > { %6971 = vst [vmem:[#allocation68_spill] sm:$0xff] %v5231_v21  ;;  %1982 = vmatprep.subr.mxu1 %v6973_v34  ;;  %1785 = vmatprep.subr.mxu0 %v6975_v45  ;;  %v5248_v29 = vsub.f32 %v5155_v62, %v6977_v4  ;;  %v5258_v44 = vsub.f32 %v386_v61, %v5192_v22  ;;  %v6981_v45 = vld [vmem:[#allocation100_spill] sm:$0xff]  ;;  %v6985_v61 = vand.u32 4294901760, %v5037_v17  ;;  %v5278_v37 = vand.u32 4294901760, %v379_v16 }
 0x149   : > { %6974 = vst [vmem:[#allocation77_spill] sm:$0xff] %v5240_v11  ;;  %1988 = vmatpush1.msra.mxu1 %v6976_v33  ;;  %v5253_v34 = vsub.f32 %v5139_v47, %v6978_v15  ;;  %6979 = vst [vmem:[#allocation70_spill] sm:$0xff] %v5255_v53  ;;  %1787 = vmatpush1.msra.mxu0 %v6981_v45  ;;  %v6982_v33 = vand.u32 4294901760, %v5023_v63  ;;  %v5265_v4 = vsub.f32 %v383_v58, %v5215_v46  ;;  %v377_v47 = vld [vmem:[#allocation4 + $0x1a0] sm:$0xff]  ;;  %v378_v58 = vld [vmem:[#allocation4 + $0x1a8] sm:$0xff] }
 0x14a   : > { %6980 = vst [vmem:[#allocation79_spill] sm:$0xff] %v5258_v44  ;;  %1789 = vmatprep.subr.mxu0 %v6984_v38  ;;  %v6986_v63 = vand.u32 4294901760, %v5166_v2  ;;  %6987 = vst [vmem:[#allocation81_spill] sm:$0xff] %v5278_v37  ;;  %v5281_v62 = vsub.f32 %v384_v51, %v5231_v21  ;;  %v6989_v15 = vld [vmem:[#allocation24_spill] sm:$0xff]  ;;  %v6990_v38 = vand.u32 4294901760, %v5058_v32  ;;  %v6991_v17 = vand.u32 4294901760, %v5195_v41 }
 0x14b   : > { %1994 = vmatprep.subr.mxu1 %v6982_v33  ;;  %6983 = vst [vmem:[#allocation72_spill] sm:$0xff] %v5265_v4  ;;  %1791 = vmatpush1.msra.mxu0 %v6989_v15  ;;  %v5292_v45 = vsub.f32 %v381_v28, %v5240_v11  ;;  %v6994_v51 = vand.u32 4294901760, %v5063_v8  ;;  %v6996_v28 = vand.u32 4294901760, %v5100_v23  ;;  %v6998_v8 = vand.u32 4294901760, %v5202_v55  ;;  %v376_v32 = vld [vmem:[#allocation4 + $0x198] sm:$0xff] }
 0x14c   : > { %2000 = vmatpush1.msra.mxu1 %v6985_v61  ;;  %v5276_v33 = vsub.f32 %v5166_v2, %v6986_v63  ;;  %6988 = vst [vmem:[#allocation74_spill] sm:$0xff] %v5281_v62  ;;  %v5289_v61 = vsub.f32 %v5195_v41, %v6991_v17  ;;  %v5294_v63 = vand.u32 4294901760, %v380_v5  ;;  %1793 = vmatprep.subr.mxu0 %v4911_v60  ;;  %v5303_v17 = vand.u32 4294901760, %v377_v47  ;;  %v375_v41 = vld [vmem:[#allocation4 + $0x190] sm:$0xff] }
 0x14d   : > { %2006 = vmatprep.subr.mxu1 %v6990_v38  ;;  %6992 = vst [vmem:[#allocation76_spill] sm:$0xff] %v5292_v45  ;;  %1795 = vmatpush1.msra.mxu0 %v4913_v40  ;;  %v6997_v2 = vand.u32 4294901760, %v5218_v27  ;;  %v5318_v38 = vand.u32 4294901760, %v378_v58  ;;  %v5321_v15 = vsub.f32 %v382_v54, %v5255_v53  ;;  %v7000_v23 = vand.u32 4294901760, %v5088_v26 }
 0x14e   : > { %6993 = vst [vmem:[#allocation85_spill] sm:$0xff] %v5294_v63  ;;  %2012 = vmatpush1.msra.mxu1 %v6994_v51  ;;  %6995 = vst [vmem:[#allocation78_spill] sm:$0xff] %v5303_v17  ;;  %v5316_v51 = vsub.f32 %v5202_v55, %v6998_v8  ;;  %1797 = vmatprep.subr.mxu0 %v4947_v42  ;;  %v373_v55 = vld [vmem:[#allocation4 + $0x180] sm:$0xff]  ;;  %v7002_v54 = vand.u32 4294901760, %v5122_v25  ;;  %v7003_v26 = vand.u32 4294901760, %v5229_v36  ;;  %v7005_v8 = vand.u32 4294901760, %v5127_v30 }
 0x14f   : > { %2018 = vmatprep.subr.mxu1 %v6996_v28  ;;  %v5311_v60 = vsub.f32 %v5218_v27, %v6997_v2  ;;  %6999 = vst [vmem:[#allocation80_spill] sm:$0xff] %v5321_v15  ;;  %v5328_v2 = vsub.f32 %v379_v16, %v5278_v37  ;;  %1799 = vmatpush1.msra.mxu0 %v4940_v18  ;;  %v5341_v28 = vand.u32 4294901760, %v375_v41  ;;  %v374_v16 = vld [vmem:[#allocation4 + $0x188] sm:$0xff]  ;;  %v7006_v25 = vand.u32 4294901760, %v5258_v44  ;;  %v372_v30 = vld [vmem:[#allocation4 + $0x178] sm:$0xff] }
 0x150   : > { %2024 = vmatpush1.msra.mxu1 %v7000_v23  ;;  %v5339_v23 = vsub.f32 %v5229_v36, %v7003_v26  ;;  %v5344_v27 = vsub.f32 %v380_v5, %v5294_v63  ;;  %1801 = vmatprep.subr.mxu0 %v4974_v39  ;;  %v5355_v42 = vsub.f32 %v377_v47, %v5303_v17  ;;  %v5357_v26 = vand.u32 4294901760, %v376_v32 }
 0x151   : > { %7001 = vst [vmem:[#allocation82_spill] sm:$0xff] %v5328_v2  ;;  %2030 = vmatprep.subr.mxu1 %v7002_v54  ;;  %v5352_v54 = vsub.f32 %v5258_v44, %v7006_v25  ;;  %1803 = vmatpush1.msra.mxu0 %v4976_v31  ;;  %v7009_v5 = vand.u32 4294901760, %v5163_v49  ;;  %v5366_v25 = vand.u32 4294901760, %v373_v55  ;;  %v371_v44 = vld [vmem:[#allocation4 + $0x170] sm:$0xff]  ;;  %v7010_v47 = vand.u32 4294901760, %v5150_v3 }
 0x152   : > { %7004 = vst [vmem:[#allocation84_spill] sm:$0xff] %v5344_v27  ;;  %2036 = vmatpush1.msra.mxu1 %v7005_v8  ;;  %7007 = vst [vmem:[#allocation86_spill] sm:$0xff] %v5355_v42  ;;  %1805 = vmatprep.subr.mxu0 %v5010_v35  ;;  %v7011_v36 = vand.u32 4294901760, %v5281_v62  ;;  %v7012_v49 = vand.u32 4294901760, %v5265_v4  ;;  %v5381_v8 = vand.u32 4294901760, %v374_v16  ;;  %v5384_v39 = vsub.f32 %v378_v58, %v5318_v38  ;;  %v7014_v35 = vld [vmem:[#allocation45_spill] sm:$0xff] }
 0x153   : > { %7008 = vst [vmem:[#allocation88_spill] sm:$0xff] %v5357_v26  ;;  %2042 = vmatprep.subr.mxu1 %v7009_v5  ;;  %1807 = vmatpush1.msra.mxu0 %v7014_v35  ;;  %v7015_v3 = vand.u32 4294901760, %v5185_v9  ;;  %v7017_v58 = vand.u32 4294901760, %v5190_v50  ;;  %v2113_v35 = vand.u32 4294901760, %v5352_v54  ;;  %v7018_v9 = vand.u32 4294901760, %v5292_v45 }
 0x154   : > { %2048 = vmatpush1.msra.mxu1 %v7010_v47  ;;  %v5374_v31 = vsub.f32 %v5281_v62, %v7011_v36  ;;  %v5379_v5 = vsub.f32 %v5265_v4, %v7012_v49  ;;  %7013 = vst [vmem:[#allocation90_spill] sm:$0xff] %v5384_v39  ;;  %v5391_v36 = vsub.f32 %v375_v41, %v5341_v28  ;;  %v369_v4 = vld [vmem:[#allocation4 + $0x160] sm:$0xff]  ;;  %v5404_v47 = vand.u32 4294901760, %v371_v44  ;;  %v5406_v41 = vld [vmem:[#allocation4 + $0x168] sm:$0xff] }
 0x155   : > { %2054 = vmatprep.subr.mxu1 %v7015_v3  ;;  %1809 = vmatprep.subr.mxu0 %v5039_v10  ;;  %v5402_v3 = vsub.f32 %v5292_v45, %v7018_v9  ;;  %v5409_v62 = vsub.f32 %v376_v32, %v5357_v26  ;;  %v7020_v49 = vand.u32 4294901760, %v5226_v12  ;;  %v7021_v50 = vand.u32 4294901760, %v5321_v15 }
 0x156   : > { %7016 = vst [vmem:[#allocation105_spill] sm:$0xff] %v5391_v36  ;;  %2060 = vmatpush1.msra.mxu1 %v7017_v58  ;;  %1811 = vmatpush1.msra.mxu0 %v5025_v43  ;;  %v5420_v58 = vsub.f32 %v373_v55, %v5366_v25  ;;  %v5422_v9 = vand.u32 4294901760, %v372_v30  ;;  %v7023_v32 = vand.u32 4294901760, %v5213_v19  ;;  %v2125_v12 = vand.u32 4294901760, %v5374_v31  ;;  %v5452_v43 = vld [vmem:[#allocation2] sm:$0x3] }
 0x157   : > { %7019 = vst [vmem:[#allocation92_spill] sm:$0xff] %v5409_v62  ;;  %2066 = vmatprep.subr.mxu1 %v7020_v49  ;;  %v5417_v54 = vsub.f32 %v5321_v15, %v7021_v50  ;;  %1813 = vmatprep.subr.mxu0 %v5065_v57  ;;  %v5431_v50 = vand.u32 4294901760, %v369_v4  ;;  %v367_v15 = vld [vmem:[#allocation4 + $0x150] sm:$0xff]  ;;  %v7024_v55 = vand.u32 4294901760, %v5248_v29  ;;  %v7025_v45 = vand.u32 4294901760, %v5344_v27 }
 0x158   : > { %7022 = vst [vmem:[#allocation94_spill] sm:$0xff] %v5420_v58  ;;  %2072 = vmatpush1.msra.mxu1 %v7023_v32  ;;  %1815 = vmatpush1.msra.mxu0 %v5050_v13  ;;  %v7026_v19 = vand.u32 4294901760, %v5328_v2  ;;  %v5447_v32 = vand.u32 4294901760, %v5406_v41  ;;  %v5450_v49 = vsub.f32 %v374_v16, %v5381_v8  ;;  %v7028_v29 = vand.u32 4294901760, %v5253_v34  ;;  %v365_v13 = vld [vmem:[#allocation4 + $0x140] sm:$0xff] }
 0x159   : > { %2078 = vmatprep.subr.mxu1 %v7024_v55  ;;  %v5439_v57 = vsub.f32 %v5344_v27, %v7025_v45  ;;  %1817 = vmatprep.subr.mxu0 %v5105_v56  ;;  %v5459_v55 = vsub.f32 %v371_v44, %v5404_v47  ;;  %v7030_v16 = vand.u32 4294901760, %v5289_v61  ;;  %v2137_v56 = vand.u32 4294901760, %v5417_v54  ;;  %v366_v44 = vld [vmem:[#allocation4 + $0x148] sm:$0xff] }
 0x15a   : > { %v5444_v31 = vsub.f32 %v5328_v2, %v7026_v19  ;;  %7027 = vst [vmem:[#allocation98_spill] sm:$0xff] %v5450_v49  ;;  %2084 = vmatpush1.msra.mxu1 %v7028_v29  ;;  %v368_v19 = vld [vmem:[#allocation4 + $0x158] sm:$0xff]  ;;  %1819 = vmatpush1.msra.mxu0 %v5090_v1  ;;  %v7031_v34 = vand.u32 4294901760, %v5355_v42  ;;  %v5472_v45 = vand.u32 4294901760, %v367_v15  ;;  %v5475_v2 = vsub.f32 %v372_v30, %v5422_v9 }
 0x15b   : > { %7029 = vst [vmem:[#allocation106_spill] sm:$0xff] %v5459_v55  ;;  %2090 = vmatprep.subr.mxu1 %v7030_v16  ;;  %1821 = vmatprep.subr.mxu0 %v5129_v7  ;;  %v7033_v27 = vand.u32 4294901760, %v5276_v33  ;;  %v7034_v61 = vand.u32 4294901760, %v5384_v39  ;;  %v5486_v16 = vsub.f32 %v369_v4, %v5431_v50  ;;  %v7037_v7 = vand.u32 4294901760, %v5311_v60  ;;  %v361_v4 = vld [vmem:[#allocation4 + $0x120] sm:$0xff] }
 0x15c   : > { %v5470_v29 = vsub.f32 %v5355_v42, %v7031_v34  ;;  %7032 = vst [vmem:[#allocation107_spill] sm:$0xff] %v5475_v2  ;;  %v7035_v42 = vld [vmem:[#allocation13_spill] sm:$0xff]  ;;  %1823 = vmatpush1.msra.mxu0 %v5114_v52  ;;  %v2155_v33 = vand.u32 4294901760, %v5444_v31  ;;  %v7038_v34 = vand.u32 4294901760, %v5316_v51  ;;  %v7040_v60 = vand.u32 4294901760, %v5391_v36 }
 0x15d   : > { %2096 = vmatpush1.msra.mxu1 %v7033_v27  ;;  %v5483_v54 = vsub.f32 %v5384_v39, %v7034_v61  ;;  %v7036_v1 = vsub.s32 1, %v7035_v42  ;;  %v2149_v27 = vand.u32 4294901760, %v5439_v57  ;;  %v5497_v61 = vand.u32 4294901760, %v368_v19  ;;  %v363_v39 = vld [vmem:[#allocation4 + $0x130] sm:$0xff]  ;;  %1825 = vmatprep.subr.mxu0 %v5168_v20  ;;  %v362_v20 = vld [vmem:[#allocation4 + $0x128] sm:$0xff] }
 0x15e   : > { %2102 = vmatprep.subr.mxu1 %v7037_v7  ;;  %v5511_v57 = vsub.f32 %v5391_v36, %v7040_v60  ;;  %v5513_v7 = vand.u32 4294901760, %v366_v44  ;;  %v5515_v31 = vand.u32 4294901760, %v365_v13  ;;  %1827 = vmatpush2.msra.mxu0 %v5152_v59  ;;  %v2167_v51 = vand.u32 4294901760, %v5470_v29 }
 0x15f   : > { %v1757_v30 = vrot.slane %v5452_v43, %v7036_v1  ;;  %2108 = vmatpush2.msra.mxu1 %v7038_v34  ;;  %v7039_v1 = vand.u32 4294901760, %v5409_v62  ;;  %v5520_v34 = vsub.f32 %v367_v15, %v5472_v45  ;;  %v5525_v60 = vsub.f32 %v5406_v41, %v5447_v32  ;;  %1829 = vmatprep.subr.mxu0 %v5192_v22 }
 0x160   : > { %7041 = vst [vmem:[#allocation13_spill] sm:$0xff] %v5513_v7  ;;  %7042 = vst [vmem:[#allocation108_spill] sm:$0xff] %v5515_v31  ;;  %2114 = vmatprep.subr.mxu1 %v2113_v35  ;;  %v7045_v36 = vand.u32 4294901760, %v5339_v23  ;;  %v2161_v59 = vand.u32 4294901760, %v5483_v54  ;;  %v7046_v35 = vand.u32 4294901760, %v5420_v58  ;;  %v5536_v15 = vand.u32 4294901760, %v363_v39  ;;  %1831 = vmatpush2.msra.mxu0 %v5177_v24 }
 0x161   : > { %v5506_v52 = vsub.f32 %v5409_v62, %v7039_v1  ;;  %7043 = vst [vmem:[#allocation109_spill] sm:$0xff] %v5520_v34  ;;  %v364_v1 = vld [vmem:[#allocation4 + $0x138] sm:$0xff]  ;;  %7044 = vst [vmem:[#allocation110_spill] sm:$0xff] %v5525_v60  ;;  %v5538_v62 = vand.u32 4294901760, %v1757_v30  ;;  %v7049_v41 = vand.u32 4294901760, %v5450_v49  ;;  %v5547_v54 = vand.u32 4294901760, %v361_v4  ;;  %1833 = vmatprep.subr.mxu0 %v5231_v21 }
 0x162   : > { %2120 = vmatpush2.msra.mxu1 %v7045_v36  ;;  %v5534_v29 = vsub.f32 %v5420_v58, %v7046_v35  ;;  %7047 = vst [vmem:[#allocation111_spill] sm:$0xff] %v5536_v15  ;;  %v5550_v35 = vsub.f32 %v368_v19, %v5497_v61  ;;  %v7052_v58 = vand.u32 4294901760, %v5379_v5  ;;  %v5558_v22 = vsub.f32 %v365_v13, %v5515_v31 }
 0x163   : > { %7048 = vst [vmem:[#allocation112_spill] sm:$0xff] %v5538_v62  ;;  %2126 = vmatprep.subr.mxu1 %v2125_v12  ;;  %v5544_v23 = vsub.f32 %v5450_v49, %v7049_v41  ;;  %7050 = vst [vmem:[#allocation113_spill] sm:$0xff] %v5547_v54  ;;  %v2173_v24 = vand.u32 4294901760, %v5506_v52  ;;  %v2179_v12 = vand.u32 4294901760, %v5511_v57  ;;  %v5560_v41 = vand.u32 4294901760, %v364_v1  ;;  %1835 = vmatpush2.msra.mxu0 %v5215_v46  ;;  %v360_v52 = vld [vmem:[#allocation4 + $0x118] sm:$0xff] }
 0x164   : > { %7051 = vst [vmem:[#allocation114_spill] sm:$0xff] %v5550_v35  ;;  %2132 = vmatpush2.msra.mxu1 %v7052_v58  ;;  %v7053_v19 = vand.u32 4294901760, %v5475_v2  ;;  %v5568_v49 = vand.u32 4294901760, %v362_v20  ;;  %v5572_v58 = vsub.f32 %v366_v44, %v5513_v7  ;;  %1837 = vmatprep.subr.mxu0 %v5255_v53  ;;  %v7055_v13 = vand.u32 4294901760, %v5402_v3 }
 0x165   : > { %2138 = vmatprep.subr.mxu1 %v2137_v56  ;;  %v2191_v56 = vand.u32 4294901760, %v5534_v29  ;;  %v5579_v57 = vsub.f32 %v363_v39, %v5536_v15  ;;  %v5583_v46 = vsub.f32 %v1757_v30, %v5538_v62  ;;  %1839 = vmatpush2.msra.mxu0 %v5240_v11  ;;  %v2185_v44 = vand.u32 4294901760, %v5544_v23 }
 0x166   : > { %v5566_v36 = vsub.f32 %v5475_v2, %v7053_v19  ;;  %7054 = vst [vmem:[#allocation115_spill] sm:$0xff] %v5568_v49  ;;  %2144 = vmatpush2.msra.mxu1 %v7055_v13  ;;  %v359_v2 = vld [vmem:[#allocation4 + $0x110] sm:$0xff]  ;;  %v7056_v5 = vand.u32 4294901760, %v5459_v55  ;;  %v5591_v29 = vsub.f32 %v361_v4, %v5547_v54  ;;  %v358_v13 = vld [vmem:[#allocation4 + $0x108] sm:$0xff]  ;;  %1841 = vmatprep.subr.mxu0 %v5294_v63  ;;  %v5595_v30 = vand.u32 4294901760, %v360_v52 }
 0x167   : > { %2150 = vmatprep.subr.mxu1 %v2149_v27  ;;  %v357_v27 = vld [vmem:[#allocation4 + $0x100] sm:$0xff]  ;;  %v7057_v23 = vsub.s32 0, %v7035_v42  ;;  %1843 = vmatpush2.msra.mxu0 %v5278_v37  ;;  %v7058_v39 = vand.u32 4294901760, %v5525_v60  ;;  %v7059_v42 = vand.u32 4294901760, %v5486_v16 }
 0x168   : > { %v2202_v3 = vsub.f32 %v5459_v55, %v7056_v5  ;;  %2156 = vmatpush2.msra.mxu1 %v2155_v33  ;;  %v5602_v5 = vsub.f32 %v364_v1, %v5560_v41  ;;  %v2197_v4 = vand.u32 4294901760, %v5566_v36  ;;  %v5609_v55 = vand.u32 4294901760, %v359_v2  ;;  %1845 = vmatprep.subr.mxu0 %v5318_v38 }
 0x169   : > { %v1753_v11 = vrot.slane %v5452_v43, %v7057_v23  ;;  %2162 = vmatprep.subr.mxu1 %v2161_v59  ;;  %v2208_v33 = vsub.f32 %v5525_v60, %v7058_v39  ;;  %v2214_v43 = vsub.f32 %v5486_v16, %v7059_v42  ;;  %v5616_v1 = vand.u32 4294901760, %v358_v13  ;;  %1847 = vmatpush2.msra.mxu0 %v5303_v17 }
 0x16a   : > { %2168 = vmatpush2.msra.mxu1 %v2167_v51  ;;  %v5620_v36 = vsub.f32 %v362_v20, %v5568_v49  ;;  %v2203_v39 = vand.u32 4294901760, %v2202_v3  ;;  %v7060_v23 = vand.u32 4294901760, %v5550_v35  ;;  %v5626_v51 = vand.u32 4294901760, %v357_v27  ;;  %1849 = vmatprep.subr.mxu0 %v5357_v26 }
 0x16b   : > { %2174 = vmatprep.subr.mxu1 %v2173_v24  ;;  %v7061_v42 = vand.u32 4294901760, %v5520_v34  ;;  %v5633_v59 = vand.u32 4294901760, %v1753_v11  ;;  %v5637_v3 = vsub.f32 %v360_v52, %v5595_v30  ;;  %1851 = vmatpush2.msra.mxu0 %v5341_v28  ;;  %v5641_v60 = vsub.f32 %v359_v2, %v5609_v55 }
 0x16c   : > { %v2220_v19 = vsub.f32 %v5550_v35, %v7060_v23  ;;  %2180 = vmatpush2.msra.mxu1 %v2179_v12  ;;  %v2209_v23 = vand.u32 4294901760, %v2208_v33  ;;  %v7063_v12 = vand.u32 4294901760, %v5572_v58  ;;  %1853 = vmatprep.subr.mxu0 %v5381_v8  ;;  %v2215_v24 = vand.u32 4294901760, %v2214_v43 }
 0x16d   : > { %v2226_v20 = vsub.f32 %v5520_v34, %v7061_v42  ;;  %7062 = vst [vmem:[#allocation116_spill] sm:$0xff] %v5633_v59  ;;  %2186 = vmatprep.subr.mxu1 %v2185_v44  ;;  %v7064_v52 = vand.u32 4294901760, %v5583_v46  ;;  %v5653_v33 = vsub.f32 %v358_v13, %v5616_v1  ;;  %1855 = vmatpush2.msra.mxu0 %v5366_v25  ;;  %v7065_v42 = vand.u32 4294901760, %v5558_v22 }
 0x16e   : > { %v2232_v35 = vsub.f32 %v5572_v58, %v7063_v12  ;;  %2192 = vmatpush2.msra.mxu1 %v2191_v56  ;;  %v2221_v2 = vand.u32 4294901760, %v2220_v19  ;;  %v5657_v12 = vsub.f32 %v357_v27, %v5626_v51  ;;  %1857 = vmatprep.subr.mxu0 %v5422_v9  ;;  %v5665_v13 = vsub.f32 %v1753_v11, %v5633_v59 }
 0x16f   : > { %v1891_v34 = vsub.f32 %v5583_v46, %v7064_v52  ;;  %2198 = vmatprep.subr.mxu1 %v2197_v4  ;;  %v2238_v56 = vsub.f32 %v5558_v22, %v7065_v42  ;;  %v2227_v52 = vand.u32 4294901760, %v2226_v20  ;;  %v7066_v44 = vand.u32 4294901760, %v5602_v5  ;;  %1859 = vmatpush2.msra.mxu0 %v5404_v47 }
 0x170   : > { %2204 = vmatpush2.msra.mxu1 %v2203_v39  ;;  %v2233_v4 = vand.u32 4294901760, %v2232_v35  ;;  %v7067_v42 = vand.u32 4294901760, %v5579_v57  ;;  %1861 = vmatprep.subr.mxu0 %v5447_v32  ;;  %v7068_v20 = vand.u32 4294901760, %v5620_v36 }
 0x171   : > { %v2244_v19 = vsub.f32 %v5602_v5, %v7066_v44  ;;  %2210 = vmatprep.subr.mxu1 %v2209_v23  ;;  %v1892_v11 = vand.u32 4294901760, %v1891_v34  ;;  %1863 = vmatpush2.msra.mxu0 %v5431_v50  ;;  %v2239_v35 = vand.u32 4294901760, %v2238_v56  ;;  %v7069_v23 = vand.u32 4294901760, %v5591_v29 }
 0x172   : > { %v2250_v43 = vsub.f32 %v5579_v57, %v7067_v42  ;;  %2216 = vmatpush2.msra.mxu1 %v2215_v24  ;;  %v2256_v44 = vsub.f32 %v5620_v36, %v7068_v20  ;;  %1865 = vmatprep.subr.mxu0 %v5497_v61  ;;  %v7070_v20 = vand.u32 4294901760, %v5637_v3  ;;  %v7071_v56 = vand.u32 4294901760, %v5641_v60 }
 0x173   : > { %2222 = vmatprep.subr.mxu1 %v2221_v2  ;;  %v2262_v42 = vsub.f32 %v5591_v29, %v7069_v23  ;;  %v2245_v24 = vand.u32 4294901760, %v2244_v19  ;;  %1867 = vmatpush2.msra.mxu0 %v5472_v45  ;;  %v7073_v34 = vand.u32 4294901760, %v5657_v12 }
 0x174   : > { %2228 = vmatpush2.msra.mxu1 %v2227_v52  ;;  %v2268_v27 = vsub.f32 %v5637_v3, %v7070_v20  ;;  %v2251_v2 = vand.u32 4294901760, %v2250_v43  ;;  %v2274_v23 = vsub.f32 %v5641_v60, %v7071_v56  ;;  %1869 = vmatprep.subr.mxu0 %v5513_v7  ;;  %v2257_v39 = vand.u32 4294901760, %v2256_v44 }
 0x175   : > { %2234 = vmatprep.subr.mxu1 %v2233_v4  ;;  %1893 = vmatprep.mubr.f32.mxu0 %v1892_v11  ;;  %v7072_v52 = vand.u32 4294901760, %v5653_v33  ;;  %v2263_v20 = vand.u32 4294901760, %v2262_v42  ;;  %v2286_v43 = vsub.f32 %v5657_v12, %v7073_v34  ;;  %v7074_v4 = vand.u32 4294901760, %v5665_v13 }
 0x176   : > { %1871 = vmatpush2.msra.mxu0 %v5515_v31  ;;  %2240 = vmatpush2.msra.mxu1 %v2239_v35  ;;  %v2269_v11 = vand.u32 4294901760, %v2268_v27  ;;  %v2275_v44 = vand.u32 4294901760, %v2274_v23  ;;  %v7075_v27 = vld [vmem:[#allocation18_spill] sm:$0xff]  ;;  %v7079_v23 = vld [vmem:[#allocation89_spill] sm:$0xff] }
 0x177   : > { %v2280_v19 = vsub.f32 %v5653_v33, %v7072_v52  ;;  %1873 = vmatprep.subr.mxu0 %v5560_v41  ;;  %v1897_v56 = vsub.f32 %v5665_v13, %v7074_v4  ;;  %2246 = vmatprep.subr.mxu1 %v2245_v24  ;;  %v2287_v42 = vand.u32 4294901760, %v2286_v43  ;;  %v7077_v24 = vld [vmem:[#allocation23_spill] sm:$0xff]  ;;  %v7083_v43 = vld [vmem:[#allocation21_spill] sm:$0xff] }
 0x178   : > { %1875 = vmatpush2.msra.mxu0 %v5536_v15  ;;  %2252 = vmatpush2.msra.mxu1 %v2251_v2  ;;  %v7078_v2 = vld [vmem:[#allocation25_spill] sm:$0xff]  ;;  %v7080_v52 = vld [vmem:[#allocation83_spill] sm:$0xff] }
 0x179   : > { %1877 = vmatprep.subr.mxu0 %v5568_v49  ;;  %2258 = vmatprep.subr.mxu1 %v2257_v39  ;;  %v2281_v35 = vand.u32 4294901760, %v2280_v19  ;;  %v1898_v34 = vand.u32 4294901760, %v1897_v56  ;;  %v7076_v39 = vld [vmem:[#allocation19_spill] sm:$0xff]  ;;  %v7081_v19 = vld [vmem:[#allocation97_spill] sm:$0xff]  ;;  %v7085_v56 = vld [vmem:[#allocation20_spill] sm:$0xff] }
 0x17a   : > { %1879 = vmatpush2.msra.mxu0 %v5547_v54  ;;  %2264 = vmatpush2.msra.mxu1 %v2263_v20  ;;  %v7082_v20 = vld [vmem:[#allocation93_spill] sm:$0xff] }
 0x17b   : > { %1881 = vmatprep.subr.mxu0 %v5595_v30  ;;  %2270 = vmatprep.subr.mxu1 %v2269_v11  ;;  %v7084_v4 = vld [vmem:[#allocation101_spill] sm:$0xff]  ;;  %v7086_v11 = vld [vmem:[#allocation99_spill] sm:$0xff] }
 0x17c   : > { %1883 = vmatpush2.msra.mxu0 %v5609_v55  ;;  %2276 = vmatpush2.msra.mxu1 %v2275_v44  ;;  %v7087_v44 = vld [vmem:[#allocation29_spill] sm:$0xff] }
 0x17d   : > { %1885 = vmatprep.subr.mxu0 %v5616_v1  ;;  %2282 = vmatprep.subr.mxu1 %v2281_v35  ;;  %v7088_v35 = vld [vmem:[#allocation103_spill] sm:$0xff] }
 0x17e   : > { %1887 = vmatpush2.msra.mxu0 %v5626_v51  ;;  %2288 = vmatpush2.msra.mxu1 %v2287_v42  ;;  %v7089_v42 = vld [vmem:[#allocation27_spill] sm:$0xff] }
 0x17f   : > { %1899 = vmatmul.mubr.f32.vlgmr.msra.gmra.mxu0 %v1898_v34  ;;  %2300 = vmatprep.subr.mxu0 %v7075_v27  ;;  %v7090_v34 = vld [vmem:[#allocation15_spill] sm:$0xff] }
 0x180   : > { %2303 = vmatpush1.msra.mxu0 %v7076_v39  ;;  %2290 = vmatprep.mubr.f32.mxu1 %v5538_v62  ;;  %v7092_v62 = vld [vmem:[#allocation33_spill] sm:$0xff] }
 0x181   : > { %2306 = vmatprep.subr.mxu0 %v7077_v24  ;;  %2292 = vmatmul.mubr.f32.vlgmr.msra.gmra.mxu1 %v5633_v59  ;;  %v7091_v59 = vld [vmem:[#allocation91_spill] sm:$0xff] }
 0x182   : > { %2309 = vmatpush1.msra.mxu0 %v7078_v2  ;;  %2502 = vmatprep.subr.mxu1 %v4722_v48 }
 0x183   : > { %2312 = vmatprep.subr.mxu0 %v7079_v23  ;;  %2504 = vmatpush1.msra.mxu1 %v4724_v0 }
 0x184   : > { %2315 = vmatpush1.msra.mxu0 %v7080_v52  ;;  %2506 = vmatprep.subr.mxu1 %v4732_v6  ;;  %v7095_v6 = vld [vmem:[#allocation95_spill] sm:$0xff] }
 0x185   : > { %2318 = vmatprep.subr.mxu0 %v7081_v19  ;;  %2508 = vmatpush1.msra.mxu1 %v4737_v14  ;;  %v7093_v14 = vld [vmem:[#allocation87_spill] sm:$0xff] }
 0x186   : > { %2321 = vmatpush1.msra.mxu0 %v7082_v20  ;;  %2510 = vmatprep.subr.mxu1 %v7083_v43  ;;  %v7094_v43 = vld [vmem:[#allocation31_spill] sm:$0xff] }
 0x187   : > { %2324 = vmatprep.subr.mxu0 %v7084_v4  ;;  %2512 = vmatpush1.msra.mxu1 %v7085_v56  ;;  %v7096_v56 = vld [vmem:[#allocation28_spill] sm:$0xff] }
 0x188   : > { %2327 = vmatpush1.msra.mxu0 %v7086_v11  ;;  %2514 = vmatprep.subr.mxu1 %v7087_v44  ;;  %v7097_v11 = vld [vmem:[#allocation96_spill] sm:$0xff]  ;;  %v7098_v44 = vld [vmem:[#allocation37_spill] sm:$0xff] }
 0x189   : > { %2330 = vmatprep.subr.mxu0 %v7088_v35  ;;  %2516 = vmatpush1.msra.mxu1 %v7089_v42  ;;  %v7099_v35 = vld [vmem:[#allocation102_spill] sm:$0xff]  ;;  %v7100_v42 = vld [vmem:[#allocation41_spill] sm:$0xff] }
 0x18a   : > { %2333 = vmatpush1.msra.mxu0 %v7090_v34  ;;  %2518 = vmatprep.subr.mxu1 %v7091_v59  ;;  %v7101_v34 = vld [vmem:[#allocation100_spill] sm:$0xff] }
 0x18b   : > { %2336 = vmatprep.subr.mxu0 %v7092_v62  ;;  %2520 = vmatpush1.msra.mxu1 %v7093_v14  ;;  %v7102_v59 = vld [vmem:[#allocation32_spill] sm:$0xff]  ;;  %v7103_v62 = vld [vmem:[#allocation22_spill] sm:$0xff] }
 0x18c   : > { %2339 = vmatpush1.msra.mxu0 %v7094_v43  ;;  %2522 = vmatprep.subr.mxu1 %v7095_v6  ;;  %v7104_v14 = vld [vmem:[#allocation38_spill] sm:$0xff]  ;;  %v7105_v43 = vld [vmem:[#allocation24_spill] sm:$0xff] }
 0x18d   : > { %2342 = vmatprep.subr.mxu0 %v7096_v56  ;;  %2524 = vmatpush1.msra.mxu1 %v7097_v11  ;;  %v7106_v6 = vld [vmem:[#allocation36_spill] sm:$0xff]  ;;  %v7107_v56 = vld [vmem:[#allocation26_spill] sm:$0xff] }
 0x18e   : > { %2345 = vmatpush1.msra.mxu0 %v7098_v44  ;;  %2526 = vmatprep.subr.mxu1 %v7099_v35  ;;  %v7108_v11 = vld [vmem:[#allocation42_spill] sm:$0xff]  ;;  %v7109_v35 = vld [vmem:[#allocation40_spill] sm:$0xff] }
 0x18f   : > { %2348 = vmatprep.subr.mxu0 %v7100_v42  ;;  %2528 = vmatpush1.msra.mxu1 %v7101_v34  ;;  %v7110_v42 = vld [vmem:[#allocation39_spill] sm:$0xff] }
 0x190   : > { %2351 = vmatpush1.msra.mxu0 %v7102_v59  ;;  %2530 = vmatprep.subr.mxu1 %v7103_v62  ;;  %v7111_v34 = vld [vmem:[#allocation55_spill] sm:$0xff]  ;;  %v7112_v62 = vld [vmem:[#allocation44_spill] sm:$0xff] }
 0x191   : > { %2354 = vmatprep.subr.mxu0 %v7104_v14  ;;  %2532 = vmatpush1.msra.mxu1 %v7105_v43  ;;  %v7113_v14 = vld [vmem:[#allocation34_spill] sm:$0xff] }
 0x192   : > { %2357 = vmatpush1.msra.mxu0 %v7106_v6  ;;  %2534 = vmatprep.subr.mxu1 %v7107_v56  ;;  %v7114_v43 = vld [vmem:[#allocation50_spill] sm:$0xff]  ;;  %v7115_v6 = vld [vmem:[#allocation43_spill] sm:$0xff]  ;;  %v7116_v56 = vld [vmem:[#allocation48_spill] sm:$0xff] }
 0x193   : > { %2360 = vmatprep.subr.mxu0 %v7108_v11  ;;  %2536 = vmatpush1.msra.mxu1 %v4913_v40  ;;  %v7117_v11 = vld [vmem:[#allocation47_spill] sm:$0xff] }
 0x194   : > { %2363 = vmatpush1.msra.mxu0 %v7109_v35  ;;  %2538 = vmatprep.subr.mxu1 %v7110_v42  ;;  %v7118_v40 = vld [vmem:[#allocation63_spill] sm:$0xff]  ;;  %v7119_v35 = vld [vmem:[#allocation45_spill] sm:$0xff] }
 0x195   : > { %2366 = vmatprep.subr.mxu0 %v7111_v34  ;;  %2540 = vmatpush1.msra.mxu1 %v4940_v18  ;;  %v7120_v42 = vld [vmem:[#allocation59_spill] sm:$0xff]  ;;  %v7121_v18 = vld [vmem:[#allocation58_spill] sm:$0xff] }
 0x196   : > { %2369 = vmatpush1.msra.mxu0 %v7112_v62  ;;  %2542 = vmatprep.subr.mxu1 %v7113_v14  ;;  %v7122_v62 = vld [vmem:[#allocation49_spill] sm:$0xff]  ;;  %v7123_v14 = vld [vmem:[#allocation56_spill] sm:$0xff] }
 0x197   : > { %2372 = vmatprep.subr.mxu0 %v7114_v43  ;;  %2544 = vmatpush1.msra.mxu1 %v7115_v6  ;;  %v7124_v43 = vld [vmem:[#allocation46_spill] sm:$0xff]  ;;  %v7125_v6 = vld [vmem:[#allocation71_spill] sm:$0xff] }
 0x198   : > { %2375 = vmatpush1.msra.mxu0 %v7116_v56  ;;  %2546 = vmatprep.subr.mxu1 %v7117_v11  ;;  %v7126_v56 = vld [vmem:[#allocation53_spill] sm:$0xff]  ;;  %v7127_v11 = vld [vmem:[#allocation67_spill] sm:$0xff] }
 0x199   : > { %2378 = vmatprep.subr.mxu0 %v7118_v40  ;;  %2548 = vmatpush1.msra.mxu1 %v7119_v35  ;;  %v7128_v40 = vld [vmem:[#allocation52_spill] sm:$0xff]  ;;  %v7129_v35 = vld [vmem:[#allocation66_spill] sm:$0xff] }
 0x19a   : > { %2381 = vmatpush1.msra.mxu0 %v7120_v42  ;;  %2550 = vmatprep.subr.mxu1 %v5039_v10  ;;  %v7130_v42 = vld [vmem:[#allocation57_spill] sm:$0xff]  ;;  %v7131_v10 = vld [vmem:[#allocation64_spill] sm:$0xff] }
 0x19b   : > { %2384 = vmatprep.subr.mxu0 %v7121_v18  ;;  %2552 = vmatpush1.msra.mxu1 %v7122_v62  ;;  %v7132_v18 = vld [vmem:[#allocation54_spill] sm:$0xff]  ;;  %v7133_v62 = vld [vmem:[#allocation79_spill] sm:$0xff] }
 0x19c   : > { %2387 = vmatpush1.msra.mxu0 %v7123_v14  ;;  %2554 = vmatprep.subr.mxu1 %v7124_v43  ;;  %v7134_v14 = vld [vmem:[#allocation61_spill] sm:$0xff]  ;;  %v7135_v43 = vld [vmem:[#allocation75_spill] sm:$0xff] }
 0x19d   : > { %2390 = vmatprep.subr.mxu0 %v7125_v6  ;;  %2556 = vmatpush1.msra.mxu1 %v7126_v56  ;;  %v7136_v6 = vld [vmem:[#allocation60_spill] sm:$0xff]  ;;  %v7137_v56 = vld [vmem:[#allocation74_spill] sm:$0xff] }
 0x19e   : > { %2393 = vmatpush1.msra.mxu0 %v7127_v11  ;;  %2558 = vmatprep.subr.mxu1 %v7128_v40  ;;  %v7138_v11 = vld [vmem:[#allocation65_spill] sm:$0xff]  ;;  %v7139_v40 = vld [vmem:[#allocation72_spill] sm:$0xff] }
 0x19f   : > { %2396 = vmatprep.subr.mxu0 %v7129_v35  ;;  %2560 = vmatpush1.msra.mxu1 %v7130_v42  ;;  %v7140_v35 = vld [vmem:[#allocation62_spill] sm:$0xff]  ;;  %v7141_v42 = vld [vmem:[#allocation80_spill] sm:$0xff] }
 0x1a0   : > { %2399 = vmatpush2.msra.mxu0 %v7131_v10  ;;  %2562 = vmatprep.subr.mxu1 %v7132_v18  ;;  %v7142_v10 = vld [vmem:[#allocation69_spill] sm:$0xff]  ;;  %v7143_v18 = vld [vmem:[#allocation76_spill] sm:$0xff] }
 0x1a1   : > { %2402 = vmatprep.subr.mxu0 %v7133_v62  ;;  %2564 = vmatpush1.msra.mxu1 %v7134_v14  ;;  %v7144_v14 = vld [vmem:[#allocation84_spill] sm:$0xff] }
 0x1a2   : > { %2405 = vmatpush2.msra.mxu0 %v7135_v43  ;;  %2566 = vmatprep.subr.mxu1 %v7136_v6  ;;  %v7145_v43 = vld [vmem:[#allocation73_spill] sm:$0xff]  ;;  %v7146_v6 = vld [vmem:[#allocation82_spill] sm:$0xff] }
 0x1a3   : > { %2408 = vmatprep.subr.mxu0 %v7137_v56  ;;  %2568 = vmatpush2.msra.mxu1 %v7138_v11  ;;  %v7147_v11 = vld [vmem:[#allocation90_spill] sm:$0xff] }
 0x1a4   : > { %2411 = vmatpush2.msra.mxu0 %v7139_v40  ;;  %2570 = vmatprep.subr.mxu1 %v7140_v35  ;;  %v7148_v40 = vld [vmem:[#allocation77_spill] sm:$0xff]  ;;  %v7149_v35 = vld [vmem:[#allocation86_spill] sm:$0xff] }
 0x1a5   : > { %2414 = vmatprep.subr.mxu0 %v7141_v42  ;;  %2572 = vmatpush2.msra.mxu1 %v7142_v10  ;;  %v7150_v10 = vld [vmem:[#allocation92_spill] sm:$0xff] }
 0x1a6   : > { %2417 = vmatpush2.msra.mxu0 %v7143_v18  ;;  %2574 = vmatprep.subr.mxu1 %v5231_v21  ;;  %v7151_v21 = vld [vmem:[#allocation105_spill] sm:$0xff] }
 0x1a7   : > { %2420 = vmatprep.subr.mxu0 %v7144_v14  ;;  %2576 = vmatpush2.msra.mxu1 %v7145_v43  ;;  %v7152_v43 = vld [vmem:[#allocation98_spill] sm:$0xff] }
 0x1a8   : > { %2423 = vmatpush2.msra.mxu0 %v7146_v6  ;;  %2578 = vmatprep.subr.mxu1 %v5255_v53  ;;  %v7153_v53 = vld [vmem:[#allocation94_spill] sm:$0xff] }
 0x1a9   : > { %2426 = vmatprep.subr.mxu0 %v7147_v11  ;;  %2580 = vmatpush2.msra.mxu1 %v7148_v40  ;;  %v7154_v40 = vld [vmem:[#allocation107_spill] sm:$0xff] }
 0x1aa   : > { %2429 = vmatpush2.msra.mxu0 %v7149_v35  ;;  %2582 = vmatprep.subr.mxu1 %v5294_v63  ;;  %v7155_v63 = vld [vmem:[#allocation106_spill] sm:$0xff] }
 0x1ab   : > { %2432 = vmatprep.subr.mxu0 %v7150_v10  ;;  %2584 = vmatpush2.msra.mxu1 %v5278_v37  ;;  %v7156_v37 = vld [vmem:[#allocation110_spill] sm:$0xff] }
 0x1ac   : > { %2435 = vmatpush2.msra.mxu0 %v7151_v21  ;;  %2586 = vmatprep.subr.mxu1 %v5318_v38 }
 0x1ad   : > { %2438 = vmatprep.subr.mxu0 %v7152_v43  ;;  %2588 = vmatpush2.msra.mxu1 %v5303_v17  ;;  %v7157_v17 = vld [vmem:[#allocation114_spill] sm:$0xff] }
 0x1ae   : > { %2441 = vmatpush2.msra.mxu0 %v7153_v53  ;;  %2590 = vmatprep.subr.mxu1 %v5357_v26  ;;  %v7158_v26 = vld [vmem:[#allocation109_spill] sm:$0xff] }
 0x1af   : > { %2444 = vmatprep.subr.mxu0 %v7154_v40  ;;  %2592 = vmatpush2.msra.mxu1 %v5341_v28 }
 0x1b0   : > { %2447 = vmatpush2.msra.mxu0 %v7155_v63  ;;  %2594 = vmatprep.subr.mxu1 %v5381_v8 }
 0x1b1   : > { %2450 = vmatprep.subr.mxu0 %v7156_v37  ;;  %2596 = vmatpush2.msra.mxu1 %v5366_v25 }
 0x1b2   : > { %2453 = vmatpush2.msra.mxu0 %v5486_v16  ;;  %2598 = vmatprep.subr.mxu1 %v5422_v9 }
 0x1b3   : > { %2456 = vmatprep.subr.mxu0 %v7157_v17  ;;  %2600 = vmatpush2.msra.mxu1 %v5404_v47 }
 0x1b4   : > { %2459 = vmatpush2.msra.mxu0 %v7158_v26  ;;  %2602 = vmatprep.subr.mxu1 %v5447_v32 }
 0x1b5   : > { %2462 = vmatprep.subr.mxu0 %v5572_v58  ;;  %2604 = vmatpush2.msra.mxu1 %v5431_v50 }
 0x1b6   : > { %2465 = vmatpush2.msra.mxu0 %v5558_v22  ;;  %2606 = vmatprep.subr.mxu1 %v5497_v61 }
 0x1b7   : > { %2468 = vmatprep.subr.mxu0 %v5602_v5  ;;  %2608 = vmatpush2.msra.mxu1 %v5472_v45 }
 0x1b8   : > { %2471 = vmatpush2.msra.mxu0 %v5579_v57  ;;  %2610 = vmatprep.subr.mxu1 %v5513_v7  ;;  %v7160_v7 = vand.u32 4294901760, %v7076_v39  ;;  %v7170_v39 = vld [vmem:[#allocation99_spill] sm:$0xff] }
 0x1b9   : > { %2474 = vmatprep.subr.mxu0 %v5620_v36  ;;  %2492 = vmatprep.mubr.f32.mxu0 %v5583_v46 }
 0x1ba   : > { %2477 = vmatpush2.msra.mxu0 %v5591_v29  ;;  %2612 = vmatpush2.msra.mxu1 %v5515_v31  ;;  %v7159_v31 = vand.u32 4294901760, %v7075_v27  ;;  %v7167_v27 = vand.u32 4294901760, %v5665_v13 }
 0x1bb   : > { %2480 = vmatprep.subr.mxu0 %v5637_v3  ;;  %2614 = vmatprep.subr.mxu1 %v5560_v41 }
 0x1bc   : > { %2483 = vmatpush2.msra.mxu0 %v5641_v60  ;;  %2616 = vmatpush2.msra.mxu1 %v5536_v15  ;;  %v7161_v15 = vand.u32 4294901760, %v7077_v24  ;;  %v7171_v24 = vand.u32 4294901760, %v7170_v39  ;;  %v7188_v39 = vand.u32 4294901760, %v7098_v44 }
 0x1bd   : > { %2486 = vmatprep.subr.mxu0 %v5653_v33  ;;  %2618 = vmatprep.subr.mxu1 %v5568_v49  ;;  %v7162_v49 = vand.u32 4294901760, %v7078_v2  ;;  %v7173_v2 = vld [vmem:[#allocation103_spill] sm:$0xff] }
 0x1be   : > { %2489 = vmatpush2.msra.mxu0 %v5657_v12  ;;  %2620 = vmatpush2.msra.mxu1 %v5547_v54  ;;  %v7163_v54 = vand.u32 4294901760, %v7079_v23  ;;  %v7174_v23 = vand.u32 4294901760, %v7173_v2 }
 0x1bf   : > { %2495 = vmatmul.mubr.f32.vlgmr.msra.gmra.mxu0 %v5665_v13  ;;  %2645 = vmatprep.subr.mxu0 %v7159_v31  ;;  %v7164_v31 = vand.u32 4294901760, %v7080_v52  ;;  %v7175_v13 = vld [vmem:[#allocation16_spill] sm:$0xff]  ;;  %v7176_v52 = vld [vmem:[#allocation15_spill] sm:$0xff] }
 0x1c0   : > { %2649 = vmatpush1.msra.mxu0 %v7160_v7  ;;  %2622 = vmatprep.subr.mxu1 %v5595_v30  ;;  %v7165_v7 = vand.u32 4294901760, %v5583_v46  ;;  %v7172_v46 = vld [vmem:[#allocation17_spill] sm:$0xff] }
 0x1c1   : > { %2653 = vmatprep.subr.mxu0 %v7161_v15  ;;  %2624 = vmatpush2.msra.mxu1 %v5609_v55  ;;  %v7166_v15 = vand.u32 4294901760, %v7081_v19  ;;  %v7177_v19 = vand.u32 4294901760, %v7176_v52  ;;  %v7194_v52 = vld [vmem:[#allocation95_spill] sm:$0xff] }
 0x1c2   : > { %2657 = vmatpush1.msra.mxu0 %v7162_v49  ;;  %2626 = vmatprep.subr.mxu1 %v5616_v1  ;;  %v7168_v49 = vand.u32 4294901760, %v7082_v20  ;;  %v7178_v20 = vld [vmem:[#allocation21_spill] sm:$0xff] }
 0x1c3   : > { %2661 = vmatprep.subr.mxu0 %v7163_v54  ;;  %2628 = vmatpush2.msra.mxu1 %v5626_v51  ;;  %v7169_v54 = vand.u32 4294901760, %v7084_v4 }
 0x1c4   : > { %2665 = vmatpush1.msra.mxu0 %v7164_v31  ;;  %2632 = vmatprep.mubr.f32.mxu1 %v7165_v7  ;;  %v7181_v31 = vld [vmem:[#allocation20_spill] sm:$0xff] }
 0x1c5   : > { %2669 = vmatprep.subr.mxu0 %v7166_v15  ;;  %2636 = vmatmul.mubr.f32.vlgmr.msra.gmra.mxu1 %v7167_v27  ;;  %v7184_v15 = vld [vmem:[#allocation29_spill] sm:$0xff]  ;;  %v7185_v27 = vld [vmem:[#allocation28_spill] sm:$0xff] }
 0x1c6   : > { %2673 = vmatpush1.msra.mxu0 %v7168_v49  ;;  %2908 = vmatprep.subr.mxu1 %v4722_v48  ;;  %v7179_v48 = vld [vmem:[#allocation33_spill] sm:$0xff]  ;;  %v7186_v49 = vand.u32 4294901760, %v7185_v27  ;;  %v7204_v27 = vld [vmem:[#allocation40_spill] sm:$0xff] }
 0x1c7   : > { %2677 = vmatprep.subr.mxu0 %v7169_v54  ;;  %2910 = vmatpush1.msra.mxu1 %v4724_v0  ;;  %v7180_v4 = vand.u32 4294901760, %v7179_v48  ;;  %v7182_v0 = vld [vmem:[#allocation31_spill] sm:$0xff]  ;;  %v7197_v48 = vld [vmem:[#allocation96_spill] sm:$0xff] }
 0x1c8   : > { %2681 = vmatpush1.msra.mxu0 %v7171_v24  ;;  %2912 = vmatprep.subr.mxu1 %v7172_v46  ;;  %v7183_v7 = vand.u32 4294901760, %v7182_v0  ;;  %v7187_v54 = vld [vmem:[#allocation27_spill] sm:$0xff]  ;;  %v7190_v46 = vld [vmem:[#allocation41_spill] sm:$0xff]  ;;  %v7201_v0 = vld [vmem:[#allocation42_spill] sm:$0xff] }
 0x1c9   : > { %2685 = vmatprep.subr.mxu0 %v7174_v23  ;;  %2914 = vmatpush1.msra.mxu1 %v7175_v13  ;;  %v7189_v24 = vld [vmem:[#allocation91_spill] sm:$0xff]  ;;  %v7191_v2 = vand.u32 4294901760, %v7190_v46  ;;  %v7193_v13 = vand.u32 4294901760, %v7102_v59  ;;  %v7205_v59 = vand.u32 4294901760, %v7204_v27 }
 0x1ca   : > { %2689 = vmatpush1.msra.mxu0 %v7177_v19  ;;  %2916 = vmatprep.subr.mxu1 %v7178_v20  ;;  %v7192_v23 = vld [vmem:[#allocation87_spill] sm:$0xff]  ;;  %v7195_v19 = vld [vmem:[#allocation38_spill] sm:$0xff] }
 0x1cb   : > { %2693 = vmatprep.subr.mxu0 %v7180_v4  ;;  %2918 = vmatpush1.msra.mxu1 %v7181_v31  ;;  %v7196_v20 = vand.u32 4294901760, %v7195_v19  ;;  %v7198_v4 = vld [vmem:[#allocation36_spill] sm:$0xff]  ;;  %v7200_v31 = vld [vmem:[#allocation102_spill] sm:$0xff] }
 0x1cc   : > { %2697 = vmatpush1.msra.mxu0 %v7183_v7  ;;  %2920 = vmatprep.subr.mxu1 %v7184_v15  ;;  %v7199_v44 = vand.u32 4294901760, %v7198_v4  ;;  %v7202_v7 = vand.u32 4294901760, %v7201_v0  ;;  %v7203_v15 = vld [vmem:[#allocation100_spill] sm:$0xff]  ;;  %v7218_v4 = vld [vmem:[#allocation63_spill] sm:$0xff] }
 0x1cd   : > { %2701 = vmatprep.subr.mxu0 %v7186_v49  ;;  %2922 = vmatpush1.msra.mxu1 %v7187_v54  ;;  %v7206_v49 = vld [vmem:[#allocation22_spill] sm:$0xff]  ;;  %v7207_v54 = vand.u32 4294901760, %v7111_v34  ;;  %v7215_v19 = vld [vmem:[#allocation48_spill] sm:$0xff]  ;;  %v7219_v34 = vand.u32 4294901760, %v7218_v4 }
 0x1ce   : > { %2705 = vmatpush1.msra.mxu0 %v7188_v39  ;;  %2924 = vmatprep.subr.mxu1 %v7189_v24  ;;  %v7208_v39 = vld [vmem:[#allocation24_spill] sm:$0xff] }
 0x1cf   : > { %2709 = vmatprep.subr.mxu0 %v7191_v2  ;;  %2926 = vmatpush1.msra.mxu1 %v7192_v23  ;;  %v7209_v24 = vld [vmem:[#allocation44_spill] sm:$0xff]  ;;  %v7211_v2 = vld [vmem:[#allocation26_spill] sm:$0xff] }
 0x1d0   : > { %2713 = vmatpush1.msra.mxu0 %v7193_v13  ;;  %2928 = vmatprep.subr.mxu1 %v7194_v52  ;;  %v7210_v46 = vand.u32 4294901760, %v7209_v24  ;;  %v7212_v23 = vld [vmem:[#allocation50_spill] sm:$0xff]  ;;  %v7214_v52 = vld [vmem:[#allocation35_spill] sm:$0xff]  ;;  %v7239_v4 = vld [vmem:[#allocation64_spill] sm:$0xff] }
 0x1d1   : > { %2717 = vmatprep.subr.mxu0 %v7196_v20  ;;  %2930 = vmatpush1.msra.mxu1 %v7197_v48  ;;  %v7213_v13 = vand.u32 4294901760, %v7212_v23  ;;  %v7216_v20 = vand.u32 4294901760, %v7215_v19  ;;  %v7217_v48 = vld [vmem:[#allocation39_spill] sm:$0xff]  ;;  %v7236_v19 = vld [vmem:[#allocation66_spill] sm:$0xff] }
 0x1d2   : > { %2721 = vmatpush1.msra.mxu0 %v7199_v44  ;;  %2932 = vmatprep.subr.mxu1 %v7200_v31  ;;  %v7220_v44 = vld [vmem:[#allocation30_spill] sm:$0xff]  ;;  %v7221_v31 = vld [vmem:[#allocation59_spill] sm:$0xff] }
 0x1d3   : > { %2725 = vmatprep.subr.mxu0 %v7202_v7  ;;  %2934 = vmatpush1.msra.mxu1 %v7203_v15  ;;  %v7222_v0 = vand.u32 4294901760, %v7221_v31  ;;  %v7223_v7 = vld [vmem:[#allocation34_spill] sm:$0xff]  ;;  %v7230_v24 = vld [vmem:[#allocation71_spill] sm:$0xff]  ;;  %v7242_v31 = vand.u32 4294901760, %v7133_v62  ;;  %v7252_v62 = vand.u32 4294901760, %v7141_v42  ;;  %v7260_v42 = vand.u32 4294901760, %v7147_v11 }
 0x1d4   : > { %2729 = vmatpush1.msra.mxu0 %v7205_v59  ;;  %2936 = vmatprep.subr.mxu1 %v7206_v49  ;;  %v7224_v15 = vld [vmem:[#allocation58_spill] sm:$0xff]  ;;  %v7226_v59 = vld [vmem:[#allocation43_spill] sm:$0xff]  ;;  %v7227_v49 = vld [vmem:[#allocation56_spill] sm:$0xff]  ;;  %v7268_v11 = vand.u32 4294901760, %v7152_v43  ;;  %v7275_v43 = vand.u32 4294901760, %v7156_v37  ;;  %v7281_v37 = vand.u32 4294901760, %v5572_v58 }
 0x1d5   : > { %2733 = vmatprep.subr.mxu0 %v7207_v54  ;;  %2938 = vmatpush1.msra.mxu1 %v7208_v39  ;;  %v7225_v27 = vand.u32 4294901760, %v7224_v15  ;;  %v7228_v54 = vand.u32 4294901760, %v7227_v49  ;;  %v7229_v39 = vld [vmem:[#allocation47_spill] sm:$0xff]  ;;  %v7248_v49 = vld [vmem:[#allocation57_spill] sm:$0xff] }
 0x1d6   : > { %2737 = vmatpush1.msra.mxu0 %v7210_v46  ;;  %2940 = vmatprep.subr.mxu1 %v7211_v2  ;;  %v7231_v46 = vand.u32 4294901760, %v7230_v24  ;;  %v7232_v2 = vld [vmem:[#allocation45_spill] sm:$0xff]  ;;  %v7233_v23 = vld [vmem:[#allocation67_spill] sm:$0xff]  ;;  %v7251_v24 = vld [vmem:[#allocation54_spill] sm:$0xff] }
 0x1d7   : > { %2741 = vmatprep.subr.mxu0 %v7213_v13  ;;  %2942 = vmatpush1.msra.mxu1 %v7214_v52  ;;  %v7234_v13 = vand.u32 4294901760, %v7233_v23  ;;  %v7235_v52 = vld [vmem:[#allocation51_spill] sm:$0xff]  ;;  %v7255_v23 = vld [vmem:[#allocation60_spill] sm:$0xff]  ;;  %v7297_v58 = vld [vmem:[#allocation113_spill] sm:$0xff] }
 0x1d8   : > { %2745 = vmatpush1.msra.mxu0 %v7216_v20  ;;  %2944 = vmatprep.subr.mxu1 %v7217_v48  ;;  %v7237_v20 = vand.u32 4294901760, %v7236_v19  ;;  %v7238_v48 = vld [vmem:[#allocation49_spill] sm:$0xff]  ;;  %v7259_v19 = vld [vmem:[#allocation62_spill] sm:$0xff] }
 0x1d9   : > { %2749 = vmatprep.subr.mxu0 %v7219_v34  ;;  %2946 = vmatpush1.msra.mxu1 %v7220_v44  ;;  %v7240_v34 = vand.u32 4294901760, %v7239_v4  ;;  %v7241_v44 = vld [vmem:[#allocation46_spill] sm:$0xff]  ;;  %v7265_v4 = vld [vmem:[#allocation73_spill] sm:$0xff] }
 0x1da   : > { %2753 = vmatpush1.msra.mxu0 %v7222_v0  ;;  %2948 = vmatprep.subr.mxu1 %v7223_v7  ;;  %v7243_v0 = vld [vmem:[#allocation53_spill] sm:$0xff]  ;;  %v7244_v7 = vld [vmem:[#allocation75_spill] sm:$0xff] }
 0x1db   : > { %2757 = vmatprep.subr.mxu0 %v7225_v27  ;;  %2950 = vmatpush1.msra.mxu1 %v7226_v59  ;;  %v7245_v15 = vand.u32 4294901760, %v7244_v7  ;;  %v7246_v27 = vld [vmem:[#allocation52_spill] sm:$0xff]  ;;  %v7247_v59 = vand.u32 4294901760, %v7137_v56  ;;  %v7256_v56 = vand.u32 4294901760, %v7144_v14  ;;  %v7264_v14 = vand.u32 4294901760, %v7150_v10  ;;  %v7276_v7 = vld [vmem:[#allocation78_spill] sm:$0xff] }
 0x1dc   : > { %2761 = vmatpush1.msra.mxu0 %v7228_v54  ;;  %2952 = vmatprep.subr.mxu1 %v7229_v39  ;;  %v7249_v54 = vld [vmem:[#allocation72_spill] sm:$0xff]  ;;  %v7272_v10 = vand.u32 4294901760, %v7154_v40  ;;  %v7279_v40 = vand.u32 4294901760, %v7157_v17  ;;  %v7283_v17 = vand.u32 4294901760, %v5602_v5 }
 0x1dd   : > { %2765 = vmatprep.subr.mxu0 %v7231_v46  ;;  %2954 = vmatpush1.msra.mxu1 %v7232_v2  ;;  %v7250_v39 = vand.u32 4294901760, %v7249_v54  ;;  %v7253_v46 = vld [vmem:[#allocation61_spill] sm:$0xff]  ;;  %v7254_v2 = vand.u32 4294901760, %v7143_v18  ;;  %v7262_v18 = vand.u32 4294901760, %v7149_v35  ;;  %v7270_v35 = vand.u32 4294901760, %v7153_v53 }
 0x1de   : > { %2769 = vmatpush1.msra.mxu0 %v7234_v13  ;;  %2956 = vmatprep.subr.mxu1 %v7235_v52  ;;  %v7257_v13 = vld [vmem:[#allocation65_spill] sm:$0xff]  ;;  %v7258_v52 = vand.u32 4294901760, %v7146_v6  ;;  %v7266_v6 = vand.u32 4294901760, %v7151_v21  ;;  %v7274_v21 = vand.u32 4294901760, %v7155_v63  ;;  %v7277_v53 = vand.u32 4294901760, %v5486_v16  ;;  %v7293_v16 = vld [vmem:[#allocation108_spill] sm:$0xff] }
 0x1df   : > { %2773 = vmatprep.subr.mxu0 %v7237_v20  ;;  %2958 = vmatpush1.msra.mxu1 %v7238_v48  ;;  %v7261_v20 = vld [vmem:[#allocation69_spill] sm:$0xff]  ;;  %v7263_v48 = vld [vmem:[#allocation68_spill] sm:$0xff]  ;;  %v7280_v63 = vand.u32 4294901760, %v7158_v26  ;;  %v7285_v26 = vand.u32 4294901760, %v5620_v36 }
 0x1e0   : > { %2777 = vmatpush2.msra.mxu0 %v7240_v34  ;;  %2960 = vmatprep.subr.mxu1 %v7241_v44  ;;  %v7267_v34 = vld [vmem:[#allocation70_spill] sm:$0xff]  ;;  %v7269_v44 = vld [vmem:[#allocation77_spill] sm:$0xff] }
 0x1e1   : > { %2781 = vmatprep.subr.mxu0 %v7242_v31  ;;  %2962 = vmatpush1.msra.mxu1 %v7243_v0  ;;  %v7271_v31 = vld [vmem:[#allocation85_spill] sm:$0xff] }
 0x1e2   : > { %2785 = vmatpush2.msra.mxu0 %v7245_v15  ;;  %2964 = vmatprep.subr.mxu1 %v7246_v27  ;;  %v7273_v0 = vld [vmem:[#allocation81_spill] sm:$0xff]  ;;  %v7278_v15 = vld [vmem:[#allocation88_spill] sm:$0xff] }
 0x1e3   : > { %2789 = vmatprep.subr.mxu0 %v7247_v59  ;;  %2966 = vmatpush1.msra.mxu1 %v7248_v49 }
 0x1e4   : > { %2793 = vmatpush2.msra.mxu0 %v7250_v39  ;;  %2968 = vmatprep.subr.mxu1 %v7251_v24 }
 0x1e5   : > { %2797 = vmatprep.subr.mxu0 %v7252_v62  ;;  %2970 = vmatpush1.msra.mxu1 %v7253_v46 }
 0x1e6   : > { %2801 = vmatpush2.msra.mxu0 %v7254_v2  ;;  %2972 = vmatprep.subr.mxu1 %v7255_v23 }
 0x1e7   : > { %2805 = vmatprep.subr.mxu0 %v7256_v56  ;;  %2974 = vmatpush2.msra.mxu1 %v7257_v13 }
 0x1e8   : > { %2809 = vmatpush2.msra.mxu0 %v7258_v52  ;;  %2976 = vmatprep.subr.mxu1 %v7259_v19 }
 0x1e9   : > { %2813 = vmatprep.subr.mxu0 %v7260_v42  ;;  %2978 = vmatpush2.msra.mxu1 %v7261_v20 }
 0x1ea   : > { %2817 = vmatpush2.msra.mxu0 %v7262_v18  ;;  %2980 = vmatprep.subr.mxu1 %v7263_v48 }
 0x1eb   : > { %2821 = vmatprep.subr.mxu0 %v7264_v14  ;;  %2982 = vmatpush2.msra.mxu1 %v7265_v4 }
 0x1ec   : > { %2825 = vmatpush2.msra.mxu0 %v7266_v6  ;;  %2984 = vmatprep.subr.mxu1 %v7267_v34 }
 0x1ed   : > { %2829 = vmatprep.subr.mxu0 %v7268_v11  ;;  %2986 = vmatpush2.msra.mxu1 %v7269_v44 }
 0x1ee   : > { %2833 = vmatpush2.msra.mxu0 %v7270_v35  ;;  %2988 = vmatprep.subr.mxu1 %v7271_v31 }
 0x1ef   : > { %2837 = vmatprep.subr.mxu0 %v7272_v10  ;;  %2990 = vmatpush2.msra.mxu1 %v7273_v0 }
 0x1f0   : > { %2841 = vmatpush2.msra.mxu0 %v7274_v21  ;;  %2992 = vmatprep.subr.mxu1 %v5318_v38  ;;  %v7282_v38 = vand.u32 4294901760, %v5558_v22  ;;  %v7286_v22 = vand.u32 4294901760, %v5591_v29  ;;  %v998_v29 = vpop.f32.mrf.mxu1 }
 0x1f1   : > { %2845 = vmatprep.subr.mxu0 %v7275_v43  ;;  %2994 = vmatpush2.msra.mxu1 %v7276_v7 }
 0x1f2   : > { %2849 = vmatpush2.msra.mxu0 %v7277_v53  ;;  %2996 = vmatprep.subr.mxu1 %v7278_v15  ;;  %v1000_v36 = vpop.f32.mrf.mxu1 }
 0x1f3   : > { %2853 = vmatprep.subr.mxu0 %v7279_v40  ;;  %2998 = vmatpush2.msra.mxu1 %v5341_v28  ;;  %v7284_v28 = vand.u32 4294901760, %v5579_v57  ;;  %v605_v57 = vpop.f32.mrf.mxu0 }
 0x1f4   : > { %2857 = vmatpush2.msra.mxu0 %v7280_v63  ;;  %3000 = vmatprep.subr.mxu1 %v5381_v8  ;;  %v7287_v8 = vand.u32 4294901760, %v5637_v3 }
 0x1f5   : > { %2861 = vmatprep.subr.mxu0 %v7281_v37  ;;  %3002 = vmatpush2.msra.mxu1 %v5366_v25  ;;  %v7288_v25 = vand.u32 4294901760, %v5641_v60  ;;  %v7296_v60 = vld [vmem:[#allocation115_spill] sm:$0xff] }
 0x1f6   : > { %2865 = vmatpush2.msra.mxu0 %v7282_v38  ;;  %3004 = vmatprep.subr.mxu1 %v5422_v9  ;;  %v7290_v9 = vand.u32 4294901760, %v5653_v33  ;;  %v1342_v33 = vpop.f32.mrf.mxu1 }
 0x1f7   : > { %2869 = vmatprep.subr.mxu0 %v7283_v17  ;;  %3006 = vmatpush2.msra.mxu1 %v5404_v47  ;;  %v7289_v47 = vld [vmem:[#allocation13_spill] sm:$0xff] }
 0x1f8   : > { %2873 = vmatpush2.msra.mxu0 %v7284_v28  ;;  %3008 = vmatprep.subr.mxu1 %v5447_v32  ;;  %v7291_v32 = vld [vmem:[#allocation112_spill] sm:$0xff]  ;;  %v1344_v27 = vpop.f32.mrf.mxu1 }
 0x1f9   : > { %2877 = vmatprep.subr.mxu0 %v7285_v26  ;;  %3010 = vmatpush2.msra.mxu1 %v5431_v50  ;;  %v7292_v50 = vand.u32 4294901760, %v5657_v12 }
 0x1fa   : > { %2881 = vmatpush2.msra.mxu0 %v7286_v22  ;;  %3012 = vmatprep.subr.mxu1 %v5497_v61  ;;  %v7294_v61 = vld [vmem:[#allocation116_spill] sm:$0xff]  ;;  %v1744_v49 = vpop.f32.mrf.mxu1 }
 0x1fb   : > { %2885 = vmatprep.subr.mxu0 %v7287_v8  ;;  %3014 = vmatpush2.msra.mxu1 %v5472_v45  ;;  %v7295_v45 = vld [vmem:[#allocation111_spill] sm:$0xff] }
 0x1fc   : > { %2889 = vmatpush2.msra.mxu0 %v7288_v25  ;;  %3016 = vmatprep.subr.mxu1 %v7289_v47  ;;  %v7298_v47 = vld [vmem:[#allocation14_spill] sm:$0xff] }
 0x1fd   : > { %2893 = vmatprep.subr.mxu0 %v7290_v9  ;;  %2899 = vmatprep.mubr.f32.mxu0 %v7291_v32 }
 0x1fe   : > { %2897 = vmatpush2.msra.mxu0 %v7292_v50  ;;  %3018 = vmatpush2.msra.mxu1 %v7293_v16 }
 0x1ff   : > { %2901 = vmatmul.mubr.f32.vlgmr.msra.gmra.mxu0 %v7294_v61  ;;  %3020 = vmatprep.subr.mxu1 %v5560_v41  ;;  %v607_v41 = vpop.f32.mrf.mxu0 }
 0x200   : > { %3022 = vmatpush2.msra.mxu1 %v7295_v45  ;;  %3036 = vmatprep.mubr.f32.mxu1 %v7291_v32 }
 0x201   : > { %3024 = vmatprep.subr.mxu1 %v7296_v60  ;;  %v1201_v5 = vpop.f32.mrf.mxu0 }
 0x202   : > { %3026 = vmatpush2.msra.mxu1 %v7297_v58 }
 0x203   : > { %3028 = vmatprep.subr.mxu1 %v5595_v30  ;;  %v1203_v3 = vpop.f32.mrf.mxu0  ;;  %v999_v30 = vadd.f32 %v998_v29, %v605_v57 }
 0x204   : > { %3030 = vmatpush2.msra.mxu1 %v5609_v55  ;;  %v1001_v55 = vadd.f32 %v1000_v36, %v607_v41 }
 0x205   : > { %3032 = vmatprep.subr.mxu1 %v5616_v1  ;;  %v1607_v12 = vpop.f32.mrf.mxu0  ;;  %v1202_v39 = vadd.f32 %v1201_v5, %v999_v30  ;;  %v1746_v1 = vpop.f32.mrf.mxu1 }
 0x206   : > { %3034 = vmatpush2.msra.mxu1 %v5626_v51  ;;  %v1204_v24 = vadd.f32 %v1203_v3, %v1001_v55 }
 0x207   : > { %3038 = vmatmul.mubr.f32.vlgmr.msra.gmra.mxu1 %v7294_v61  ;;  %v1609_v59 = vpop.f32.mrf.mxu0  ;;  %v1343_v51 = vadd.f32 %v1342_v33, %v1202_v39 }
 0x208   : > { %v1345_v2 = vadd.f32 %v1344_v27, %v1204_v24 }
 0x209   : > { %v1608_v23 = vadd.f32 %v1607_v12, %v1343_v51 }
 0x20a   : > { %v1610_v13 = vadd.f32 %v1609_v59, %v1345_v2 }
 0x20b   : > { %v1745_v52 = vadd.f32 %v1744_v49, %v1608_v23 }
 0x20c   : > { %v1747_v42 = vadd.f32 %v1746_v1, %v1610_v13 }
 0x23f   : > { %v1900_v54 = vpop.f32.mrf.mxu0 }
 0x240   : > { %v1901_v20 = vadd.f32 %v1900_v54, %v1745_v52 }
 0x241   : > { %v1902_v62 = vpop.f32.mrf.mxu0  ;;  %v2293_v46 = vpop.f32.mrf.mxu1 }
 0x242   : > { %v1903_v14 = vadd.f32 %v1902_v62, %v1747_v42  ;;  %v2294_v4 = vadd.f32 %v2293_v46, %v1901_v20 }
 0x243   : > { %v2295_v19 = vpop.f32.mrf.mxu1 }
 0x244   : > { %v2296_v34 = vadd.f32 %v2295_v19, %v1903_v14 }
 0x27f   : > { %v2496_v56 = vpop.f32.mrf.mxu0 }
 0x280   : > { %v2497_v11 = vadd.f32 %v2496_v56, %v2294_v4 }
 0x281   : > { %v2498_v18 = vpop.f32.mrf.mxu0 }
 0x282   : > { %v2499_v35 = vadd.f32 %v2498_v18, %v2296_v34 }
 0x285   : > { %v2637_v48 = vpop.f32.mrf.mxu1 }
 0x286   : > { %v2638_v31 = vadd.f32 %v2637_v48, %v2497_v11 }
 0x287   : > { %v2639_v44 = vpop.f32.mrf.mxu1 }
 0x288   : > { %v2640_v0 = vadd.f32 %v2639_v44, %v2499_v35 }
 0x2bf   : > { %v2902_v6 = vpop.f32.mrf.mxu0 }
 0x2c0   : > { %v2903_v21 = vadd.f32 %v2902_v6, %v2638_v31 }
 0x2c1   : > { %v2904_v10 = vpop.f32.mrf.mxu0 }
 0x2c2   : > { %v2905_v7 = vadd.f32 %v2904_v10, %v2640_v0 }
 0x2c7   : > { %v3039_v43 = vpop.f32.mrf.mxu1 }
 0x2c8   : > { %v3040_v53 = vadd.f32 %v3039_v43, %v2903_v21 }
 0x2c9   : > { %v3041_v15 = vpop.f32.mrf.mxu1 }
 0x2ca   : > { %v3199_v40 = vmul.f32 -1.442695, %v3040_v53  ;;  %v3042_v63 = vadd.f32 %v3041_v15, %v2905_v7 }
 0x2cc   : > { %3285 = vpow2.f32 %v3199_v40  ;;  %v3200_v37 = vmul.f32 -1.442695, %v3042_v63 }
 0x2ce   : > { %3287 = vpow2.f32 %v3200_v37 }
 0x2d9   : > { %v3286_v38 = vpop.eup %3285 }
 0x2da   : > { %v3050_v17 = vadd.f32 1.0, %v3286_v38 }
 0x2db   : > { %v3288_v28 = vpop.eup %3287 }
 0x2dc   : > { %v3051_v26 = vadd.f32 1.0, %v3288_v28  ;;  %3289 = vrcp.f32 %v3050_v17 }
 0x2de   : > { %3291 = vrcp.f32 %v3051_v26 }
 0x2e9   : > { %v3290_v22 = vpop.eup %3289 }
 0x2eb   : > { %v3292_v8 = vpop.eup %3291 }
 0x2ec   : > { %v3058_v25 = vcombine.low %v3290_v22, %v3292_v8 }
 0x2ee   : > { %v3065_v9 = vrot.slane %v3058_v25, %v7298_v47 }
 0x2f0   : > { %v3072_v32 = vrot.slane %v3065_v9, %v7298_v47 }
 0x2f2   : > { %3078 = vst.msk [vmem:[%s190_s21] sm:$0x3] %vm4463_vm1, %v3072_v32 }
 0x2f3   : > { %3360 = shalt.err (!%p3357_p5)
}
 0x2f4   : > { %s3361_s30 = scalar_lea.hbm %s3092_s26, 32  ;;  %s3365_s4 = scalar_lea.hbm %s6093_s2, 64 }
 0x2f5   : > { %p3362_p7 = scmp.ne.s32.totalorder %s3092_s26, %s3361_s30  ;;  %p3366_p9 = scmp.lt.s32.totalorder %s3092_s26, %s6093_s2 }
 0x2f6   : > { %p3367_p11 = scmp.lt.s32.totalorder %s3365_s4, %s3361_s30 }
 0x2f7   : > { %p3363_p6 = pnand %p3362_p7, %p3541_p13 }
 0x2f8   : > { %p3368_p10 = por %p3367_p11, %p3366_p9 }
 0x2f9   : > { %p3364_p4 = pneg %p3363_p6 }
 0x2fb   : > { %p3369_p1 = pnand %p3368_p10, %p3364_p4 }
 0x2fd   : > { %3372 = shalt.err (!%p3369_p1)
}
 0x2fe   : > { %3214 = dma.vmem_to_hbm [thread:$0]  (%p3541_p13), %s3095_s22, 32, %s3092_s26, %s3080_s27  }
 0x2ff PF: > { %s3106_s16 = sand.u32 1, %s3411_s9   ;;  %p7300_p8 = scmp.ne.s32.totalorder %s6509_s20, 0 }
 0x300   : > { %p7301_p12 = scmp.ge.s32.totalorder %s3431_s14, 2  ;;  %s3107_s17 = scalar_lea.sflag [#allocation6], %s3106_s16 }
 0x302   : > { %p3225_p0 = pnand %p7301_p12, %p7300_p8 }
 0x304   : > { %p3226_p2 = pneg %p3225_p0 }
 0x306   : > { %3406 = dma.done.wait (%p3226_p2), %s3107_s17, 32  }
 0x307   : > { %3408 = vsyncadd (%p3226_p2), %s3107_s17, 4294967264  ;;  %s19_s14 = sadd.s32 1, %s3431_s14   ;;  %s7302_s9 = smov %s3415_s10 }
 0x308   : > { %p16_p3 = scmp.ge.s32.totalorder %s19_s14, 4   ;;  %s7303_s10 = smov %s3419_s11 }
 0x309   : > { %s7304_s11 = smov %s3550_s15  ;;  %s7305_s12 = smov %s3427_s13 }
 0x30a   : > { %s7306_s13 = smov %s7308_s25  ;;  %18 = sbr.rel (!%p16_p3) target bundleno = 7 (0x7), region = 91 }
 0x30f   :  { %3112 = vsyncpa [#allocation5], 1 }
 0x310   :  { %3114 = vsyncpa [#allocation5 + $0x1], 1 }
 0x311   :  { %3115 = vsyncpa [#allocation8], 1 }
 0x312   :  { %3117 = vsyncpa [#allocation8 + $0x1], 1 }
 0x313   :  { %3118 = vsyncpa [#allocation6], 1 }
 0x314   :  { %3120 = vsyncpa [#allocation6 + $0x1], 1 }

</bundles_post_ra>
